<compile_context>
chip_gen: v7x
topology: tpu7x:2x2x1
jax: 0.10.0
libtpu: 0.0.40
codegen_flags: <defaults>
</compile_context>

<pallas_src>
import functools

import jax
import jax.numpy as jnp
import numpy as np
from jax import lax
from jax.experimental import pallas as pl
from jax.experimental.pallas import tpu as pltpu

_EPS = 1e-5
_SLOPE = 0.2


def _round_up(x, m):
    return (x + m - 1) // m * m


@functools.lru_cache(maxsize=1)
def _vmem_budget():
    """VMEM budget (bytes): ~3/4 of physical, capped at 100 MiB."""
    cap = 64 * 1024 * 1024
    try:
        info = pltpu.get_tpu_info()
        cap = int(getattr(info, "vmem_capacity_bytes", cap))
    except Exception:
        pass
    return int(min(cap * 3 // 4, 100 * 1024 * 1024))


def _pick_tm(m, k, cout, budget):
    """Largest M-tile whose (double-buffered) working set fits the budget."""
    m8 = _round_up(m, 8)
    cands = ([m8] if m8 <= 1024 else []) + [1024, 512, 256, 128, 64, 32, 16, 8]
    for tm in cands:
        if tm > m8:
            continue
        need = (2 * tm * k * 2          # bf16 patch tile, double-buffered
                + 2 * k * cout * 2      # bf16 weight (conservatively x2)
                + 2 * tm * cout * 2     # bf16 output tile, double-buffered
                + 4 * 2 * cout * 4      # per-tile stats blocks
                + (1 << 20))            # slack
        if need <= budget:
            return tm
    return 8


# ---------------------------- Pallas kernels ---------------------------------

def _conv_mm_kernel(p_ref, w_ref, y_ref, *maybe_stats, with_stats):
    """bf16 matmul (f32 accumulation); optional per-M-tile BN partial stats.

    Padded (zero) patch rows produce y == 0 and therefore contribute nothing
    to sum / sum-of-squares, so the stats stay exact without masking.
    """
    y = jnp.dot(p_ref[...], w_ref[...], preferred_element_type=jnp.float32)
    y_ref[...] = y.astype(y_ref.dtype)
    if with_stats:
        stats_ref = maybe_stats[0]
        s = jnp.sum(y, axis=0, keepdims=True)
        ss = jnp.sum(y * y, axis=0, keepdims=True)
        stats_ref[...] = jnp.concatenate([s, ss], axis=0)[None]


def _bn_lrelu_tmean_kernel(y_ref, scale_ref, shift_ref, o_ref, *, inv_t):
    """Last-layer BN apply + LeakyReLU fused into the temporal mean."""
    y = y_ref[...].astype(jnp.float32) * scale_ref[...] + shift_ref[...]
    y = jnp.where(y > 0, y, _SLOPE * y)
    o_ref[...] = jnp.sum(y, axis=1) * inv_t


# ------------------------------ pallas wrappers -------------------------------

def conv_matmul(patches, w_mat, with_stats):
    """(M, K) bf16 @ (K, C) bf16 -> (M, C) bf16 [+ per-tile stats (nt, 2, C)]."""
    m, k = patches.shape
    cout = w_mat.shape[1]
    budget = _vmem_budget()
    tm = _pick_tm(m, k, cout, budget)
    m_pad = _round_up(m, tm)
    if m_pad != m:
        patches = jnp.pad(patches, ((0, m_pad - m), (0, 0)))
    n_tiles = m_pad // tm

    in_specs = [pl.BlockSpec((tm, k), lambda i: (i, 0)),
                pl.BlockSpec((k, cout), lambda i: (0, 0))]
    if with_stats:
        out_shape = (jax.ShapeDtypeStruct((m_pad, cout), jnp.bfloat16),
                     jax.ShapeDtypeStruct((n_tiles, 2, cout), jnp.float32))
        out_specs = (pl.BlockSpec((tm, cout), lambda i: (i, 0)),
                     pl.BlockSpec((1, 2, cout), lambda i: (i, 0, 0)))
    else:
        out_shape = jax.ShapeDtypeStruct((m_pad, cout), jnp.bfloat16)
        out_specs = pl.BlockSpec((tm, cout), lambda i: (i, 0))

    res = pl.pallas_call(
        functools.partial(_conv_mm_kernel, with_stats=with_stats),
        out_shape=out_shape,
        grid=(n_tiles,),
        in_specs=in_specs,
        out_specs=out_specs,
        compiler_params=pltpu.CompilerParams(
            dimension_semantics=("parallel",),   # per-tile stats -> megacore OK
            vmem_limit_bytes=budget),
    )(patches, w_mat)

    if with_stats:
        y, stats = res
        return y[:m], jnp.sum(stats, axis=0)     # (2, C) tiny JAX reduce
    return res[:m], None


def bn_lrelu_temporal_mean(y, scale, shift):
    """y: (N, T, HW, C) bf16 raw conv output -> (N, HW, C) f32 mean_T(act(y))."""
    n, t, hw, c = y.shape
    return pl.pallas_call(
        functools.partial(_bn_lrelu_tmean_kernel, inv_t=1.0 / t),
        out_shape=jax.ShapeDtypeStruct((n, hw, c), jnp.float32),
        grid=(n,),
        in_specs=[pl.BlockSpec((1, t, hw, c), lambda i: (i, 0, 0, 0)),
                  pl.BlockSpec((1, c), lambda i: (0, 0)),
                  pl.BlockSpec((1, c), lambda i: (0, 0))],
        out_specs=pl.BlockSpec((1, hw, c), lambda i: (i, 0, 0)),
        compiler_params=pltpu.CompilerParams(
            dimension_semantics=("parallel",),
            vmem_limit_bytes=_vmem_budget()),
    )(y, scale.reshape(1, c), shift.reshape(1, c))


# ------------------------------- glue (JAX) -----------------------------------

def act_im2col(x_nhwc, scale, shift, *, apply_act, k=4, s=2, p=1):
    """[optional BN scale/shift + LeakyReLU] then 4x4/s2/p1 patches in bf16.

    The elementwise activation fuses (under jit) into the im2col gather, so
    the previous layer's output is only read once from HBM.  Column order is
    (ci, kh, kw), matching the flattened (Cout, Cin*4*4) weight.
    """
    x = x_nhwc.astype(jnp.float32)
    if apply_act:
        if scale is not None:
            x = x * scale + shift
        x = jnp.where(x > 0, x, _SLOPE * x)
    b, h, w, c = x.shape
    ho = (h + 2 * p - k) // s + 1
    wo = (w + 2 * p - k) // s + 1
    xp = jnp.pad(x, ((0, 0), (p, p), (p, p), (0, 0)))
    cols = [xp[:, kh:kh + s * ho:s, kw:kw + s * wo:s, :]
            for kh in range(k) for kw in range(k)]
    pt = jnp.stack(cols, axis=-1)                       # (B, Ho, Wo, C, 16)
    m = b * ho * wo
    return pt.reshape(m, c * k * k).astype(jnp.bfloat16), m, ho, wo


def _wmat(w_oihw):
    cout = w_oihw.shape[0]
    return jnp.reshape(w_oihw, (cout, -1)).T.astype(jnp.bfloat16)   # (Cin*16, Cout)


def _bn_scale_shift(stats, m, gamma, beta):
    """Training-mode batch stats (biased variance) -> per-channel scale/shift."""
    count = jnp.float32(m)
    mean = stats[0] / count
    var = stats[1] / count - mean * mean
    scale = gamma * lax.rsqrt(var + _EPS)
    shift = beta - mean * scale
    return scale, shift


def init_params(key, ndf):
    ks = jax.random.split(key, 4)
    w1 = jax.random.normal(ks[0], (ndf, 3, 4, 4), jnp.float32) * 0.05
    w2 = jax.random.normal(ks[1], (ndf * 2, ndf, 4, 4), jnp.float32) * 0.05
    w3 = jax.random.normal(ks[2], (ndf * 4, ndf * 2, 4, 4), jnp.float32) * 0.05
    w4 = jax.random.normal(ks[3], (ndf * 8, ndf * 4, 4, 4), jnp.float32) * 0.05

    def bn(c):  # PyTorch BatchNorm2d default init: weight=1, bias=0
        return jnp.ones((c,), jnp.float32), jnp.zeros((c,), jnp.float32)

    g2, b2 = bn(ndf * 2)
    g3, b3 = bn(ndf * 4)
    g4, b4 = bn(ndf * 8)
    return dict(w1=w1, w2=w2, w3=w3, w4=w4,
                g2=g2, b2=b2, g3=g3, b3=b3, g4=g4, b4=b4)


def stage1_d_sty_v2_forward(params, story):
    """story: (N, C, video_len, W, H) f32 -> (N, ndf*8, W/16, H/16) f32."""
    n, c, t, w, h = story.shape
    # story.permute(0,2,1,3,4).contiguous().view(-1, C, W, H), then NCHW -> NHWC
    x = jnp.transpose(story, (0, 2, 1, 3, 4)).reshape(n * t, c, w, h)
    x = jnp.transpose(x, (0, 2, 3, 1))
    b = n * t

    # layer 1: conv only (its LeakyReLU is applied by layer 2's patch build)
    p, m1, h1, w1 = act_im2col(x, None, None, apply_act=False)
    y1, _ = conv_matmul(p, _wmat(params['w1']), with_stats=False)
    y1 = y1.reshape(b, h1, w1, -1)

    # layer 2: input act = LeakyReLU; output gets BN stats fused in-kernel
    p, m2, h2, w2 = act_im2col(y1, None, None, apply_act=True)
    y2, s2 = conv_matmul(p, _wmat(params['w2']), with_stats=True)
    sc2, sh2 = _bn_scale_shift(s2, m2, params['g2'], params['b2'])
    y2 = y2.reshape(b, h2, w2, -1)

    # layer 3: input act = BN2 + LeakyReLU (fused into the im2col gather)
    p, m3, h3, w3 = act_im2col(y2, sc2, sh2, apply_act=True)
    y3, s3 = conv_matmul(p, _wmat(params['w3']), with_stats=True)
    sc3, sh3 = _bn_scale_shift(s3, m3, params['g3'], params['b3'])
    y3 = y3.reshape(b, h3, w3, -1)

    # layer 4
    p, m4, h4, w4 = act_im2col(y3, sc3, sh3, apply_act=True)
    y4, s4 = conv_matmul(p, _wmat(params['w4']), with_stats=True)
    sc4, sh4 = _bn_scale_shift(s4, m4, params['g4'], params['b4'])

    c4 = params['w4'].shape[0]
    # squeeze()s in the PyTorch forward are no-ops for these shapes.
    y4 = y4.reshape(n, t, h4 * w4, c4)
    out = bn_lrelu_temporal_mean(y4, sc4, sh4)          # BN4+LReLU+mean over T
    out = out.reshape(n, h4, w4, c4)
    return jnp.transpose(out, (0, 3, 1, 2))             # back to NCHW


# ------------------------ pure-JAX reference for checking ---------------------

def reference_forward(params, story):
    n, c, t, w, h = story.shape
    x = jnp.transpose(story, (0, 2, 1, 3, 4)).reshape(n * t, c, w, h)
    x = jnp.transpose(x, (0, 2, 3, 1))

    def conv(x, wgt):  # same bf16-in / f32-accumulate numerics as the kernels
        w_hwio = jnp.transpose(wgt, (2, 3, 1, 0)).astype(jnp.bfloat16)
        return lax.conv_general_dilated(
            x.astype(jnp.bfloat16), w_hwio, window_strides=(2, 2),
            padding=((1, 1), (1, 1)),
            dimension_numbers=('NHWC', 'HWIO', 'NHWC'),
            preferred_element_type=jnp.float32)

    def lrelu(x):
        return jnp.where(x > 0, x, _SLOPE * x)

    def bn_lrelu(x, g, bb):
        mean = jnp.mean(x, axis=(0, 1, 2))
        var = jnp.mean(x * x, axis=(0, 1, 2)) - mean * mean
        out = (x - mean) * lax.rsqrt(var + _EPS) * g + bb
        return lrelu(out)

    x = lrelu(conv(x, params['w1']))
    x = bn_lrelu(conv(x, params['w2']), params['g2'], params['b2'])
    x = bn_lrelu(conv(x, params['w3']), params['g3'], params['b3'])
    x = bn_lrelu(conv(x, params['w4']), params['g4'], params['b4'])
    _, h4, w4, c4 = x.shape
    x = x.reshape(n, t, h4, w4, c4).mean(axis=1)
    return jnp.transpose(x, (0, 3, 1, 2))


# ----------------------------------- main --------------------------------------

if __name__ == "__main__":
    key = jax.random.PRNGKey(0)
    kp, kx = jax.random.split(key)

    ndf = 8                             # cfg.GAN.DF_DIM (small synthetic value)
    N, C, T, W, H = 2, 3, 4, 32, 32     # story: (N, C, video_len, W, H)

    params = init_params(kp, ndf)
    story = jax.random.normal(kx, (N, C, T, W, H), jnp.float32)

    fwd = jax.jit(stage1_d_sty_v2_forward)
    out = jax.block_until_ready(fwd(params, story))
    assert out.shape == (N, ndf * 8, W // 16, H // 16)

    ref = reference_forward(params, story)
    np.testing.assert_allclose(np.asarray(out), np.asarray(ref),
                               rtol=2.5e-2, atol=2.5e-2)

    print("KERNEL_OK")
</pallas_src>

<mosaic_0001>
module attributes {stable_mosaic.version = 11 : i64} {
  func.func @_conv_mm_kernel(%arg0: i32, %arg1: memref<1024x48xbf16, #tpu.memory_space<vmem>>, %arg2: memref<48x8xbf16, #tpu.memory_space<vmem>>, %arg3: memref<1024x8xbf16, #tpu.memory_space<vmem>>) attributes {dimension_semantics = [#tpu.dimension_semantics<parallel>], iteration_bounds = array<i64: 2>, scalar_prefetch = 0 : i64, scratch_operands = 0 : i64, tpu.core_type = #tpu.core_type<tc>, window_params = [{transform_indices = @transform_0, window_bounds = array<i64: 1024, 48>}, {pipeline_mode = #tpu.pipeline_mode<synchronous>, transform_indices = @transform_1, window_bounds = array<i64: 48, 8>}, {transform_indices = @transform_2, window_bounds = array<i64: 1024, 8>}]} {
    %c0 = arith.constant 0 : index
    %c0_0 = arith.constant 0 : index
    %0 = vector.load %arg1[%c0, %c0_0] : memref<1024x48xbf16, #tpu.memory_space<vmem>>, vector<1024x48xbf16>
    %c0_1 = arith.constant 0 : index
    %c0_2 = arith.constant 0 : index
    %1 = vector.load %arg2[%c0_1, %c0_2] : memref<48x8xbf16, #tpu.memory_space<vmem>>, vector<48x8xbf16>
    %cst = arith.constant dense<0.000000e+00> : vector<1024x8xf32>
    %2 = tpu.matmul %0, %1, %cst {dimension_numbers = #tpu.dot_dimension_numbers<[1], [0], [0], [1], [0, 0, 1, 1], [], []>} : vector<1024x48xbf16>, vector<48x8xbf16>, vector<1024x8xf32> -> vector<1024x8xf32>
    %3 = arith.truncf %2 : vector<1024x8xf32> to vector<1024x8xbf16>
    %c0_3 = arith.constant 0 : index
    %c0_4 = arith.constant 0 : index
    %4 = vector.load %arg3[%c0_3, %c0_4] : memref<1024x8xbf16, #tpu.memory_space<vmem>>, vector<1024x8xbf16>
    tpu.vector_store %arg3[%c0_3, %c0_4], %3 {strides = array<i32>} : memref<1024x8xbf16, #tpu.memory_space<vmem>>, vector<1024x8xbf16>,
    return
  }
  func.func @transform_0(%arg0: i32) -> (i32, i32) {
    %c0_i32 = arith.constant 0 : i32
    %c0_i32_0 = arith.constant 0 : i32
    return %arg0, %c0_i32 : i32, i32
  }
  func.func @transform_1(%arg0: i32) -> (i32, i32) {
    %c0_i32 = arith.constant 0 : i32
    %c0_i32_0 = arith.constant 0 : i32
    %c0_i32_1 = arith.constant 0 : i32
    return %c0_i32, %c0_i32_0 : i32, i32
  }
  func.func @transform_2(%arg0: i32) -> (i32, i32) {
    %c0_i32 = arith.constant 0 : i32
    %c0_i32_0 = arith.constant 0 : i32
    return %arg0, %c0_i32 : i32, i32
  }
}

module attributes {stable_mosaic.version = 11 : i64} {
  func.func @_conv_mm_kernel(%arg0: i32, %arg1: memref<512x128xbf16, #tpu.memory_space<vmem>>, %arg2: memref<128x16xbf16, #tpu.memory_space<vmem>>, %arg3: memref<512x16xbf16, #tpu.memory_space<vmem>>, %arg4: memref<1x2x16xf32, #tpu.memory_space<vmem>>) attributes {dimension_semantics = [#tpu.dimension_semantics<parallel>], iteration_bounds = array<i64: 1>, scalar_prefetch = 0 : i64, scratch_operands = 0 : i64, tpu.core_type = #tpu.core_type<tc>, window_params = [{transform_indices = @transform_0, window_bounds = array<i64: 512, 128>}, {pipeline_mode = #tpu.pipeline_mode<synchronous>, transform_indices = @transform_1, window_bounds = array<i64: 128, 16>}, {transform_indices = @transform_2, window_bounds = array<i64: 512, 16>}, {transform_indices = @transform_3, window_bounds = array<i64: 1, 2, 16>}]} {
    %c0 = arith.constant 0 : index
    %c0_0 = arith.constant 0 : index
    %0 = vector.load %arg1[%c0, %c0_0] : memref<512x128xbf16, #tpu.memory_space<vmem>>, vector<512x128xbf16>
    %c0_1 = arith.constant 0 : index
    %c0_2 = arith.constant 0 : index
    %1 = vector.load %arg2[%c0_1, %c0_2] : memref<128x16xbf16, #tpu.memory_space<vmem>>, vector<128x16xbf16>
    %cst = arith.constant dense<0.000000e+00> : vector<512x16xf32>
    %2 = tpu.matmul %0, %1, %cst {dimension_numbers = #tpu.dot_dimension_numbers<[1], [0], [0], [1], [0, 0, 1, 1], [], []>} : vector<512x128xbf16>, vector<128x16xbf16>, vector<512x16xf32> -> vector<512x16xf32>
    %3 = arith.truncf %2 : vector<512x16xf32> to vector<512x16xbf16>
    %c0_3 = arith.constant 0 : index
    %c0_4 = arith.constant 0 : index
    %4 = vector.load %arg3[%c0_3, %c0_4] : memref<512x16xbf16, #tpu.memory_space<vmem>>, vector<512x16xbf16>
    tpu.vector_store %arg3[%c0_3, %c0_4], %3 {strides = array<i32>} : memref<512x16xbf16, #tpu.memory_space<vmem>>, vector<512x16xbf16>,
    %cst_5 = arith.constant dense<0.000000e+00> : vector<16xf32>
    %5 = vector.multi_reduction <add>, %2, %cst_5 [0] : vector<512x16xf32> to vector<16xf32>
    %6 = vector.shape_cast %5 : vector<16xf32> to vector<1x16xf32>
    %7 = arith.mulf %2, %2 : vector<512x16xf32>
    %cst_6 = arith.constant dense<0.000000e+00> : vector<16xf32>
    %8 = vector.multi_reduction <add>, %7, %cst_6 [0] : vector<512x16xf32> to vector<16xf32>
    %9 = vector.shape_cast %8 : vector<16xf32> to vector<1x16xf32>
    %10 = tpu.concatenate %6, %9 in 0 : vector<1x16xf32>, vector<1x16xf32> -> vector<2x16xf32>
    %11 = vector.shape_cast %10 : vector<2x16xf32> to vector<1x2x16xf32>
    %c0_7 = arith.constant 0 : index
    %c0_8 = arith.constant 0 : index
    %c0_9 = arith.constant 0 : index
    %12 = vector.load %arg4[%c0_7, %c0_8, %c0_9] : memref<1x2x16xf32, #tpu.memory_space<vmem>>, vector<1x2x16xf32>
    tpu.vector_store %arg4[%c0_7, %c0_8, %c0_9], %11 {strides = array<i32>} : memref<1x2x16xf32, #tpu.memory_space<vmem>>, vector<1x2x16xf32>,
    return
  }
  func.func @transform_0(%arg0: i32) -> (i32, i32) {
    %c0_i32 = arith.constant 0 : i32
    %c0_i32_0 = arith.constant 0 : i32
    return %arg0, %c0_i32 : i32, i32
  }
  func.func @transform_1(%arg0: i32) -> (i32, i32) {
    %c0_i32 = arith.constant 0 : i32
    %c0_i32_0 = arith.constant 0 : i32
    %c0_i32_1 = arith.constant 0 : i32
    return %c0_i32, %c0_i32_0 : i32, i32
  }
  func.func @transform_2(%arg0: i32) -> (i32, i32) {
    %c0_i32 = arith.constant 0 : i32
    %c0_i32_0 = arith.constant 0 : i32
    return %arg0, %c0_i32 : i32, i32
  }
  func.func @transform_3(%arg0: i32) -> (i32, i32, i32) {
    %c0_i32 = arith.constant 0 : i32
    %c0_i32_0 = arith.constant 0 : i32
    %c0_i32_1 = arith.constant 0 : i32
    return %arg0, %c0_i32, %c0_i32_0 : i32, i32, i32
  }
}

module attributes {stable_mosaic.version = 11 : i64} {
  func.func @_conv_mm_kernel(%arg0: i32, %arg1: memref<128x256xbf16, #tpu.memory_space<vmem>>, %arg2: memref<256x32xbf16, #tpu.memory_space<vmem>>, %arg3: memref<128x32xbf16, #tpu.memory_space<vmem>>, %arg4: memref<1x2x32xf32, #tpu.memory_space<vmem>>) attributes {dimension_semantics = [#tpu.dimension_semantics<parallel>], iteration_bounds = array<i64: 1>, scalar_prefetch = 0 : i64, scratch_operands = 0 : i64, tpu.core_type = #tpu.core_type<tc>, window_params = [{transform_indices = @transform_0, window_bounds = array<i64: 128, 256>}, {pipeline_mode = #tpu.pipeline_mode<synchronous>, transform_indices = @transform_1, window_bounds = array<i64: 256, 32>}, {transform_indices = @transform_2, window_bounds = array<i64: 128, 32>}, {transform_indices = @transform_3, window_bounds = array<i64: 1, 2, 32>}]} {
    %c0 = arith.constant 0 : index
    %c0_0 = arith.constant 0 : index
    %0 = vector.load %arg1[%c0, %c0_0] : memref<128x256xbf16, #tpu.memory_space<vmem>>, vector<128x256xbf16>
    %c0_1 = arith.constant 0 : index
    %c0_2 = arith.constant 0 : index
    %1 = vector.load %arg2[%c0_1, %c0_2] : memref<256x32xbf16, #tpu.memory_space<vmem>>, vector<256x32xbf16>
    %cst = arith.constant dense<0.000000e+00> : vector<128x32xf32>
    %2 = tpu.matmul %0, %1, %cst {dimension_numbers = #tpu.dot_dimension_numbers<[1], [0], [0], [1], [0, 0, 1, 1], [], []>} : vector<128x256xbf16>, vector<256x32xbf16>, vector<128x32xf32> -> vector<128x32xf32>
    %3 = arith.truncf %2 : vector<128x32xf32> to vector<128x32xbf16>
    %c0_3 = arith.constant 0 : index
    %c0_4 = arith.constant 0 : index
    %4 = vector.load %arg3[%c0_3, %c0_4] : memref<128x32xbf16, #tpu.memory_space<vmem>>, vector<128x32xbf16>
    tpu.vector_store %arg3[%c0_3, %c0_4], %3 {strides = array<i32>} : memref<128x32xbf16, #tpu.memory_space<vmem>>, vector<128x32xbf16>,
    %cst_5 = arith.constant dense<0.000000e+00> : vector<32xf32>
    %5 = vector.multi_reduction <add>, %2, %cst_5 [0] : vector<128x32xf32> to vector<32xf32>
    %6 = vector.shape_cast %5 : vector<32xf32> to vector<1x32xf32>
    %7 = arith.mulf %2, %2 : vector<128x32xf32>
    %cst_6 = arith.constant dense<0.000000e+00> : vector<32xf32>
    %8 = vector.multi_reduction <add>, %7, %cst_6 [0] : vector<128x32xf32> to vector<32xf32>
    %9 = vector.shape_cast %8 : vector<32xf32> to vector<1x32xf32>
    %10 = tpu.concatenate %6, %9 in 0 : vector<1x32xf32>, vector<1x32xf32> -> vector<2x32xf32>
    %11 = vector.shape_cast %10 : vector<2x32xf32> to vector<1x2x32xf32>
    %c0_7 = arith.constant 0 : index
    %c0_8 = arith.constant 0 : index
    %c0_9 = arith.constant 0 : index
    %12 = vector.load %arg4[%c0_7, %c0_8, %c0_9] : memref<1x2x32xf32, #tpu.memory_space<vmem>>, vector<1x2x32xf32>
    tpu.vector_store %arg4[%c0_7, %c0_8, %c0_9], %11 {strides = array<i32>} : memref<1x2x32xf32, #tpu.memory_space<vmem>>, vector<1x2x32xf32>,
    return
  }
  func.func @transform_0(%arg0: i32) -> (i32, i32) {
    %c0_i32 = arith.constant 0 : i32
    %c0_i32_0 = arith.constant 0 : i32
    return %arg0, %c0_i32 : i32, i32
  }
  func.func @transform_1(%arg0: i32) -> (i32, i32) {
    %c0_i32 = arith.constant 0 : i32
    %c0_i32_0 = arith.constant 0 : i32
    %c0_i32_1 = arith.constant 0 : i32
    return %c0_i32, %c0_i32_0 : i32, i32
  }
  func.func @transform_2(%arg0: i32) -> (i32, i32) {
    %c0_i32 = arith.constant 0 : i32
    %c0_i32_0 = arith.constant 0 : i32
    return %arg0, %c0_i32 : i32, i32
  }
  func.func @transform_3(%arg0: i32) -> (i32, i32, i32) {
    %c0_i32 = arith.constant 0 : i32
    %c0_i32_0 = arith.constant 0 : i32
    %c0_i32_1 = arith.constant 0 : i32
    return %arg0, %c0_i32, %c0_i32_0 : i32, i32, i32
  }
}

module attributes {stable_mosaic.version = 11 : i64} {
  func.func @_conv_mm_kernel(%arg0: i32, %arg1: memref<32x512xbf16, #tpu.memory_space<vmem>>, %arg2: memref<512x64xbf16, #tpu.memory_space<vmem>>, %arg3: memref<32x64xbf16, #tpu.memory_space<vmem>>, %arg4: memref<1x2x64xf32, #tpu.memory_space<vmem>>) attributes {dimension_semantics = [#tpu.dimension_semantics<parallel>], iteration_bounds = array<i64: 1>, scalar_prefetch = 0 : i64, scratch_operands = 0 : i64, tpu.core_type = #tpu.core_type<tc>, window_params = [{transform_indices = @transform_0, window_bounds = array<i64: 32, 512>}, {pipeline_mode = #tpu.pipeline_mode<synchronous>, transform_indices = @transform_1, window_bounds = array<i64: 512, 64>}, {transform_indices = @transform_2, window_bounds = array<i64: 32, 64>}, {transform_indices = @transform_3, window_bounds = array<i64: 1, 2, 64>}]} {
    %c0 = arith.constant 0 : index
    %c0_0 = arith.constant 0 : index
    %0 = vector.load %arg1[%c0, %c0_0] : memref<32x512xbf16, #tpu.memory_space<vmem>>, vector<32x512xbf16>
    %c0_1 = arith.constant 0 : index
    %c0_2 = arith.constant 0 : index
    %1 = vector.load %arg2[%c0_1, %c0_2] : memref<512x64xbf16, #tpu.memory_space<vmem>>, vector<512x64xbf16>
    %cst = arith.constant dense<0.000000e+00> : vector<32x64xf32>
    %2 = tpu.matmul %0, %1, %cst {dimension_numbers = #tpu.dot_dimension_numbers<[1], [0], [0], [1], [0, 0, 1, 1], [], []>} : vector<32x512xbf16>, vector<512x64xbf16>, vector<32x64xf32> -> vector<32x64xf32>
    %3 = arith.truncf %2 : vector<32x64xf32> to vector<32x64xbf16>
    %c0_3 = arith.constant 0 : index
    %c0_4 = arith.constant 0 : index
    %4 = vector.load %arg3[%c0_3, %c0_4] : memref<32x64xbf16, #tpu.memory_space<vmem>>, vector<32x64xbf16>
    tpu.vector_store %arg3[%c0_3, %c0_4], %3 {strides = array<i32>} : memref<32x64xbf16, #tpu.memory_space<vmem>>, vector<32x64xbf16>,
    %cst_5 = arith.constant dense<0.000000e+00> : vector<64xf32>
    %5 = vector.multi_reduction <add>, %2, %cst_5 [0] : vector<32x64xf32> to vector<64xf32>
    %6 = vector.shape_cast %5 : vector<64xf32> to vector<1x64xf32>
    %7 = arith.mulf %2, %2 : vector<32x64xf32>
    %cst_6 = arith.constant dense<0.000000e+00> : vector<64xf32>
    %8 = vector.multi_reduction <add>, %7, %cst_6 [0] : vector<32x64xf32> to vector<64xf32>
    %9 = vector.shape_cast %8 : vector<64xf32> to vector<1x64xf32>
    %10 = tpu.concatenate %6, %9 in 0 : vector<1x64xf32>, vector<1x64xf32> -> vector<2x64xf32>
    %11 = vector.shape_cast %10 : vector<2x64xf32> to vector<1x2x64xf32>
    %c0_7 = arith.constant 0 : index
    %c0_8 = arith.constant 0 : index
    %c0_9 = arith.constant 0 : index
    %12 = vector.load %arg4[%c0_7, %c0_8, %c0_9] : memref<1x2x64xf32, #tpu.memory_space<vmem>>, vector<1x2x64xf32>
    tpu.vector_store %arg4[%c0_7, %c0_8, %c0_9], %11 {strides = array<i32>} : memref<1x2x64xf32, #tpu.memory_space<vmem>>, vector<1x2x64xf32>,
    return
  }
  func.func @transform_0(%arg0: i32) -> (i32, i32) {
    %c0_i32 = arith.constant 0 : i32
    %c0_i32_0 = arith.constant 0 : i32
    return %arg0, %c0_i32 : i32, i32
  }
  func.func @transform_1(%arg0: i32) -> (i32, i32) {
    %c0_i32 = arith.constant 0 : i32
    %c0_i32_0 = arith.constant 0 : i32
    %c0_i32_1 = arith.constant 0 : i32
    return %c0_i32, %c0_i32_0 : i32, i32
  }
  func.func @transform_2(%arg0: i32) -> (i32, i32) {
    %c0_i32 = arith.constant 0 : i32
    %c0_i32_0 = arith.constant 0 : i32
    return %arg0, %c0_i32 : i32, i32
  }
  func.func @transform_3(%arg0: i32) -> (i32, i32, i32) {
    %c0_i32 = arith.constant 0 : i32
    %c0_i32_0 = arith.constant 0 : i32
    %c0_i32_1 = arith.constant 0 : i32
    return %arg0, %c0_i32, %c0_i32_0 : i32, i32, i32
  }
}

module attributes {stable_mosaic.version = 11 : i64} {
  func.func @_bn_lrelu_tmean_kernel(%arg0: i32, %arg1: memref<1x4x4x64xbf16, #tpu.memory_space<vmem>>, %arg2: memref<1x64xf32, #tpu.memory_space<vmem>>, %arg3: memref<1x64xf32, #tpu.memory_space<vmem>>, %arg4: memref<1x4x64xf32, #tpu.memory_space<vmem>>) attributes {dimension_semantics = [#tpu.dimension_semantics<parallel>], iteration_bounds = array<i64: 2>, scalar_prefetch = 0 : i64, scratch_operands = 0 : i64, tpu.core_type = #tpu.core_type<tc>, window_params = [{transform_indices = @transform_0, window_bounds = array<i64: 1, 4, 4, 64>}, {pipeline_mode = #tpu.pipeline_mode<synchronous>, transform_indices = @transform_1, window_bounds = array<i64: 1, 64>}, {pipeline_mode = #tpu.pipeline_mode<synchronous>, transform_indices = @transform_2, window_bounds = array<i64: 1, 64>}, {transform_indices = @transform_3, window_bounds = array<i64: 1, 4, 64>}]} {
    %c0 = arith.constant 0 : index
    %c0_0 = arith.constant 0 : index
    %c0_1 = arith.constant 0 : index
    %c0_2 = arith.constant 0 : index
    %0 = vector.load %arg1[%c0, %c0_0, %c0_1, %c0_2] : memref<1x4x4x64xbf16, #tpu.memory_space<vmem>>, vector<1x4x4x64xbf16>
    %1 = arith.extf %0 : vector<1x4x4x64xbf16> to vector<1x4x4x64xf32>
    %c0_3 = arith.constant 0 : index
    %c0_4 = arith.constant 0 : index
    %2 = vector.load %arg2[%c0_3, %c0_4] : memref<1x64xf32, #tpu.memory_space<vmem>>, vector<1x64xf32>
    %3 = vector.shape_cast %2 : vector<1x64xf32> to vector<1x1x1x64xf32>
    %4 = vector.broadcast %3 : vector<1x1x1x64xf32> to vector<1x4x4x64xf32>
    %5 = arith.mulf %1, %4 : vector<1x4x4x64xf32>
    %c0_5 = arith.constant 0 : index
    %c0_6 = arith.constant 0 : index
    %6 = vector.load %arg3[%c0_5, %c0_6] : memref<1x64xf32, #tpu.memory_space<vmem>>, vector<1x64xf32>
    %7 = vector.shape_cast %6 : vector<1x64xf32> to vector<1x1x1x64xf32>
    %8 = vector.broadcast %7 : vector<1x1x1x64xf32> to vector<1x4x4x64xf32>
    %9 = arith.addf %5, %8 : vector<1x4x4x64xf32>
    %cst = arith.constant 0.000000e+00 : f32
    %10 = vector.broadcast %cst : f32 to vector<1x4x4x64xf32>
    %11 = arith.cmpf ogt, %9, %10 : vector<1x4x4x64xf32>
    %cst_7 = arith.constant 2.000000e-01 : f32
    %12 = vector.broadcast %cst_7 : f32 to vector<1x4x4x64xf32>
    %13 = arith.mulf %12, %9 : vector<1x4x4x64xf32>
    %14 = arith.select %11, %9, %13 : vector<1x4x4x64xi1>, vector<1x4x4x64xf32>
    %cst_8 = arith.constant dense<0.000000e+00> : vector<1x4x64xf32>
    %15 = vector.multi_reduction <add>, %14, %cst_8 [1] : vector<1x4x4x64xf32> to vector<1x4x64xf32>
    %cst_9 = arith.constant 2.500000e-01 : f32
    %16 = vector.broadcast %cst_9 : f32 to vector<1x4x64xf32>
    %17 = arith.mulf %15, %16 : vector<1x4x64xf32>
    %c0_10 = arith.constant 0 : index
    %c0_11 = arith.constant 0 : index
    %c0_12 = arith.constant 0 : index
    %18 = vector.load %arg4[%c0_10, %c0_11, %c0_12] : memref<1x4x64xf32, #tpu.memory_space<vmem>>, vector<1x4x64xf32>
    tpu.vector_store %arg4[%c0_10, %c0_11, %c0_12], %17 {strides = array<i32>} : memref<1x4x64xf32, #tpu.memory_space<vmem>>, vector<1x4x64xf32>,
    return
  }
  func.func @transform_0(%arg0: i32) -> (i32, i32, i32, i32) {
    %c0_i32 = arith.constant 0 : i32
    %c0_i32_0 = arith.constant 0 : i32
    %c0_i32_1 = arith.constant 0 : i32
    %c0_i32_2 = arith.constant 0 : i32
    return %arg0, %c0_i32, %c0_i32_0, %c0_i32_1 : i32, i32, i32, i32
  }
  func.func @transform_1(%arg0: i32) -> (i32, i32) {
    %c0_i32 = arith.constant 0 : i32
    %c0_i32_0 = arith.constant 0 : i32
    %c0_i32_1 = arith.constant 0 : i32
    return %c0_i32, %c0_i32_0 : i32, i32
  }
  func.func @transform_2(%arg0: i32) -> (i32, i32) {
    %c0_i32 = arith.constant 0 : i32
    %c0_i32_0 = arith.constant 0 : i32
    %c0_i32_1 = arith.constant 0 : i32
    return %c0_i32, %c0_i32_0 : i32, i32
  }
  func.func @transform_3(%arg0: i32) -> (i32, i32, i32) {
    %c0_i32 = arith.constant 0 : i32
    %c0_i32_0 = arith.constant 0 : i32
    %c0_i32_1 = arith.constant 0 : i32
    return %arg0, %c0_i32, %c0_i32_0 : i32, i32, i32
  }
}

</mosaic_0001>

<bundles_post_ra>
// kernel: stage1_d_sty_v2_forward.5
= control target key start
LH: loop header
LB: loop body
LE: loop exit
PB: predicated region body
PF: predicated region fallthrough
CT: control target
= control target key end

     0   :  { %s2758_s9 = smov 0   ;;  %s3179_s0 = inlined_call_operand.vmem [shape: bf16[2048,48], index: 0, kind: input, shape index: {}]   ;;  %s3180_s1 = inlined_call_operand.vmem [shape: bf16[48,8], index: 1, kind: input, shape index: {}]   ;;  %s3181_s2 = inlined_call_operand.vmem [shape: bf16[2048,8], index: 2, kind: output, shape index: {}]  }
   0x1 LB: > { %s2055_s10 = sadd.s32 4294967295, %s2741_s9   ;;  %p2059_p0 = scmp.ge.s32.totalorder %s2741_s9, 1  ;;  %s2741_s9 = sphi %s2758_s9, %s12_s9  }
   0x2   : > { %p113_p1 = scmp.lt.s32.totalorder %s2741_s9, 3 }
   0x4   : > { %p114_p2 = pnand %p2059_p0, %p113_p1 }
   0x5   : > { %v2668_v0 = vld [vmem:[%s3180_s1] sm:$0xff] (!%p114_p2)   ;;  %s2060_s13 = sshll.u32 (!%p114_p2), %s2055_s10, 7  ;;  %v2669_v1 = vld [vmem:[%s3180_s1 + $0x8] sm:$0xff] (!%p114_p2)   ;;  %v2670_v2 = vld [vmem:[%s3180_s1 + $0x10] sm:$0xff] (!%p114_p2)   ;;  %vm620_vm0 = vcmask (!%p114_p2), 392192   ;;  %vm1870_vm1 = vcmask (!%p114_p2), 60416  }
   0x6   : > { %117 = sbr.rel (%p114_p2) target bundleno = 357 (0x165), region = 28  ;;  %p136_p3 = scmp.lt.s32.totalorder (!%p114_p2), %s2060_s13, 255  ;;  %2520 = vmatprep.subr.bf16.mxu0 (!%p114_p2), %v2668_v0  ;;  %2654 = vmatprep.subr.bf16.mxu1 (!%p114_p2), %v2668_v0 }
   0x7   : > { %2521 = vmatpush3.bf16.msra.mxu0 (!%p114_p2), %v2668_v0  ;;  %2657 = vmatpush3.bf16.msra.mxu1 (!%p114_p2), %v2668_v0 }
   0x8   : > { %2522 = vmatprep.subr.bf16.mxu0 (!%p114_p2), %v2669_v1  ;;  %2655 = vmatprep.subr.bf16.mxu1 (!%p114_p2), %v2669_v1 }
   0xb   : > { %2523 = vmatpush3.bf16.msra.mxu0 (!%p114_p2), %v2669_v1  ;;  %2658 = vmatpush3.bf16.msra.mxu1 (!%p114_p2), %v2669_v1 }
   0xc   : > { %2524 = vmatprep.subr.bf16.mxu0 (!%p114_p2), %v2670_v2  ;;  %2656 = vmatprep.subr.bf16.mxu1 (!%p114_p2), %v2670_v2 }
   0xd   : > { %s3183_s13 = smov (!%p136_p3, %s2060_s13), 255 }
   0xe   : > { %s2061_s18 = sshll.u32 %s3183_s13, 2 }
   0xf   : > { %s2783_s21 = scalar_lea.vmem %s3179_s0, %s2061_s18  ;;  %2525 = vmatpush3.bf16.msra.mxu0 %v2670_v2  ;;  %2659 = vmatpush3.bf16.msra.mxu1 %v2670_v2  ;;  %s2918_s24 = scalar_lea.vmem %s3181_s2, %s2061_s18 }
  0x10   : > { %v2671_v3 = vld [vmem:[%s2783_s21] sm:$0xff]   ;;  %v2673_v5 = vld [vmem:[%s2783_s21 + $0x8] sm:$0xff]   ;;  %v2675_v7 = vld [vmem:[%s2783_s21 + $0x10] sm:$0xff]  }
  0x11   : > { %v2672_v4 = vld [vmem:[%s2783_s21 + $0x100] sm:$0xff]   ;;  %2526 = vmatprep.mubr.msk.bf16.mxu0 %vm620_vm0, %v2671_v3  ;;  %v2674_v6 = vld [vmem:[%s2783_s21 + $0x108] sm:$0xff]   ;;  %v2676_v8 = vld [vmem:[%s2783_s21 + $0x110] sm:$0xff]  }
  0x12   : > { %2590 = vmatprep.mubr.msk.bf16.mxu1 %vm620_vm0, %v2672_v4  ;;  %2527 = vmatmul.mubr.msk.bf16.vlgmr.msra.gmra.mrb[0].mxu0 %vm620_vm0, %v2673_v5  ;;  %v2677_v9 = vld [vmem:[%s2783_s21 + $0x18] sm:$0xff]   ;;  %v2679_v11 = vld [vmem:[%s2783_s21 + $0x20] sm:$0xff]   ;;  %v2681_v13 = vld [vmem:[%s2783_s21 + $0x28] sm:$0xff]  }
  0x13   : > { %2591 = vmatmul.mubr.msk.bf16.vlgmr.msra.gmra.mrb[0].mxu1 %vm620_vm0, %v2674_v6  ;;  %2530 = vmatprep.mubr.msk.bf16.mxu0 %vm620_vm0, %v2675_v7  ;;  %v2678_v10 = vld [vmem:[%s2783_s21 + $0x118] sm:$0xff]   ;;  %v2680_v12 = vld [vmem:[%s2783_s21 + $0x120] sm:$0xff]   ;;  %v2682_v14 = vld [vmem:[%s2783_s21 + $0x128] sm:$0xff]  }
  0x14   : > { %2594 = vmatprep.mubr.msk.bf16.mxu1 %vm620_vm0, %v2676_v8  ;;  %v2683_v15 = vld [vmem:[%s2783_s21 + $0x30] sm:$0xff]   ;;  %v2685_v17 = vld [vmem:[%s2783_s21 + $0x38] sm:$0xff]   ;;  %v2687_v19 = vld [vmem:[%s2783_s21 + $0x40] sm:$0xff]  }
  0x15   : > { %v2684_v16 = vld [vmem:[%s2783_s21 + $0x130] sm:$0xff]   ;;  %v2686_v18 = vld [vmem:[%s2783_s21 + $0x138] sm:$0xff]   ;;  %v2688_v20 = vld [vmem:[%s2783_s21 + $0x140] sm:$0xff]  }
  0x16   : > { %v2689_v21 = vld [vmem:[%s2783_s21 + $0x48] sm:$0xff]   ;;  %v2691_v23 = vld [vmem:[%s2783_s21 + $0x50] sm:$0xff]   ;;  %v2693_v25 = vld [vmem:[%s2783_s21 + $0x58] sm:$0xff]  }
  0x17   : > { %v2690_v22 = vld [vmem:[%s2783_s21 + $0x148] sm:$0xff]   ;;  %v2692_v24 = vld [vmem:[%s2783_s21 + $0x150] sm:$0xff]   ;;  %v2694_v26 = vld [vmem:[%s2783_s21 + $0x158] sm:$0xff]  }
  0x18   : > { %v2695_v27 = vld [vmem:[%s2783_s21 + $0x60] sm:$0xff]   ;;  %v2697_v29 = vld [vmem:[%s2783_s21 + $0x68] sm:$0xff]   ;;  %v2699_v31 = vld [vmem:[%s2783_s21 + $0x70] sm:$0xff]  }
  0x19   : > { %v2696_v28 = vld [vmem:[%s2783_s21 + $0x160] sm:$0xff]   ;;  %v2698_v30 = vld [vmem:[%s2783_s21 + $0x168] sm:$0xff]   ;;  %v2700_v32 = vld [vmem:[%s2783_s21 + $0x170] sm:$0xff]  }
  0x1a   : > { %2531 = vmatmul.mubr.msk.bf16.gmra.mrb[4].mxu0 %vm620_vm0, %v2677_v9  ;;  %v2701_v33 = vld [vmem:[%s2783_s21 + $0x78] sm:$0xff]   ;;  %v2703_v35 = vld [vmem:[%s2783_s21 + $0x80] sm:$0xff]   ;;  %v2705_v37 = vld [vmem:[%s2783_s21 + $0x88] sm:$0xff]  }
  0x1b   : > { %2595 = vmatmul.mubr.msk.bf16.gmra.mrb[4].mxu1 %vm620_vm0, %v2678_v10  ;;  %2534 = vmatprep.mubr.msk.bf16.mxu0 %vm620_vm0, %v2679_v11  ;;  %v2702_v34 = vld [vmem:[%s2783_s21 + $0x178] sm:$0xff]   ;;  %v2704_v36 = vld [vmem:[%s2783_s21 + $0x180] sm:$0xff]   ;;  %v2706_v38 = vld [vmem:[%s2783_s21 + $0x188] sm:$0xff]  }
  0x1c   : > { %2598 = vmatprep.mubr.msk.bf16.mxu1 %vm620_vm0, %v2680_v12  ;;  %v2707_v39 = vld [vmem:[%s2783_s21 + $0x90] sm:$0xff]   ;;  %v2709_v41 = vld [vmem:[%s2783_s21 + $0x98] sm:$0xff]   ;;  %v2711_v43 = vld [vmem:[%s2783_s21 + $0xa0] sm:$0xff]  }
  0x1d   : > { %v2708_v40 = vld [vmem:[%s2783_s21 + $0x190] sm:$0xff]   ;;  %v2710_v42 = vld [vmem:[%s2783_s21 + $0x198] sm:$0xff]   ;;  %v2712_v44 = vld [vmem:[%s2783_s21 + $0x1a0] sm:$0xff]  }
  0x1e   : > { %v2713_v45 = vld [vmem:[%s2783_s21 + $0xa8] sm:$0xff]   ;;  %v2715_v47 = vld [vmem:[%s2783_s21 + $0xb0] sm:$0xff]   ;;  %v2717_v49 = vld [vmem:[%s2783_s21 + $0xb8] sm:$0xff]  }
  0x1f   : > { %v2714_v46 = vld [vmem:[%s2783_s21 + $0x1a8] sm:$0xff]   ;;  %v2716_v48 = vld [vmem:[%s2783_s21 + $0x1b0] sm:$0xff]   ;;  %v2718_v50 = vld [vmem:[%s2783_s21 + $0x1b8] sm:$0xff]  }
  0x20   : > { %v2719_v51 = vld [vmem:[%s2783_s21 + $0xc0] sm:$0xff]   ;;  %v2721_v53 = vld [vmem:[%s2783_s21 + $0xc8] sm:$0xff]   ;;  %v2723_v55 = vld [vmem:[%s2783_s21 + $0xd0] sm:$0xff]  }
  0x21   : > { %v2720_v52 = vld [vmem:[%s2783_s21 + $0x1c0] sm:$0xff]   ;;  %v2722_v54 = vld [vmem:[%s2783_s21 + $0x1c8] sm:$0xff]   ;;  %v2724_v56 = vld [vmem:[%s2783_s21 + $0x1d0] sm:$0xff]  }
  0x22   : > { %2535 = vmatmul.mubr.msk.bf16.gmra.mrb[8].mxu0 %vm620_vm0, %v2681_v13  ;;  %v2725_v57 = vld [vmem:[%s2783_s21 + $0xd8] sm:$0xff]   ;;  %v2727_v59 = vld [vmem:[%s2783_s21 + $0xe0] sm:$0xff]   ;;  %v2729_v61 = vld [vmem:[%s2783_s21 + $0xe8] sm:$0xff]  }
  0x23   : > { %2599 = vmatmul.mubr.msk.bf16.gmra.mrb[8].mxu1 %vm620_vm0, %v2682_v14  ;;  %2538 = vmatprep.mubr.msk.bf16.mxu0 %vm620_vm0, %v2683_v15  ;;  %v2726_v58 = vld [vmem:[%s2783_s21 + $0x1d8] sm:$0xff]   ;;  %v2728_v60 = vld [vmem:[%s2783_s21 + $0x1e0] sm:$0xff]   ;;  %v2730_v62 = vld [vmem:[%s2783_s21 + $0x1e8] sm:$0xff]  }
  0x24   : > { %2602 = vmatprep.mubr.msk.bf16.mxu1 %vm620_vm0, %v2684_v16  ;;  %v2731_v63 = vld [vmem:[%s2783_s21 + $0xf0] sm:$0xff]   ;;  %v2733_v1 = vld [vmem:[%s2783_s21 + $0xf8] sm:$0xff]  }
  0x25   : > { %v2732_v0 = vld [vmem:[%s2783_s21 + $0x1f0] sm:$0xff]   ;;  %v2734_v2 = vld [vmem:[%s2783_s21 + $0x1f8] sm:$0xff]  }
  0x2a   : > { %2539 = vmatmul.mubr.msk.bf16.gmra.mrb[12].mxu0 %vm620_vm0, %v2685_v17 }
  0x2b   : > { %2603 = vmatmul.mubr.msk.bf16.gmra.mrb[12].mxu1 %vm620_vm0, %v2686_v18  ;;  %2542 = vmatprep.mubr.msk.bf16.mxu0 %vm620_vm0, %v2687_v19 }
  0x2c   : > { %2606 = vmatprep.mubr.msk.bf16.mxu1 %vm620_vm0, %v2688_v20 }
  0x32   : > { %2543 = vmatmul.mubr.msk.bf16.gmra.mrb[16].mxu0 %vm620_vm0, %v2689_v21 }
  0x33   : > { %2607 = vmatmul.mubr.msk.bf16.gmra.mrb[16].mxu1 %vm620_vm0, %v2690_v22  ;;  %2546 = vmatprep.mubr.msk.bf16.mxu0 %vm620_vm0, %v2691_v23 }
  0x34   : > { %2610 = vmatprep.mubr.msk.bf16.mxu1 %vm620_vm0, %v2692_v24 }
  0x3a   : > { %2547 = vmatmul.mubr.msk.bf16.gmra.mrb[20].mxu0 %vm620_vm0, %v2693_v25 }
  0x3b   : > { %2611 = vmatmul.mubr.msk.bf16.gmra.mrb[20].mxu1 %vm620_vm0, %v2694_v26  ;;  %2550 = vmatprep.mubr.msk.bf16.mxu0 %vm620_vm0, %v2695_v27 }
  0x3c   : > { %2614 = vmatprep.mubr.msk.bf16.mxu1 %vm620_vm0, %v2696_v28 }
  0x42   : > { %2551 = vmatmul.mubr.msk.bf16.gmra.mrb[24].mxu0 %vm620_vm0, %v2697_v29 }
  0x43   : > { %2615 = vmatmul.mubr.msk.bf16.gmra.mrb[24].mxu1 %vm620_vm0, %v2698_v30  ;;  %2554 = vmatprep.mubr.msk.bf16.mxu0 %vm620_vm0, %v2699_v31 }
  0x44   : > { %2618 = vmatprep.mubr.msk.bf16.mxu1 %vm620_vm0, %v2700_v32 }
  0x4a   : > { %2555 = vmatmul.mubr.msk.bf16.gmra.mrb[28].mxu0 %vm620_vm0, %v2701_v33 }
  0x4b   : > { %2619 = vmatmul.mubr.msk.bf16.gmra.mrb[28].mxu1 %vm620_vm0, %v2702_v34  ;;  %2558 = vmatprep.mubr.msk.bf16.mxu0 %vm620_vm0, %v2703_v35 }
  0x4c   : > { %2622 = vmatprep.mubr.msk.bf16.mxu1 %vm620_vm0, %v2704_v36 }
  0x52   : > { %2559 = vmatmul.mubr.msk.bf16.gmra.mrb[32].mxu0 %vm620_vm0, %v2705_v37 }
  0x53   : > { %2623 = vmatmul.mubr.msk.bf16.gmra.mrb[32].mxu1 %vm620_vm0, %v2706_v38  ;;  %2562 = vmatprep.mubr.msk.bf16.mxu0 %vm620_vm0, %v2707_v39 }
  0x54   : > { %2626 = vmatprep.mubr.msk.bf16.mxu1 %vm620_vm0, %v2708_v40 }
  0x5a   : > { %2563 = vmatmul.mubr.msk.bf16.gmra.mrb[36].mxu0 %vm620_vm0, %v2709_v41 }
  0x5b   : > { %2627 = vmatmul.mubr.msk.bf16.gmra.mrb[36].mxu1 %vm620_vm0, %v2710_v42  ;;  %2566 = vmatprep.mubr.msk.bf16.mxu0 %vm620_vm0, %v2711_v43 }
  0x5c   : > { %2630 = vmatprep.mubr.msk.bf16.mxu1 %vm620_vm0, %v2712_v44 }
  0x62   : > { %2567 = vmatmul.mubr.msk.bf16.gmra.mrb[40].mxu0 %vm620_vm0, %v2713_v45 }
  0x63   : > { %2631 = vmatmul.mubr.msk.bf16.gmra.mrb[40].mxu1 %vm620_vm0, %v2714_v46  ;;  %2570 = vmatprep.mubr.msk.bf16.mxu0 %vm620_vm0, %v2715_v47 }
  0x64   : > { %2634 = vmatprep.mubr.msk.bf16.mxu1 %vm620_vm0, %v2716_v48 }
  0x6a   : > { %2571 = vmatmul.mubr.msk.bf16.gmra.mrb[44].mxu0 %vm620_vm0, %v2717_v49 }
  0x6b   : > { %2635 = vmatmul.mubr.msk.bf16.gmra.mrb[44].mxu1 %vm620_vm0, %v2718_v50  ;;  %2574 = vmatprep.mubr.msk.bf16.mxu0 %vm620_vm0, %v2719_v51 }
  0x6c   : > { %2638 = vmatprep.mubr.msk.bf16.mxu1 %vm620_vm0, %v2720_v52 }
  0x72   : > { %2575 = vmatmul.mubr.msk.bf16.gmra.mrb[48].mxu0 %vm620_vm0, %v2721_v53 }
  0x73   : > { %2639 = vmatmul.mubr.msk.bf16.gmra.mrb[48].mxu1 %vm620_vm0, %v2722_v54  ;;  %2578 = vmatprep.mubr.msk.bf16.mxu0 %vm620_vm0, %v2723_v55 }
  0x74   : > { %2642 = vmatprep.mubr.msk.bf16.mxu1 %vm620_vm0, %v2724_v56 }
  0x7a   : > { %2579 = vmatmul.mubr.msk.bf16.gmra.mrb[52].mxu0 %vm620_vm0, %v2725_v57 }
  0x7b   : > { %2643 = vmatmul.mubr.msk.bf16.gmra.mrb[52].mxu1 %vm620_vm0, %v2726_v58  ;;  %2582 = vmatprep.mubr.msk.bf16.mxu0 %vm620_vm0, %v2727_v59 }
  0x7c   : > { %2646 = vmatprep.mubr.msk.bf16.mxu1 %vm620_vm0, %v2728_v60 }
  0x82   : > { %2583 = vmatmul.mubr.msk.bf16.gmra.mrb[56].mxu0 %vm620_vm0, %v2729_v61 }
  0x83   : > { %2647 = vmatmul.mubr.msk.bf16.gmra.mrb[56].mxu1 %vm620_vm0, %v2730_v62  ;;  %2586 = vmatprep.mubr.msk.bf16.mxu0 %vm620_vm0, %v2731_v63 }
  0x84   : > { %2650 = vmatprep.mubr.msk.bf16.mxu1 %vm620_vm0, %v2732_v0 }
  0x8a   : > { %2587 = vmatmul.mubr.msk.bf16.gmra.mrb[60].mxu0 %vm620_vm0, %v2733_v1 }
  0x8b   : > { %2651 = vmatmul.mubr.msk.bf16.gmra.mrb[60].mxu1 %vm620_vm0, %v2734_v2 }
  0xe5   : > { %v2528_v3 = vpop.f32.mrb[0].mxu0 }
  0xe6   : > { %v2592_v4 = vpop.f32.mrb[0].mxu1  ;;  %v2327_v5 = vpack.c.bf16 %v2528_v3, %v2528_v3  ;;  %v847_v7 = vpop.f32.mrb[1].mxu0 }
  0xe7   : > { %v2391_v6 = vpack.c.bf16 %v2592_v4, %v2592_v4  ;;  %v1103_v8 = vpop.f32.mrb[1].mxu1  ;;  %v2325_v9 = vpack.c.bf16 %v847_v7, %v847_v7  ;;  %v2529_v11 = vpop.f32.mrb[2].mxu0 }
  0xe8   : > { %v2389_v10 = vpack.c.bf16 %v1103_v8, %v1103_v8  ;;  %v2593_v12 = vpop.f32.mrb[2].mxu1  ;;  %1873 = vst.msk [vmem:[%s2918_s24 + $0x8] sm:$0xf] %vm1870_vm1, %v2327_v5  ;;  %v2328_v13 = vpack.c.bf16 %v2529_v11, %v2529_v11  ;;  %v850_v15 = vpop.f32.mrb[3].mxu0 }
  0xe9   : > { %1937 = vst.msk [vmem:[%s2918_s24 + $0x108] sm:$0xf] %vm1870_vm1, %v2391_v6  ;;  %v2392_v14 = vpack.c.bf16 %v2593_v12, %v2593_v12  ;;  %v1106_v16 = vpop.f32.mrb[3].mxu1  ;;  %1871 = vst.msk [vmem:[%s2918_s24] sm:$0xf] %vm1870_vm1, %v2325_v9  ;;  %v2326_v17 = vpack.c.bf16 %v850_v15, %v850_v15 }
  0xea   : > { %1935 = vst.msk [vmem:[%s2918_s24 + $0x100] sm:$0xf] %vm1870_vm1, %v2389_v10  ;;  %v2390_v18 = vpack.c.bf16 %v1106_v16, %v1106_v16  ;;  %1874 = vst.msk [vmem:[%s2918_s24 + $0xc] sm:$0xf] %vm1870_vm1, %v2328_v13 }
  0xeb   : > { %1938 = vst.msk [vmem:[%s2918_s24 + $0x10c] sm:$0xf] %vm1870_vm1, %v2392_v14  ;;  %1872 = vst.msk [vmem:[%s2918_s24 + $0x4] sm:$0xf] %vm1870_vm1, %v2326_v17 }
  0xec   : > { %1936 = vst.msk [vmem:[%s2918_s24 + $0x104] sm:$0xf] %vm1870_vm1, %v2390_v18 }
  0xed   : > { %v2532_v19 = vpop.f32.mrb[4].mxu0 }
  0xee   : > { %v2596_v20 = vpop.f32.mrb[4].mxu1  ;;  %v2331_v21 = vpack.c.bf16 %v2532_v19, %v2532_v19  ;;  %v863_v23 = vpop.f32.mrb[5].mxu0 }
  0xef   : > { %v2395_v22 = vpack.c.bf16 %v2596_v20, %v2596_v20  ;;  %v1119_v24 = vpop.f32.mrb[5].mxu1  ;;  %v2329_v25 = vpack.c.bf16 %v863_v23, %v863_v23  ;;  %v2533_v27 = vpop.f32.mrb[6].mxu0 }
  0xf0   : > { %v2393_v26 = vpack.c.bf16 %v1119_v24, %v1119_v24  ;;  %v2597_v28 = vpop.f32.mrb[6].mxu1  ;;  %1877 = vst.msk [vmem:[%s2918_s24 + $0x18] sm:$0xf] %vm1870_vm1, %v2331_v21  ;;  %v2332_v29 = vpack.c.bf16 %v2533_v27, %v2533_v27  ;;  %v866_v31 = vpop.f32.mrb[7].mxu0 }
  0xf1   : > { %1941 = vst.msk [vmem:[%s2918_s24 + $0x118] sm:$0xf] %vm1870_vm1, %v2395_v22  ;;  %v2396_v30 = vpack.c.bf16 %v2597_v28, %v2597_v28  ;;  %v1122_v32 = vpop.f32.mrb[7].mxu1  ;;  %1875 = vst.msk [vmem:[%s2918_s24 + $0x10] sm:$0xf] %vm1870_vm1, %v2329_v25  ;;  %v2330_v33 = vpack.c.bf16 %v866_v31, %v866_v31 }
  0xf2   : > { %1939 = vst.msk [vmem:[%s2918_s24 + $0x110] sm:$0xf] %vm1870_vm1, %v2393_v26  ;;  %v2394_v34 = vpack.c.bf16 %v1122_v32, %v1122_v32  ;;  %1878 = vst.msk [vmem:[%s2918_s24 + $0x1c] sm:$0xf] %vm1870_vm1, %v2332_v29 }
  0xf3   : > { %1942 = vst.msk [vmem:[%s2918_s24 + $0x11c] sm:$0xf] %vm1870_vm1, %v2396_v30  ;;  %1876 = vst.msk [vmem:[%s2918_s24 + $0x14] sm:$0xf] %vm1870_vm1, %v2330_v33 }
  0xf4   : > { %1940 = vst.msk [vmem:[%s2918_s24 + $0x114] sm:$0xf] %vm1870_vm1, %v2394_v34 }
  0xf5   : > { %v2536_v35 = vpop.f32.mrb[8].mxu0 }
  0xf6   : > { %v2600_v36 = vpop.f32.mrb[8].mxu1  ;;  %v2335_v37 = vpack.c.bf16 %v2536_v35, %v2536_v35  ;;  %v879_v39 = vpop.f32.mrb[9].mxu0 }
  0xf7   : > { %v2399_v38 = vpack.c.bf16 %v2600_v36, %v2600_v36  ;;  %v1135_v40 = vpop.f32.mrb[9].mxu1  ;;  %v2333_v41 = vpack.c.bf16 %v879_v39, %v879_v39  ;;  %v2537_v43 = vpop.f32.mrb[10].mxu0 }
  0xf8   : > { %v2397_v42 = vpack.c.bf16 %v1135_v40, %v1135_v40  ;;  %v2601_v44 = vpop.f32.mrb[10].mxu1  ;;  %1881 = vst.msk [vmem:[%s2918_s24 + $0x28] sm:$0xf] %vm1870_vm1, %v2335_v37  ;;  %v2336_v45 = vpack.c.bf16 %v2537_v43, %v2537_v43  ;;  %v882_v47 = vpop.f32.mrb[11].mxu0 }
  0xf9   : > { %1945 = vst.msk [vmem:[%s2918_s24 + $0x128] sm:$0xf] %vm1870_vm1, %v2399_v38  ;;  %v2400_v46 = vpack.c.bf16 %v2601_v44, %v2601_v44  ;;  %v1138_v48 = vpop.f32.mrb[11].mxu1  ;;  %1879 = vst.msk [vmem:[%s2918_s24 + $0x20] sm:$0xf] %vm1870_vm1, %v2333_v41  ;;  %v2334_v49 = vpack.c.bf16 %v882_v47, %v882_v47 }
  0xfa   : > { %1943 = vst.msk [vmem:[%s2918_s24 + $0x120] sm:$0xf] %vm1870_vm1, %v2397_v42  ;;  %v2398_v50 = vpack.c.bf16 %v1138_v48, %v1138_v48  ;;  %1882 = vst.msk [vmem:[%s2918_s24 + $0x2c] sm:$0xf] %vm1870_vm1, %v2336_v45 }
  0xfb   : > { %1946 = vst.msk [vmem:[%s2918_s24 + $0x12c] sm:$0xf] %vm1870_vm1, %v2400_v46  ;;  %1880 = vst.msk [vmem:[%s2918_s24 + $0x24] sm:$0xf] %vm1870_vm1, %v2334_v49 }
  0xfc   : > { %1944 = vst.msk [vmem:[%s2918_s24 + $0x124] sm:$0xf] %vm1870_vm1, %v2398_v50 }
  0xfd   : > { %v2540_v51 = vpop.f32.mrb[12].mxu0 }
  0xfe   : > { %v2604_v52 = vpop.f32.mrb[12].mxu1  ;;  %v2339_v53 = vpack.c.bf16 %v2540_v51, %v2540_v51  ;;  %v895_v55 = vpop.f32.mrb[13].mxu0 }
  0xff   : > { %v2403_v54 = vpack.c.bf16 %v2604_v52, %v2604_v52  ;;  %v1151_v56 = vpop.f32.mrb[13].mxu1  ;;  %v2337_v57 = vpack.c.bf16 %v895_v55, %v895_v55  ;;  %v2541_v59 = vpop.f32.mrb[14].mxu0 }
 0x100   : > { %v2401_v58 = vpack.c.bf16 %v1151_v56, %v1151_v56  ;;  %v2605_v60 = vpop.f32.mrb[14].mxu1  ;;  %1885 = vst.msk [vmem:[%s2918_s24 + $0x38] sm:$0xf] %vm1870_vm1, %v2339_v53  ;;  %v2340_v61 = vpack.c.bf16 %v2541_v59, %v2541_v59  ;;  %v898_v63 = vpop.f32.mrb[15].mxu0 }
 0x101   : > { %1949 = vst.msk [vmem:[%s2918_s24 + $0x138] sm:$0xf] %vm1870_vm1, %v2403_v54  ;;  %v2404_v62 = vpack.c.bf16 %v2605_v60, %v2605_v60  ;;  %v1154_v0 = vpop.f32.mrb[15].mxu1  ;;  %1883 = vst.msk [vmem:[%s2918_s24 + $0x30] sm:$0xf] %vm1870_vm1, %v2337_v57  ;;  %v2338_v1 = vpack.c.bf16 %v898_v63, %v898_v63 }
 0x102   : > { %1947 = vst.msk [vmem:[%s2918_s24 + $0x130] sm:$0xf] %vm1870_vm1, %v2401_v58  ;;  %v2402_v2 = vpack.c.bf16 %v1154_v0, %v1154_v0  ;;  %1886 = vst.msk [vmem:[%s2918_s24 + $0x3c] sm:$0xf] %vm1870_vm1, %v2340_v61 }
 0x103   : > { %1950 = vst.msk [vmem:[%s2918_s24 + $0x13c] sm:$0xf] %vm1870_vm1, %v2404_v62  ;;  %1884 = vst.msk [vmem:[%s2918_s24 + $0x34] sm:$0xf] %vm1870_vm1, %v2338_v1 }
 0x104   : > { %1948 = vst.msk [vmem:[%s2918_s24 + $0x134] sm:$0xf] %vm1870_vm1, %v2402_v2 }
 0x105   : > { %v2544_v3 = vpop.f32.mrb[16].mxu0 }
 0x106   : > { %v2608_v4 = vpop.f32.mrb[16].mxu1  ;;  %v2343_v5 = vpack.c.bf16 %v2544_v3, %v2544_v3  ;;  %v911_v7 = vpop.f32.mrb[17].mxu0 }
 0x107   : > { %v2407_v6 = vpack.c.bf16 %v2608_v4, %v2608_v4  ;;  %v1167_v8 = vpop.f32.mrb[17].mxu1  ;;  %v2341_v9 = vpack.c.bf16 %v911_v7, %v911_v7  ;;  %v2545_v11 = vpop.f32.mrb[18].mxu0 }
 0x108   : > { %v2405_v10 = vpack.c.bf16 %v1167_v8, %v1167_v8  ;;  %v2609_v12 = vpop.f32.mrb[18].mxu1  ;;  %1889 = vst.msk [vmem:[%s2918_s24 + $0x48] sm:$0xf] %vm1870_vm1, %v2343_v5  ;;  %v2344_v13 = vpack.c.bf16 %v2545_v11, %v2545_v11  ;;  %v914_v15 = vpop.f32.mrb[19].mxu0 }
 0x109   : > { %1953 = vst.msk [vmem:[%s2918_s24 + $0x148] sm:$0xf] %vm1870_vm1, %v2407_v6  ;;  %v2408_v14 = vpack.c.bf16 %v2609_v12, %v2609_v12  ;;  %v1170_v16 = vpop.f32.mrb[19].mxu1  ;;  %1887 = vst.msk [vmem:[%s2918_s24 + $0x40] sm:$0xf] %vm1870_vm1, %v2341_v9  ;;  %v2342_v17 = vpack.c.bf16 %v914_v15, %v914_v15 }
 0x10a   : > { %1951 = vst.msk [vmem:[%s2918_s24 + $0x140] sm:$0xf] %vm1870_vm1, %v2405_v10  ;;  %v2406_v18 = vpack.c.bf16 %v1170_v16, %v1170_v16  ;;  %1890 = vst.msk [vmem:[%s2918_s24 + $0x4c] sm:$0xf] %vm1870_vm1, %v2344_v13 }
 0x10b   : > { %1954 = vst.msk [vmem:[%s2918_s24 + $0x14c] sm:$0xf] %vm1870_vm1, %v2408_v14  ;;  %1888 = vst.msk [vmem:[%s2918_s24 + $0x44] sm:$0xf] %vm1870_vm1, %v2342_v17 }
 0x10c   : > { %1952 = vst.msk [vmem:[%s2918_s24 + $0x144] sm:$0xf] %vm1870_vm1, %v2406_v18 }
 0x10d   : > { %v2548_v19 = vpop.f32.mrb[20].mxu0 }
 0x10e   : > { %v2612_v20 = vpop.f32.mrb[20].mxu1  ;;  %v2347_v21 = vpack.c.bf16 %v2548_v19, %v2548_v19  ;;  %v927_v23 = vpop.f32.mrb[21].mxu0 }
 0x10f   : > { %v2411_v22 = vpack.c.bf16 %v2612_v20, %v2612_v20  ;;  %v1183_v24 = vpop.f32.mrb[21].mxu1  ;;  %v2345_v25 = vpack.c.bf16 %v927_v23, %v927_v23  ;;  %v2549_v27 = vpop.f32.mrb[22].mxu0 }
 0x110   : > { %v2409_v26 = vpack.c.bf16 %v1183_v24, %v1183_v24  ;;  %v2613_v28 = vpop.f32.mrb[22].mxu1  ;;  %1893 = vst.msk [vmem:[%s2918_s24 + $0x58] sm:$0xf] %vm1870_vm1, %v2347_v21  ;;  %v2348_v29 = vpack.c.bf16 %v2549_v27, %v2549_v27  ;;  %v930_v31 = vpop.f32.mrb[23].mxu0 }
 0x111   : > { %1957 = vst.msk [vmem:[%s2918_s24 + $0x158] sm:$0xf] %vm1870_vm1, %v2411_v22  ;;  %v2412_v30 = vpack.c.bf16 %v2613_v28, %v2613_v28  ;;  %v1186_v32 = vpop.f32.mrb[23].mxu1  ;;  %1891 = vst.msk [vmem:[%s2918_s24 + $0x50] sm:$0xf] %vm1870_vm1, %v2345_v25  ;;  %v2346_v33 = vpack.c.bf16 %v930_v31, %v930_v31 }
 0x112   : > { %1955 = vst.msk [vmem:[%s2918_s24 + $0x150] sm:$0xf] %vm1870_vm1, %v2409_v26  ;;  %v2410_v34 = vpack.c.bf16 %v1186_v32, %v1186_v32  ;;  %1894 = vst.msk [vmem:[%s2918_s24 + $0x5c] sm:$0xf] %vm1870_vm1, %v2348_v29 }
 0x113   : > { %1958 = vst.msk [vmem:[%s2918_s24 + $0x15c] sm:$0xf] %vm1870_vm1, %v2412_v30  ;;  %1892 = vst.msk [vmem:[%s2918_s24 + $0x54] sm:$0xf] %vm1870_vm1, %v2346_v33 }
 0x114   : > { %1956 = vst.msk [vmem:[%s2918_s24 + $0x154] sm:$0xf] %vm1870_vm1, %v2410_v34 }
 0x115   : > { %v2552_v35 = vpop.f32.mrb[24].mxu0 }
 0x116   : > { %v2616_v36 = vpop.f32.mrb[24].mxu1  ;;  %v2351_v37 = vpack.c.bf16 %v2552_v35, %v2552_v35  ;;  %v943_v39 = vpop.f32.mrb[25].mxu0 }
 0x117   : > { %v2415_v38 = vpack.c.bf16 %v2616_v36, %v2616_v36  ;;  %v1199_v40 = vpop.f32.mrb[25].mxu1  ;;  %v2349_v41 = vpack.c.bf16 %v943_v39, %v943_v39  ;;  %v2553_v43 = vpop.f32.mrb[26].mxu0 }
 0x118   : > { %v2413_v42 = vpack.c.bf16 %v1199_v40, %v1199_v40  ;;  %v2617_v44 = vpop.f32.mrb[26].mxu1  ;;  %1897 = vst.msk [vmem:[%s2918_s24 + $0x68] sm:$0xf] %vm1870_vm1, %v2351_v37  ;;  %v2352_v45 = vpack.c.bf16 %v2553_v43, %v2553_v43  ;;  %v946_v47 = vpop.f32.mrb[27].mxu0 }
 0x119   : > { %1961 = vst.msk [vmem:[%s2918_s24 + $0x168] sm:$0xf] %vm1870_vm1, %v2415_v38  ;;  %v2416_v46 = vpack.c.bf16 %v2617_v44, %v2617_v44  ;;  %v1202_v48 = vpop.f32.mrb[27].mxu1  ;;  %1895 = vst.msk [vmem:[%s2918_s24 + $0x60] sm:$0xf] %vm1870_vm1, %v2349_v41  ;;  %v2350_v49 = vpack.c.bf16 %v946_v47, %v946_v47 }
 0x11a   : > { %1959 = vst.msk [vmem:[%s2918_s24 + $0x160] sm:$0xf] %vm1870_vm1, %v2413_v42  ;;  %v2414_v50 = vpack.c.bf16 %v1202_v48, %v1202_v48  ;;  %1898 = vst.msk [vmem:[%s2918_s24 + $0x6c] sm:$0xf] %vm1870_vm1, %v2352_v45 }
 0x11b   : > { %1962 = vst.msk [vmem:[%s2918_s24 + $0x16c] sm:$0xf] %vm1870_vm1, %v2416_v46  ;;  %1896 = vst.msk [vmem:[%s2918_s24 + $0x64] sm:$0xf] %vm1870_vm1, %v2350_v49 }
 0x11c   : > { %1960 = vst.msk [vmem:[%s2918_s24 + $0x164] sm:$0xf] %vm1870_vm1, %v2414_v50 }
 0x11d   : > { %v2556_v51 = vpop.f32.mrb[28].mxu0 }
 0x11e   : > { %v2620_v52 = vpop.f32.mrb[28].mxu1  ;;  %v2355_v53 = vpack.c.bf16 %v2556_v51, %v2556_v51  ;;  %v959_v55 = vpop.f32.mrb[29].mxu0 }
 0x11f   : > { %v2419_v54 = vpack.c.bf16 %v2620_v52, %v2620_v52  ;;  %v1215_v56 = vpop.f32.mrb[29].mxu1  ;;  %v2353_v57 = vpack.c.bf16 %v959_v55, %v959_v55  ;;  %v2557_v59 = vpop.f32.mrb[30].mxu0 }
 0x120   : > { %v2417_v58 = vpack.c.bf16 %v1215_v56, %v1215_v56  ;;  %v2621_v60 = vpop.f32.mrb[30].mxu1  ;;  %1901 = vst.msk [vmem:[%s2918_s24 + $0x78] sm:$0xf] %vm1870_vm1, %v2355_v53  ;;  %v2356_v61 = vpack.c.bf16 %v2557_v59, %v2557_v59  ;;  %v962_v63 = vpop.f32.mrb[31].mxu0 }
 0x121   : > { %1965 = vst.msk [vmem:[%s2918_s24 + $0x178] sm:$0xf] %vm1870_vm1, %v2419_v54  ;;  %v2420_v62 = vpack.c.bf16 %v2621_v60, %v2621_v60  ;;  %v1218_v0 = vpop.f32.mrb[31].mxu1  ;;  %1899 = vst.msk [vmem:[%s2918_s24 + $0x70] sm:$0xf] %vm1870_vm1, %v2353_v57  ;;  %v2354_v1 = vpack.c.bf16 %v962_v63, %v962_v63 }
 0x122   : > { %1963 = vst.msk [vmem:[%s2918_s24 + $0x170] sm:$0xf] %vm1870_vm1, %v2417_v58  ;;  %v2418_v2 = vpack.c.bf16 %v1218_v0, %v1218_v0  ;;  %1902 = vst.msk [vmem:[%s2918_s24 + $0x7c] sm:$0xf] %vm1870_vm1, %v2356_v61 }
 0x123   : > { %1966 = vst.msk [vmem:[%s2918_s24 + $0x17c] sm:$0xf] %vm1870_vm1, %v2420_v62  ;;  %1900 = vst.msk [vmem:[%s2918_s24 + $0x74] sm:$0xf] %vm1870_vm1, %v2354_v1 }
 0x124   : > { %1964 = vst.msk [vmem:[%s2918_s24 + $0x174] sm:$0xf] %vm1870_vm1, %v2418_v2 }
 0x125   : > { %v2560_v3 = vpop.f32.mrb[32].mxu0 }
 0x126   : > { %v2624_v4 = vpop.f32.mrb[32].mxu1  ;;  %v2359_v5 = vpack.c.bf16 %v2560_v3, %v2560_v3  ;;  %v975_v7 = vpop.f32.mrb[33].mxu0 }
 0x127   : > { %v2423_v6 = vpack.c.bf16 %v2624_v4, %v2624_v4  ;;  %v1231_v8 = vpop.f32.mrb[33].mxu1  ;;  %v2357_v9 = vpack.c.bf16 %v975_v7, %v975_v7  ;;  %v2561_v11 = vpop.f32.mrb[34].mxu0 }
 0x128   : > { %v2421_v10 = vpack.c.bf16 %v1231_v8, %v1231_v8  ;;  %v2625_v12 = vpop.f32.mrb[34].mxu1  ;;  %1905 = vst.msk [vmem:[%s2918_s24 + $0x88] sm:$0xf] %vm1870_vm1, %v2359_v5  ;;  %v2360_v13 = vpack.c.bf16 %v2561_v11, %v2561_v11  ;;  %v978_v15 = vpop.f32.mrb[35].mxu0 }
 0x129   : > { %1969 = vst.msk [vmem:[%s2918_s24 + $0x188] sm:$0xf] %vm1870_vm1, %v2423_v6  ;;  %v2424_v14 = vpack.c.bf16 %v2625_v12, %v2625_v12  ;;  %v1234_v16 = vpop.f32.mrb[35].mxu1  ;;  %1903 = vst.msk [vmem:[%s2918_s24 + $0x80] sm:$0xf] %vm1870_vm1, %v2357_v9  ;;  %v2358_v17 = vpack.c.bf16 %v978_v15, %v978_v15 }
 0x12a   : > { %1967 = vst.msk [vmem:[%s2918_s24 + $0x180] sm:$0xf] %vm1870_vm1, %v2421_v10  ;;  %v2422_v18 = vpack.c.bf16 %v1234_v16, %v1234_v16  ;;  %1906 = vst.msk [vmem:[%s2918_s24 + $0x8c] sm:$0xf] %vm1870_vm1, %v2360_v13 }
 0x12b   : > { %1970 = vst.msk [vmem:[%s2918_s24 + $0x18c] sm:$0xf] %vm1870_vm1, %v2424_v14  ;;  %1904 = vst.msk [vmem:[%s2918_s24 + $0x84] sm:$0xf] %vm1870_vm1, %v2358_v17 }
 0x12c   : > { %1968 = vst.msk [vmem:[%s2918_s24 + $0x184] sm:$0xf] %vm1870_vm1, %v2422_v18 }
 0x12d   : > { %v2564_v19 = vpop.f32.mrb[36].mxu0 }
 0x12e   : > { %v2628_v20 = vpop.f32.mrb[36].mxu1  ;;  %v2363_v21 = vpack.c.bf16 %v2564_v19, %v2564_v19  ;;  %v991_v23 = vpop.f32.mrb[37].mxu0 }
 0x12f   : > { %v2427_v22 = vpack.c.bf16 %v2628_v20, %v2628_v20  ;;  %v1247_v24 = vpop.f32.mrb[37].mxu1  ;;  %v2361_v25 = vpack.c.bf16 %v991_v23, %v991_v23  ;;  %v2565_v27 = vpop.f32.mrb[38].mxu0 }
 0x130   : > { %v2425_v26 = vpack.c.bf16 %v1247_v24, %v1247_v24  ;;  %v2629_v28 = vpop.f32.mrb[38].mxu1  ;;  %1909 = vst.msk [vmem:[%s2918_s24 + $0x98] sm:$0xf] %vm1870_vm1, %v2363_v21  ;;  %v2364_v29 = vpack.c.bf16 %v2565_v27, %v2565_v27  ;;  %v994_v31 = vpop.f32.mrb[39].mxu0 }
 0x131   : > { %1973 = vst.msk [vmem:[%s2918_s24 + $0x198] sm:$0xf] %vm1870_vm1, %v2427_v22  ;;  %v2428_v30 = vpack.c.bf16 %v2629_v28, %v2629_v28  ;;  %v1250_v32 = vpop.f32.mrb[39].mxu1  ;;  %1907 = vst.msk [vmem:[%s2918_s24 + $0x90] sm:$0xf] %vm1870_vm1, %v2361_v25  ;;  %v2362_v33 = vpack.c.bf16 %v994_v31, %v994_v31 }
 0x132   : > { %1971 = vst.msk [vmem:[%s2918_s24 + $0x190] sm:$0xf] %vm1870_vm1, %v2425_v26  ;;  %v2426_v34 = vpack.c.bf16 %v1250_v32, %v1250_v32  ;;  %1910 = vst.msk [vmem:[%s2918_s24 + $0x9c] sm:$0xf] %vm1870_vm1, %v2364_v29 }
 0x133   : > { %1974 = vst.msk [vmem:[%s2918_s24 + $0x19c] sm:$0xf] %vm1870_vm1, %v2428_v30  ;;  %1908 = vst.msk [vmem:[%s2918_s24 + $0x94] sm:$0xf] %vm1870_vm1, %v2362_v33 }
 0x134   : > { %1972 = vst.msk [vmem:[%s2918_s24 + $0x194] sm:$0xf] %vm1870_vm1, %v2426_v34 }
 0x135   : > { %v2568_v35 = vpop.f32.mrb[40].mxu0 }
 0x136   : > { %v2632_v36 = vpop.f32.mrb[40].mxu1  ;;  %v2367_v37 = vpack.c.bf16 %v2568_v35, %v2568_v35  ;;  %v1007_v39 = vpop.f32.mrb[41].mxu0 }
 0x137   : > { %v2431_v38 = vpack.c.bf16 %v2632_v36, %v2632_v36  ;;  %v1263_v40 = vpop.f32.mrb[41].mxu1  ;;  %v2365_v41 = vpack.c.bf16 %v1007_v39, %v1007_v39  ;;  %v2569_v43 = vpop.f32.mrb[42].mxu0 }
 0x138   : > { %v2429_v42 = vpack.c.bf16 %v1263_v40, %v1263_v40  ;;  %v2633_v44 = vpop.f32.mrb[42].mxu1  ;;  %1913 = vst.msk [vmem:[%s2918_s24 + $0xa8] sm:$0xf] %vm1870_vm1, %v2367_v37  ;;  %v2368_v45 = vpack.c.bf16 %v2569_v43, %v2569_v43  ;;  %v1010_v47 = vpop.f32.mrb[43].mxu0 }
 0x139   : > { %1977 = vst.msk [vmem:[%s2918_s24 + $0x1a8] sm:$0xf] %vm1870_vm1, %v2431_v38  ;;  %v2432_v46 = vpack.c.bf16 %v2633_v44, %v2633_v44  ;;  %v1266_v48 = vpop.f32.mrb[43].mxu1  ;;  %1911 = vst.msk [vmem:[%s2918_s24 + $0xa0] sm:$0xf] %vm1870_vm1, %v2365_v41  ;;  %v2366_v49 = vpack.c.bf16 %v1010_v47, %v1010_v47 }
 0x13a   : > { %1975 = vst.msk [vmem:[%s2918_s24 + $0x1a0] sm:$0xf] %vm1870_vm1, %v2429_v42  ;;  %v2430_v50 = vpack.c.bf16 %v1266_v48, %v1266_v48  ;;  %1914 = vst.msk [vmem:[%s2918_s24 + $0xac] sm:$0xf] %vm1870_vm1, %v2368_v45 }
 0x13b   : > { %1978 = vst.msk [vmem:[%s2918_s24 + $0x1ac] sm:$0xf] %vm1870_vm1, %v2432_v46  ;;  %1912 = vst.msk [vmem:[%s2918_s24 + $0xa4] sm:$0xf] %vm1870_vm1, %v2366_v49 }
 0x13c   : > { %1976 = vst.msk [vmem:[%s2918_s24 + $0x1a4] sm:$0xf] %vm1870_vm1, %v2430_v50 }
 0x13d   : > { %v2572_v51 = vpop.f32.mrb[44].mxu0 }
 0x13e   : > { %v2636_v52 = vpop.f32.mrb[44].mxu1  ;;  %v2371_v53 = vpack.c.bf16 %v2572_v51, %v2572_v51  ;;  %v1023_v55 = vpop.f32.mrb[45].mxu0 }
 0x13f   : > { %v2435_v54 = vpack.c.bf16 %v2636_v52, %v2636_v52  ;;  %v1279_v56 = vpop.f32.mrb[45].mxu1  ;;  %v2369_v57 = vpack.c.bf16 %v1023_v55, %v1023_v55  ;;  %v2573_v59 = vpop.f32.mrb[46].mxu0 }
 0x140   : > { %v2433_v58 = vpack.c.bf16 %v1279_v56, %v1279_v56  ;;  %v2637_v60 = vpop.f32.mrb[46].mxu1  ;;  %1917 = vst.msk [vmem:[%s2918_s24 + $0xb8] sm:$0xf] %vm1870_vm1, %v2371_v53  ;;  %v2372_v61 = vpack.c.bf16 %v2573_v59, %v2573_v59  ;;  %v1026_v63 = vpop.f32.mrb[47].mxu0 }
 0x141   : > { %1981 = vst.msk [vmem:[%s2918_s24 + $0x1b8] sm:$0xf] %vm1870_vm1, %v2435_v54  ;;  %v2436_v62 = vpack.c.bf16 %v2637_v60, %v2637_v60  ;;  %v1282_v0 = vpop.f32.mrb[47].mxu1  ;;  %1915 = vst.msk [vmem:[%s2918_s24 + $0xb0] sm:$0xf] %vm1870_vm1, %v2369_v57  ;;  %v2370_v1 = vpack.c.bf16 %v1026_v63, %v1026_v63 }
 0x142   : > { %1979 = vst.msk [vmem:[%s2918_s24 + $0x1b0] sm:$0xf] %vm1870_vm1, %v2433_v58  ;;  %v2434_v2 = vpack.c.bf16 %v1282_v0, %v1282_v0  ;;  %1918 = vst.msk [vmem:[%s2918_s24 + $0xbc] sm:$0xf] %vm1870_vm1, %v2372_v61 }
 0x143   : > { %1982 = vst.msk [vmem:[%s2918_s24 + $0x1bc] sm:$0xf] %vm1870_vm1, %v2436_v62  ;;  %1916 = vst.msk [vmem:[%s2918_s24 + $0xb4] sm:$0xf] %vm1870_vm1, %v2370_v1 }
 0x144   : > { %1980 = vst.msk [vmem:[%s2918_s24 + $0x1b4] sm:$0xf] %vm1870_vm1, %v2434_v2 }
 0x145   : > { %v2576_v3 = vpop.f32.mrb[48].mxu0 }
 0x146   : > { %v2640_v4 = vpop.f32.mrb[48].mxu1  ;;  %v2375_v5 = vpack.c.bf16 %v2576_v3, %v2576_v3  ;;  %v1039_v7 = vpop.f32.mrb[49].mxu0 }
 0x147   : > { %v2439_v6 = vpack.c.bf16 %v2640_v4, %v2640_v4  ;;  %v1295_v8 = vpop.f32.mrb[49].mxu1  ;;  %v2373_v9 = vpack.c.bf16 %v1039_v7, %v1039_v7  ;;  %v2577_v11 = vpop.f32.mrb[50].mxu0 }
 0x148   : > { %v2437_v10 = vpack.c.bf16 %v1295_v8, %v1295_v8  ;;  %v2641_v12 = vpop.f32.mrb[50].mxu1  ;;  %1921 = vst.msk [vmem:[%s2918_s24 + $0xc8] sm:$0xf] %vm1870_vm1, %v2375_v5  ;;  %v2376_v13 = vpack.c.bf16 %v2577_v11, %v2577_v11  ;;  %v1042_v15 = vpop.f32.mrb[51].mxu0 }
 0x149   : > { %1985 = vst.msk [vmem:[%s2918_s24 + $0x1c8] sm:$0xf] %vm1870_vm1, %v2439_v6  ;;  %v2440_v14 = vpack.c.bf16 %v2641_v12, %v2641_v12  ;;  %v1298_v16 = vpop.f32.mrb[51].mxu1  ;;  %1919 = vst.msk [vmem:[%s2918_s24 + $0xc0] sm:$0xf] %vm1870_vm1, %v2373_v9  ;;  %v2374_v17 = vpack.c.bf16 %v1042_v15, %v1042_v15 }
 0x14a   : > { %1983 = vst.msk [vmem:[%s2918_s24 + $0x1c0] sm:$0xf] %vm1870_vm1, %v2437_v10  ;;  %v2438_v18 = vpack.c.bf16 %v1298_v16, %v1298_v16  ;;  %1922 = vst.msk [vmem:[%s2918_s24 + $0xcc] sm:$0xf] %vm1870_vm1, %v2376_v13 }
 0x14b   : > { %1986 = vst.msk [vmem:[%s2918_s24 + $0x1cc] sm:$0xf] %vm1870_vm1, %v2440_v14  ;;  %1920 = vst.msk [vmem:[%s2918_s24 + $0xc4] sm:$0xf] %vm1870_vm1, %v2374_v17 }
 0x14c   : > { %1984 = vst.msk [vmem:[%s2918_s24 + $0x1c4] sm:$0xf] %vm1870_vm1, %v2438_v18 }
 0x14d   : > { %v2580_v19 = vpop.f32.mrb[52].mxu0 }
 0x14e   : > { %v2644_v20 = vpop.f32.mrb[52].mxu1  ;;  %v2379_v21 = vpack.c.bf16 %v2580_v19, %v2580_v19  ;;  %v1055_v23 = vpop.f32.mrb[53].mxu0 }
 0x14f   : > { %v2443_v22 = vpack.c.bf16 %v2644_v20, %v2644_v20  ;;  %v1311_v24 = vpop.f32.mrb[53].mxu1  ;;  %v2377_v25 = vpack.c.bf16 %v1055_v23, %v1055_v23  ;;  %v2581_v27 = vpop.f32.mrb[54].mxu0 }
 0x150   : > { %v2441_v26 = vpack.c.bf16 %v1311_v24, %v1311_v24  ;;  %v2645_v28 = vpop.f32.mrb[54].mxu1  ;;  %1925 = vst.msk [vmem:[%s2918_s24 + $0xd8] sm:$0xf] %vm1870_vm1, %v2379_v21  ;;  %v2380_v29 = vpack.c.bf16 %v2581_v27, %v2581_v27  ;;  %v1058_v31 = vpop.f32.mrb[55].mxu0 }
 0x151   : > { %1989 = vst.msk [vmem:[%s2918_s24 + $0x1d8] sm:$0xf] %vm1870_vm1, %v2443_v22  ;;  %v2444_v30 = vpack.c.bf16 %v2645_v28, %v2645_v28  ;;  %v1314_v32 = vpop.f32.mrb[55].mxu1  ;;  %1923 = vst.msk [vmem:[%s2918_s24 + $0xd0] sm:$0xf] %vm1870_vm1, %v2377_v25  ;;  %v2378_v33 = vpack.c.bf16 %v1058_v31, %v1058_v31 }
 0x152   : > { %1987 = vst.msk [vmem:[%s2918_s24 + $0x1d0] sm:$0xf] %vm1870_vm1, %v2441_v26  ;;  %v2442_v34 = vpack.c.bf16 %v1314_v32, %v1314_v32  ;;  %1926 = vst.msk [vmem:[%s2918_s24 + $0xdc] sm:$0xf] %vm1870_vm1, %v2380_v29 }
 0x153   : > { %1990 = vst.msk [vmem:[%s2918_s24 + $0x1dc] sm:$0xf] %vm1870_vm1, %v2444_v30  ;;  %1924 = vst.msk [vmem:[%s2918_s24 + $0xd4] sm:$0xf] %vm1870_vm1, %v2378_v33 }
 0x154   : > { %1988 = vst.msk [vmem:[%s2918_s24 + $0x1d4] sm:$0xf] %vm1870_vm1, %v2442_v34 }
 0x155   : > { %v2584_v35 = vpop.f32.mrb[56].mxu0 }
 0x156   : > { %v2648_v36 = vpop.f32.mrb[56].mxu1  ;;  %v2383_v37 = vpack.c.bf16 %v2584_v35, %v2584_v35  ;;  %v1071_v39 = vpop.f32.mrb[57].mxu0 }
 0x157   : > { %v2447_v38 = vpack.c.bf16 %v2648_v36, %v2648_v36  ;;  %v1327_v40 = vpop.f32.mrb[57].mxu1  ;;  %v2381_v41 = vpack.c.bf16 %v1071_v39, %v1071_v39  ;;  %v2585_v43 = vpop.f32.mrb[58].mxu0 }
 0x158   : > { %v2445_v42 = vpack.c.bf16 %v1327_v40, %v1327_v40  ;;  %v2649_v44 = vpop.f32.mrb[58].mxu1  ;;  %1929 = vst.msk [vmem:[%s2918_s24 + $0xe8] sm:$0xf] %vm1870_vm1, %v2383_v37  ;;  %v2384_v45 = vpack.c.bf16 %v2585_v43, %v2585_v43  ;;  %v1074_v47 = vpop.f32.mrb[59].mxu0 }
 0x159   : > { %1993 = vst.msk [vmem:[%s2918_s24 + $0x1e8] sm:$0xf] %vm1870_vm1, %v2447_v38  ;;  %v2448_v46 = vpack.c.bf16 %v2649_v44, %v2649_v44  ;;  %v1330_v48 = vpop.f32.mrb[59].mxu1  ;;  %1927 = vst.msk [vmem:[%s2918_s24 + $0xe0] sm:$0xf] %vm1870_vm1, %v2381_v41  ;;  %v2382_v49 = vpack.c.bf16 %v1074_v47, %v1074_v47 }
 0x15a   : > { %1991 = vst.msk [vmem:[%s2918_s24 + $0x1e0] sm:$0xf] %vm1870_vm1, %v2445_v42  ;;  %v2446_v50 = vpack.c.bf16 %v1330_v48, %v1330_v48  ;;  %1930 = vst.msk [vmem:[%s2918_s24 + $0xec] sm:$0xf] %vm1870_vm1, %v2384_v45 }
 0x15b   : > { %1994 = vst.msk [vmem:[%s2918_s24 + $0x1ec] sm:$0xf] %vm1870_vm1, %v2448_v46  ;;  %1928 = vst.msk [vmem:[%s2918_s24 + $0xe4] sm:$0xf] %vm1870_vm1, %v2382_v49 }
 0x15c   : > { %1992 = vst.msk [vmem:[%s2918_s24 + $0x1e4] sm:$0xf] %vm1870_vm1, %v2446_v50 }
 0x15d   : > { %v2588_v51 = vpop.f32.mrb[60].mxu0 }
 0x15e   : > { %v2652_v52 = vpop.f32.mrb[60].mxu1  ;;  %v2387_v53 = vpack.c.bf16 %v2588_v51, %v2588_v51  ;;  %v1087_v55 = vpop.f32.mrb[61].mxu0 }
 0x15f   : > { %v2451_v54 = vpack.c.bf16 %v2652_v52, %v2652_v52  ;;  %v1343_v56 = vpop.f32.mrb[61].mxu1  ;;  %v2385_v57 = vpack.c.bf16 %v1087_v55, %v1087_v55  ;;  %v2589_v59 = vpop.f32.mrb[62].mxu0 }
 0x160   : > { %v2449_v58 = vpack.c.bf16 %v1343_v56, %v1343_v56  ;;  %v2653_v60 = vpop.f32.mrb[62].mxu1  ;;  %1933 = vst.msk [vmem:[%s2918_s24 + $0xf8] sm:$0xf] %vm1870_vm1, %v2387_v53  ;;  %v2388_v61 = vpack.c.bf16 %v2589_v59, %v2589_v59  ;;  %v1090_v63 = vpop.f32.mrb[63].mxu0 }
 0x161   : > { %1997 = vst.msk [vmem:[%s2918_s24 + $0x1f8] sm:$0xf] %vm1870_vm1, %v2451_v54  ;;  %v2452_v62 = vpack.c.bf16 %v2653_v60, %v2653_v60  ;;  %v1346_v0 = vpop.f32.mrb[63].mxu1  ;;  %1931 = vst.msk [vmem:[%s2918_s24 + $0xf0] sm:$0xf] %vm1870_vm1, %v2385_v57  ;;  %v2386_v1 = vpack.c.bf16 %v1090_v63, %v1090_v63 }
 0x162   : > { %1995 = vst.msk [vmem:[%s2918_s24 + $0x1f0] sm:$0xf] %vm1870_vm1, %v2449_v58  ;;  %v2450_v2 = vpack.c.bf16 %v1346_v0, %v1346_v0  ;;  %1934 = vst.msk [vmem:[%s2918_s24 + $0xfc] sm:$0xf] %vm1870_vm1, %v2388_v61 }
 0x163   : > { %1998 = vst.msk [vmem:[%s2918_s24 + $0x1fc] sm:$0xf] %vm1870_vm1, %v2452_v62  ;;  %1932 = vst.msk [vmem:[%s2918_s24 + $0xf4] sm:$0xf] %vm1870_vm1, %v2386_v1 }
 0x164   : > { %1996 = vst.msk [vmem:[%s2918_s24 + $0x1f4] sm:$0xf] %vm1870_vm1, %v2450_v2 }
 0x165 PF: > { %s12_s9 = sadd.s32 1, %s2741_s9  }
 0x166   : > { %p9_p4 = scmp.ge.s32.totalorder %s12_s9, 4  }
 0x168   :  { %11 = sbr.rel (!%p9_p4) target bundleno = 1 (0x1), region = 58 }

// kernel: stage1_d_sty_v2_forward.6
= control target key start
LH: loop header
LB: loop body
LE: loop exit
PB: predicated region body
PF: predicated region fallthrough
CT: control target
= control target key end

     0   :  { %vm879_vm0 = vcmask 125952   ;;  %vm944_vm1 = vcmask 130048   ;;  %vm1275_vm2 = vcmask 1040384   ;;  %vm1277_vm3 = vcmask 123904   ;;  %s2382_s1 = inlined_call_operand.vmem [shape: bf16[128,16], index: 1, kind: input, shape index: {}]   ;;  %s2383_s0 = inlined_call_operand.vmem [shape: bf16[512,128], index: 0, kind: input, shape index: {}]   ;;  %s2384_s2 = inlined_call_operand.vmem [shape: bf16[512,16], index: 2, kind: output, shape index: {0}]   ;;  %s2385_s3 = inlined_call_operand.vmem [shape: f32[1,2,16], index: 3, kind: output, shape index: {1}]  }
   0x1   :  { %v1591_v0 = vld [vmem:[%s2382_s1] sm:$0xff]   ;;  %v1592_v1 = vld [vmem:[%s2382_s1 + $0x8] sm:$0xff]   ;;  %v1593_v2 = vld [vmem:[%s2382_s1 + $0x10] sm:$0xff]  }
   0x2   :  { %1495 = vmatprep.subr.bf16.mxu0 %v1591_v0  ;;  %1575 = vmatprep.subr.bf16.mxu1 %v1591_v0  ;;  %v1594_v3 = vld [vmem:[%s2382_s1 + $0x18] sm:$0xff]   ;;  %v1599_v4 = vld [vmem:[%s2383_s0] sm:$0xff]   ;;  %v1596_v6 = vld [vmem:[%s2382_s1 + $0x28] sm:$0xff]  }
   0x3   :  { %1496 = vmatpush3.bf16.msra.mxu0 %v1591_v0  ;;  %1583 = vmatpush3.bf16.msra.mxu1 %v1591_v0  ;;  %v1595_v5 = vld [vmem:[%s2382_s1 + $0x20] sm:$0xff]   ;;  %v1597_v7 = vld [vmem:[%s2382_s1 + $0x30] sm:$0xff]   ;;  %v1598_v8 = vld [vmem:[%s2382_s1 + $0x38] sm:$0xff]  }
   0x4   :  { %1497 = vmatprep.subr.bf16.mxu0 %v1592_v1  ;;  %1576 = vmatprep.subr.bf16.mxu1 %v1592_v1  ;;  %v1615_v9 = vld [vmem:[%s2383_s0 + $0x80] sm:$0xff]   ;;  %v1600_v10 = vld [vmem:[%s2383_s0 + $0x8] sm:$0xff]   ;;  %v1601_v11 = vld [vmem:[%s2383_s0 + $0x10] sm:$0xff]  }
   0x5   :  { %1511 = vmatprep.mubr.bf16.mxu0 %v1599_v4  ;;  %1543 = vmatprep.mubr.bf16.mxu1 %v1615_v9  ;;  %v1616_v12 = vld [vmem:[%s2383_s0 + $0x88] sm:$0xff]   ;;  %v1617_v13 = vld [vmem:[%s2383_s0 + $0x90] sm:$0xff]   ;;  %v1602_v14 = vld [vmem:[%s2383_s0 + $0x18] sm:$0xff]  }
   0x6   :  { %v1603_v15 = vld [vmem:[%s2383_s0 + $0x20] sm:$0xff]   ;;  %v1618_v16 = vld [vmem:[%s2383_s0 + $0x98] sm:$0xff]   ;;  %v1604_v18 = vld [vmem:[%s2383_s0 + $0x28] sm:$0xff]  }
   0x7   :  { %1498 = vmatpush3.bf16.msra.mxu0 %v1592_v1  ;;  %1584 = vmatpush3.bf16.msra.mxu1 %v1592_v1  ;;  %v1619_v17 = vld [vmem:[%s2383_s0 + $0xa0] sm:$0xff]   ;;  %v1620_v19 = vld [vmem:[%s2383_s0 + $0xa8] sm:$0xff]   ;;  %v1605_v20 = vld [vmem:[%s2383_s0 + $0x30] sm:$0xff]  }
   0x8   :  { %1499 = vmatprep.subr.bf16.mxu0 %v1593_v2  ;;  %1577 = vmatprep.subr.bf16.mxu1 %v1593_v2  ;;  %v1621_v21 = vld [vmem:[%s2383_s0 + $0xb0] sm:$0xff]   ;;  %v1606_v22 = vld [vmem:[%s2383_s0 + $0x38] sm:$0xff]   ;;  %v1607_v24 = vld [vmem:[%s2383_s0 + $0x40] sm:$0xff]  }
   0x9   :  { %v1622_v23 = vld [vmem:[%s2383_s0 + $0xb8] sm:$0xff]   ;;  %v1623_v25 = vld [vmem:[%s2383_s0 + $0xc0] sm:$0xff]   ;;  %v1608_v26 = vld [vmem:[%s2383_s0 + $0x48] sm:$0xff]  }
   0xa   :  { %v1624_v27 = vld [vmem:[%s2383_s0 + $0xc8] sm:$0xff]   ;;  %v1609_v28 = vld [vmem:[%s2383_s0 + $0x50] sm:$0xff]   ;;  %v1610_v30 = vld [vmem:[%s2383_s0 + $0x58] sm:$0xff]  }
   0xb   :  { %1500 = vmatpush3.bf16.msra.mxu0 %v1593_v2  ;;  %1585 = vmatpush3.bf16.msra.mxu1 %v1593_v2  ;;  %v1625_v29 = vld [vmem:[%s2383_s0 + $0xd0] sm:$0xff]   ;;  %v1626_v31 = vld [vmem:[%s2383_s0 + $0xd8] sm:$0xff]   ;;  %v1611_v32 = vld [vmem:[%s2383_s0 + $0x60] sm:$0xff]  }
   0xc   :  { %1501 = vmatprep.subr.bf16.mxu0 %v1594_v3  ;;  %1578 = vmatprep.subr.bf16.mxu1 %v1594_v3  ;;  %v1627_v33 = vld [vmem:[%s2383_s0 + $0xe0] sm:$0xff]   ;;  %v1612_v34 = vld [vmem:[%s2383_s0 + $0x68] sm:$0xff]   ;;  %v1613_v36 = vld [vmem:[%s2383_s0 + $0x70] sm:$0xff]  }
   0xd   :  { %v1628_v35 = vld [vmem:[%s2383_s0 + $0xe8] sm:$0xff]   ;;  %v1629_v37 = vld [vmem:[%s2383_s0 + $0xf0] sm:$0xff]   ;;  %v1614_v38 = vld [vmem:[%s2383_s0 + $0x78] sm:$0xff]  }
   0xe   :  { %v1630_v39 = vld [vmem:[%s2383_s0 + $0xf8] sm:$0xff]  }
   0xf   :  { %1502 = vmatpush3.bf16.msra.mxu0 %v1594_v3  ;;  %1586 = vmatpush3.bf16.msra.mxu1 %v1594_v3 }
  0x10   :  { %1503 = vmatprep.subr.bf16.mxu0 %v1595_v5  ;;  %1579 = vmatprep.subr.bf16.mxu1 %v1595_v5 }
  0x13   :  { %1504 = vmatpush3.bf16.msra.mxu0 %v1595_v5  ;;  %1587 = vmatpush3.bf16.msra.mxu1 %v1595_v5 }
  0x14   :  { %1505 = vmatprep.subr.bf16.mxu0 %v1596_v6  ;;  %1580 = vmatprep.subr.bf16.mxu1 %v1596_v6 }
  0x17   :  { %1506 = vmatpush3.bf16.msra.mxu0 %v1596_v6  ;;  %1588 = vmatpush3.bf16.msra.mxu1 %v1596_v6 }
  0x18   :  { %1507 = vmatprep.subr.bf16.mxu0 %v1597_v7  ;;  %1581 = vmatprep.subr.bf16.mxu1 %v1597_v7 }
  0x1b   :  { %1508 = vmatpush3.bf16.msra.mxu0 %v1597_v7  ;;  %1589 = vmatpush3.bf16.msra.mxu1 %v1597_v7 }
  0x1c   :  { %1509 = vmatprep.subr.bf16.mxu0 %v1598_v8  ;;  %1582 = vmatprep.subr.bf16.mxu1 %v1598_v8 }
  0x1f   :  { %1510 = vmatpush3.bf16.msra.mxu0 %v1598_v8  ;;  %1590 = vmatpush3.bf16.msra.mxu1 %v1598_v8 }
  0x22   :  { %1512 = vmatmul.mubr.bf16.vlgmr.msra.gmra.mrb[0].mxu0 %v1600_v10  ;;  %1544 = vmatmul.mubr.bf16.vlgmr.msra.gmra.mrb[0].mxu1 %v1616_v12 }
  0x23   :  { %1515 = vmatprep.mubr.bf16.mxu0 %v1601_v11  ;;  %1547 = vmatprep.mubr.bf16.mxu1 %v1617_v13 }
  0x2a   :  { %1516 = vmatmul.mubr.bf16.gmra.mrb[4].mxu0 %v1602_v14  ;;  %1548 = vmatmul.mubr.bf16.gmra.mrb[4].mxu1 %v1618_v16 }
  0x2b   :  { %1519 = vmatprep.mubr.bf16.mxu0 %v1603_v15  ;;  %1551 = vmatprep.mubr.bf16.mxu1 %v1619_v17 }
  0x32   :  { %1520 = vmatmul.mubr.bf16.gmra.mrb[8].mxu0 %v1604_v18  ;;  %1552 = vmatmul.mubr.bf16.gmra.mrb[8].mxu1 %v1620_v19 }
  0x33   :  { %1523 = vmatprep.mubr.bf16.mxu0 %v1605_v20  ;;  %1555 = vmatprep.mubr.bf16.mxu1 %v1621_v21 }
  0x3a   :  { %1524 = vmatmul.mubr.bf16.gmra.mrb[12].mxu0 %v1606_v22  ;;  %1556 = vmatmul.mubr.bf16.gmra.mrb[12].mxu1 %v1622_v23 }
  0x3b   :  { %1527 = vmatprep.mubr.bf16.mxu0 %v1607_v24  ;;  %1559 = vmatprep.mubr.bf16.mxu1 %v1623_v25 }
  0x42   :  { %1528 = vmatmul.mubr.bf16.gmra.mrb[16].mxu0 %v1608_v26  ;;  %1560 = vmatmul.mubr.bf16.gmra.mrb[16].mxu1 %v1624_v27 }
  0x43   :  { %1531 = vmatprep.mubr.bf16.mxu0 %v1609_v28  ;;  %1563 = vmatprep.mubr.bf16.mxu1 %v1625_v29 }
  0x4a   :  { %1532 = vmatmul.mubr.bf16.gmra.mrb[20].mxu0 %v1610_v30  ;;  %1564 = vmatmul.mubr.bf16.gmra.mrb[20].mxu1 %v1626_v31 }
  0x4b   :  { %1535 = vmatprep.mubr.bf16.mxu0 %v1611_v32  ;;  %1567 = vmatprep.mubr.bf16.mxu1 %v1627_v33 }
  0x52   :  { %1536 = vmatmul.mubr.bf16.gmra.mrb[24].mxu0 %v1612_v34  ;;  %1568 = vmatmul.mubr.bf16.gmra.mrb[24].mxu1 %v1628_v35 }
  0x53   :  { %1539 = vmatprep.mubr.bf16.mxu0 %v1613_v36  ;;  %1571 = vmatprep.mubr.bf16.mxu1 %v1629_v37 }
  0x5a   :  { %1540 = vmatmul.mubr.bf16.gmra.mrb[28].mxu0 %v1614_v38  ;;  %1572 = vmatmul.mubr.bf16.gmra.mrb[28].mxu1 %v1630_v39 }
  0xf5   :  { %v1513_v40 = vpop.f32.mrb[0].mxu0  ;;  %v1771_v41 = vpop.f32.mrb[0].mxu1 }
  0xf6   :  { %v1393_v42 = vpack.c.bf16 %v1513_v40, %v1513_v40  ;;  %v368_v43 = vpop.f32.mrb[1].mxu0  ;;  %v1425_v44 = vpack.c.bf16 %v1771_v41, %v1771_v41  ;;  %v1775_v45 = vpop.f32.mrb[1].mxu1  ;;  %v1080_v50 = vmul.f32 %v1513_v40, %v1513_v40  ;;  %v948_v61 = vsel %vm944_vm1, %v1513_v40, 0.0 }
  0xf7   :  { %v1391_v46 = vpack.c.bf16 %v368_v43, %v368_v43  ;;  %v1078_v47 = vmul.f32 %v368_v43, %v368_v43  ;;  %v1514_v48 = vpop.f32.mrb[2].mxu0  ;;  %v1777_v49 = vpop.f32.mrb[2].mxu1  ;;  %v945_v54 = vsel %vm944_vm1, %v368_v43, 0.0  ;;  %v1423_v60 = vpack.c.bf16 %v1775_v45, %v1775_v45 }
  0xf8   :  { %882 = vst.msk [vmem:[%s2384_s2 + $0x8] sm:$0xf] %vm879_vm0, %v1393_v42  ;;  %v1394_v51 = vpack.c.bf16 %v1514_v48, %v1514_v48  ;;  %v371_v52 = vpop.f32.mrb[3].mxu0  ;;  %914 = vst.msk [vmem:[%s2384_s2 + $0x88] sm:$0xf] %vm879_vm0, %v1425_v44  ;;  %v1787_v53 = vpop.f32.mrb[3].mxu1  ;;  %v1081_v58 = vmul.f32 %v1514_v48, %v1514_v48  ;;  %v1426_v0 = vpack.c.bf16 %v1777_v49, %v1777_v49 }
  0xf9   :  { %880 = vst.msk [vmem:[%s2384_s2] sm:$0xf] %vm879_vm0, %v1391_v46  ;;  %v1392_v55 = vpack.c.bf16 %v371_v52, %v371_v52  ;;  %v946_v56 = vsel %vm944_vm1, %v371_v52, 0.0  ;;  %v1079_v57 = vmul.f32 %v371_v52, %v371_v52  ;;  %v1142_v62 = vsel %vm944_vm1, %v1078_v47, 0.0  ;;  %912 = vst.msk [vmem:[%s2384_s2 + $0x80] sm:$0xf] %vm879_vm0, %v1423_v60 }
  0xfa   :  { %883 = vst.msk [vmem:[%s2384_s2 + $0xc] sm:$0xf] %vm879_vm0, %v1394_v51  ;;  %v947_v59 = vadd.f32 %v946_v56, %v945_v54  ;;  %v1145_v3 = vsel %vm944_vm1, %v1080_v50, 0.0  ;;  %915 = vst.msk [vmem:[%s2384_s2 + $0x8c] sm:$0xf] %vm879_vm0, %v1426_v0  ;;  %v1424_v5 = vpack.c.bf16 %v1787_v53, %v1787_v53  ;;  %v950_v7 = vsel %vm944_vm1, %v1514_v48, 0.0 }
  0xfb   :  { %881 = vst.msk [vmem:[%s2384_s2 + $0x4] sm:$0xf] %vm879_vm0, %v1392_v55  ;;  %v1143_v63 = vsel %vm944_vm1, %v1079_v57, 0.0  ;;  %v1147_v8 = vsel %vm944_vm1, %v1081_v58, 0.0 }
  0xfc   :  { %v949_v1 = vadd.f32 %v948_v61, %v947_v59  ;;  %v1144_v2 = vadd.f32 %v1143_v63, %v1142_v62  ;;  %913 = vst.msk [vmem:[%s2384_s2 + $0x84] sm:$0xf] %vm879_vm0, %v1424_v5 }
  0xfd   :  { %v1517_v4 = vpop.f32.mrb[4].mxu0  ;;  %v1821_v6 = vpop.f32.mrb[4].mxu1 }
  0xfe   :  { %v1146_v9 = vadd.f32 %v1145_v3, %v1144_v2  ;;  %v1397_v10 = vpack.c.bf16 %v1517_v4, %v1517_v4  ;;  %v384_v11 = vpop.f32.mrb[5].mxu0  ;;  %v1825_v12 = vpop.f32.mrb[5].mxu1  ;;  %v951_v14 = vadd.f32 %v950_v7, %v949_v1  ;;  %v1084_v26 = vmul.f32 %v1517_v4, %v1517_v4 }
  0xff   :  { %v1395_v13 = vpack.c.bf16 %v384_v11, %v384_v11  ;;  %v952_v15 = vsel %vm944_vm1, %v384_v11, 0.0  ;;  %v1082_v16 = vmul.f32 %v384_v11, %v384_v11  ;;  %v1518_v17 = vpop.f32.mrb[6].mxu0  ;;  %v1832_v18 = vpop.f32.mrb[6].mxu1  ;;  %v1429_v31 = vpack.c.bf16 %v1821_v6, %v1821_v6 }
 0x100   :  { %886 = vst.msk [vmem:[%s2384_s2 + $0x18] sm:$0xf] %vm879_vm0, %v1397_v10  ;;  %v1148_v19 = vadd.f32 %v1147_v8, %v1146_v9  ;;  %v1398_v20 = vpack.c.bf16 %v1518_v17, %v1518_v17  ;;  %v387_v21 = vpop.f32.mrb[7].mxu0  ;;  %v1838_v22 = vpop.f32.mrb[7].mxu1  ;;  %v953_v23 = vadd.f32 %v952_v15, %v951_v14  ;;  %v956_v32 = vsel %vm944_vm1, %v1517_v4, 0.0 }
 0x101   :  { %884 = vst.msk [vmem:[%s2384_s2 + $0x10] sm:$0xf] %vm879_vm0, %v1395_v13  ;;  %v1149_v24 = vsel %vm944_vm1, %v1082_v16, 0.0  ;;  %v1396_v25 = vpack.c.bf16 %v387_v21, %v387_v21  ;;  %v954_v28 = vsel %vm944_vm1, %v387_v21, 0.0  ;;  %v1083_v29 = vmul.f32 %v387_v21, %v387_v21  ;;  %918 = vst.msk [vmem:[%s2384_s2 + $0x98] sm:$0xf] %vm879_vm0, %v1429_v31 }
 0x102   :  { %v1150_v27 = vadd.f32 %v1149_v24, %v1148_v19  ;;  %887 = vst.msk [vmem:[%s2384_s2 + $0x1c] sm:$0xf] %vm879_vm0, %v1398_v20  ;;  %v955_v30 = vadd.f32 %v954_v28, %v953_v23  ;;  %v1085_v33 = vmul.f32 %v1518_v17, %v1518_v17  ;;  %v1427_v35 = vpack.c.bf16 %v1825_v12, %v1825_v12 }
 0x103   :  { %885 = vst.msk [vmem:[%s2384_s2 + $0x14] sm:$0xf] %vm879_vm0, %v1396_v25  ;;  %v1151_v34 = vsel %vm944_vm1, %v1083_v29, 0.0  ;;  %v1153_v40 = vsel %vm944_vm1, %v1084_v26, 0.0  ;;  %v958_v42 = vsel %vm944_vm1, %v1518_v17, 0.0  ;;  %v1430_v5 = vpack.c.bf16 %v1832_v18, %v1832_v18 }
 0x104   :  { %v957_v36 = vadd.f32 %v956_v32, %v955_v30  ;;  %v1152_v37 = vadd.f32 %v1151_v34, %v1150_v27  ;;  %916 = vst.msk [vmem:[%s2384_s2 + $0x90] sm:$0xf] %vm879_vm0, %v1427_v35  ;;  %v1155_v55 = vsel %vm944_vm1, %v1085_v33, 0.0  ;;  %v1428_v14 = vpack.c.bf16 %v1838_v22, %v1838_v22 }
 0x105   :  { %v1521_v38 = vpop.f32.mrb[8].mxu0  ;;  %v1864_v39 = vpop.f32.mrb[8].mxu1  ;;  %919 = vst.msk [vmem:[%s2384_s2 + $0x9c] sm:$0xf] %vm879_vm0, %v1430_v5 }
 0x106   :  { %v1401_v43 = vpack.c.bf16 %v1521_v38, %v1521_v38  ;;  %v400_v44 = vpop.f32.mrb[9].mxu0  ;;  %v1872_v46 = vpop.f32.mrb[9].mxu1  ;;  %v1154_v47 = vadd.f32 %v1153_v40, %v1152_v37  ;;  %v959_v50 = vadd.f32 %v958_v42, %v957_v36  ;;  %v1088_v63 = vmul.f32 %v1521_v38, %v1521_v38  ;;  %917 = vst.msk [vmem:[%s2384_s2 + $0x94] sm:$0xf] %vm879_vm0, %v1428_v14 }
 0x107   :  { %v1399_v48 = vpack.c.bf16 %v400_v44, %v400_v44  ;;  %v960_v51 = vsel %vm944_vm1, %v400_v44, 0.0  ;;  %v1522_v52 = vpop.f32.mrb[10].mxu0  ;;  %v1875_v54 = vpop.f32.mrb[10].mxu1  ;;  %v1086_v56 = vmul.f32 %v400_v44, %v400_v44  ;;  %v964_v7 = vsel %vm944_vm1, %v1521_v38, 0.0 }
 0x108   :  { %890 = vst.msk [vmem:[%s2384_s2 + $0x28] sm:$0xf] %vm879_vm0, %v1401_v43  ;;  %v1402_v57 = vpack.c.bf16 %v1522_v52, %v1522_v52  ;;  %v403_v58 = vpop.f32.mrb[11].mxu0  ;;  %v1882_v59 = vpop.f32.mrb[11].mxu1  ;;  %v961_v60 = vadd.f32 %v960_v51, %v959_v50  ;;  %v1156_v61 = vadd.f32 %v1155_v55, %v1154_v47  ;;  %v1089_v8 = vmul.f32 %v1522_v52, %v1522_v52 }
 0x109   :  { %888 = vst.msk [vmem:[%s2384_s2 + $0x20] sm:$0xf] %vm879_vm0, %v1399_v48  ;;  %v1400_v62 = vpack.c.bf16 %v403_v58, %v403_v58  ;;  %v1157_v0 = vsel %vm944_vm1, %v1086_v56, 0.0  ;;  %v962_v1 = vsel %vm944_vm1, %v403_v58, 0.0  ;;  %v1087_v2 = vmul.f32 %v403_v58, %v403_v58 }
 0x10a   :  { %891 = vst.msk [vmem:[%s2384_s2 + $0x2c] sm:$0xf] %vm879_vm0, %v1402_v57  ;;  %v1158_v3 = vadd.f32 %v1157_v0, %v1156_v61  ;;  %v963_v4 = vadd.f32 %v962_v1, %v961_v60  ;;  %v1161_v16 = vsel %vm944_vm1, %v1088_v63, 0.0  ;;  %v966_v17 = vsel %vm944_vm1, %v1522_v52, 0.0 }
 0x10b   :  { %889 = vst.msk [vmem:[%s2384_s2 + $0x24] sm:$0xf] %vm879_vm0, %v1400_v62  ;;  %v1159_v9 = vsel %vm944_vm1, %v1087_v2, 0.0  ;;  %v1163_v29 = vsel %vm944_vm1, %v1089_v8, 0.0  ;;  %v1433_v47 = vpack.c.bf16 %v1864_v39, %v1864_v39  ;;  %v1431_v57 = vpack.c.bf16 %v1872_v46, %v1872_v46 }
 0x10c   :  { %v965_v10 = vadd.f32 %v964_v7, %v963_v4  ;;  %v1160_v11 = vadd.f32 %v1159_v9, %v1158_v3 }
 0x10d   :  { %v1525_v13 = vpop.f32.mrb[12].mxu0  ;;  %v1908_v15 = vpop.f32.mrb[12].mxu1  ;;  %922 = vst.msk [vmem:[%s2384_s2 + $0xa8] sm:$0xf] %vm879_vm0, %v1433_v47  ;;  %920 = vst.msk [vmem:[%s2384_s2 + $0xa0] sm:$0xf] %vm879_vm0, %v1431_v57 }
 0x10e   :  { %v1405_v19 = vpack.c.bf16 %v1525_v13, %v1525_v13  ;;  %v416_v20 = vpop.f32.mrb[13].mxu0  ;;  %v1912_v21 = vpop.f32.mrb[13].mxu1  ;;  %v1162_v23 = vadd.f32 %v1161_v16, %v1160_v11  ;;  %v967_v25 = vadd.f32 %v966_v17, %v965_v10  ;;  %v1092_v37 = vmul.f32 %v1525_v13, %v1525_v13 }
 0x10f   :  { %v1403_v24 = vpack.c.bf16 %v416_v20, %v416_v20  ;;  %v968_v26 = vsel %vm944_vm1, %v416_v20, 0.0  ;;  %v1526_v27 = vpop.f32.mrb[14].mxu0  ;;  %v1919_v28 = vpop.f32.mrb[14].mxu1  ;;  %v1090_v30 = vmul.f32 %v416_v20, %v416_v20  ;;  %v972_v48 = vsel %vm944_vm1, %v1525_v13, 0.0 }
 0x110   :  { %894 = vst.msk [vmem:[%s2384_s2 + $0x38] sm:$0xf] %vm879_vm0, %v1405_v19  ;;  %v1406_v31 = vpack.c.bf16 %v1526_v27, %v1526_v27  ;;  %v419_v32 = vpop.f32.mrb[15].mxu0  ;;  %v1926_v33 = vpop.f32.mrb[15].mxu1  ;;  %v969_v34 = vadd.f32 %v968_v26, %v967_v25  ;;  %v1164_v35 = vadd.f32 %v1163_v29, %v1162_v23  ;;  %v1093_v50 = vmul.f32 %v1526_v27, %v1526_v27 }
 0x111   :  { %892 = vst.msk [vmem:[%s2384_s2 + $0x30] sm:$0xf] %vm879_vm0, %v1403_v24  ;;  %v1404_v36 = vpack.c.bf16 %v419_v32, %v419_v32  ;;  %v1165_v38 = vsel %vm944_vm1, %v1090_v30, 0.0  ;;  %v970_v40 = vsel %vm944_vm1, %v419_v32, 0.0  ;;  %v1091_v42 = vmul.f32 %v419_v32, %v419_v32 }
 0x112   :  { %895 = vst.msk [vmem:[%s2384_s2 + $0x3c] sm:$0xf] %vm879_vm0, %v1406_v31  ;;  %v1166_v43 = vadd.f32 %v1165_v38, %v1164_v35  ;;  %v971_v44 = vadd.f32 %v970_v40, %v969_v34  ;;  %v1169_v60 = vsel %vm944_vm1, %v1092_v37, 0.0  ;;  %v974_v61 = vsel %vm944_vm1, %v1526_v27, 0.0 }
 0x113   :  { %893 = vst.msk [vmem:[%s2384_s2 + $0x34] sm:$0xf] %vm879_vm0, %v1404_v36  ;;  %v1167_v51 = vsel %vm944_vm1, %v1091_v42, 0.0  ;;  %v1171_v8 = vsel %vm944_vm1, %v1093_v50, 0.0  ;;  %v1434_v27 = vpack.c.bf16 %v1875_v54, %v1875_v54  ;;  %v1432_v36 = vpack.c.bf16 %v1882_v59, %v1882_v59 }
 0x114   :  { %v973_v52 = vadd.f32 %v972_v48, %v971_v44  ;;  %v1168_v55 = vadd.f32 %v1167_v51, %v1166_v43 }
 0x115   :  { %v1529_v56 = vpop.f32.mrb[16].mxu0  ;;  %v1952_v58 = vpop.f32.mrb[16].mxu1  ;;  %923 = vst.msk [vmem:[%s2384_s2 + $0xac] sm:$0xf] %vm879_vm0, %v1434_v27  ;;  %921 = vst.msk [vmem:[%s2384_s2 + $0xa4] sm:$0xf] %vm879_vm0, %v1432_v36 }
 0x116   :  { %v1409_v62 = vpack.c.bf16 %v1529_v56, %v1529_v56  ;;  %v432_v63 = vpop.f32.mrb[17].mxu0  ;;  %v1956_v0 = vpop.f32.mrb[17].mxu1  ;;  %v1170_v1 = vadd.f32 %v1169_v60, %v1168_v55  ;;  %v975_v3 = vadd.f32 %v974_v61, %v973_v52  ;;  %v1096_v19 = vmul.f32 %v1529_v56, %v1529_v56 }
 0x117   :  { %v1407_v2 = vpack.c.bf16 %v432_v63, %v432_v63  ;;  %v976_v4 = vsel %vm944_vm1, %v432_v63, 0.0  ;;  %v1530_v5 = vpop.f32.mrb[18].mxu0  ;;  %v1963_v7 = vpop.f32.mrb[18].mxu1  ;;  %v1094_v9 = vmul.f32 %v432_v63, %v432_v63  ;;  %v980_v29 = vsel %vm944_vm1, %v1529_v56, 0.0 }
 0x118   :  { %898 = vst.msk [vmem:[%s2384_s2 + $0x48] sm:$0xf] %vm879_vm0, %v1409_v62  ;;  %v1410_v10 = vpack.c.bf16 %v1530_v5, %v1530_v5  ;;  %v435_v11 = vpop.f32.mrb[19].mxu0  ;;  %v1970_v13 = vpop.f32.mrb[19].mxu1  ;;  %v977_v14 = vadd.f32 %v976_v4, %v975_v3  ;;  %v1172_v16 = vadd.f32 %v1171_v8, %v1170_v1  ;;  %v1097_v30 = vmul.f32 %v1530_v5, %v1530_v5 }
 0x119   :  { %896 = vst.msk [vmem:[%s2384_s2 + $0x40] sm:$0xf] %vm879_vm0, %v1407_v2  ;;  %v1408_v17 = vpack.c.bf16 %v435_v11, %v435_v11  ;;  %v1173_v20 = vsel %vm944_vm1, %v1094_v9, 0.0  ;;  %v978_v23 = vsel %vm944_vm1, %v435_v11, 0.0  ;;  %v1095_v24 = vmul.f32 %v435_v11, %v435_v11 }
 0x11a   :  { %899 = vst.msk [vmem:[%s2384_s2 + $0x4c] sm:$0xf] %vm879_vm0, %v1410_v10  ;;  %v1174_v25 = vadd.f32 %v1173_v20, %v1172_v16  ;;  %v979_v26 = vadd.f32 %v978_v23, %v977_v14  ;;  %v1177_v38 = vsel %vm944_vm1, %v1096_v19, 0.0  ;;  %v982_v40 = vsel %vm944_vm1, %v1530_v5, 0.0 }
 0x11b   :  { %897 = vst.msk [vmem:[%s2384_s2 + $0x44] sm:$0xf] %vm879_vm0, %v1408_v17  ;;  %v1175_v31 = vsel %vm944_vm1, %v1095_v24, 0.0  ;;  %v1179_v56 = vsel %vm944_vm1, %v1097_v30, 0.0  ;;  %v1437_v11 = vpack.c.bf16 %v1908_v15, %v1908_v15  ;;  %v1435_v24 = vpack.c.bf16 %v1912_v21, %v1912_v21 }
 0x11c   :  { %v981_v32 = vadd.f32 %v980_v29, %v979_v26  ;;  %v1176_v34 = vadd.f32 %v1175_v31, %v1174_v25 }
 0x11d   :  { %v1533_v35 = vpop.f32.mrb[20].mxu0  ;;  %v1996_v37 = vpop.f32.mrb[20].mxu1  ;;  %926 = vst.msk [vmem:[%s2384_s2 + $0xb8] sm:$0xf] %vm879_vm0, %v1437_v11  ;;  %924 = vst.msk [vmem:[%s2384_s2 + $0xb0] sm:$0xf] %vm879_vm0, %v1435_v24 }
 0x11e   :  { %v1413_v42 = vpack.c.bf16 %v1533_v35, %v1533_v35  ;;  %v448_v43 = vpop.f32.mrb[21].mxu0  ;;  %v2000_v44 = vpop.f32.mrb[21].mxu1  ;;  %v1178_v47 = vadd.f32 %v1177_v38, %v1176_v34  ;;  %v983_v50 = vadd.f32 %v982_v40, %v981_v32  ;;  %v1100_v3 = vmul.f32 %v1533_v35, %v1533_v35 }
 0x11f   :  { %v1411_v48 = vpack.c.bf16 %v448_v43, %v448_v43  ;;  %v984_v51 = vsel %vm944_vm1, %v448_v43, 0.0  ;;  %v1534_v52 = vpop.f32.mrb[22].mxu0  ;;  %v2007_v55 = vpop.f32.mrb[22].mxu1  ;;  %v1098_v57 = vmul.f32 %v448_v43, %v448_v43  ;;  %v988_v14 = vsel %vm944_vm1, %v1533_v35, 0.0 }
 0x120   :  { %902 = vst.msk [vmem:[%s2384_s2 + $0x58] sm:$0xf] %vm879_vm0, %v1413_v42  ;;  %v1414_v60 = vpack.c.bf16 %v1534_v52, %v1534_v52  ;;  %v451_v61 = vpop.f32.mrb[23].mxu0  ;;  %v2014_v62 = vpop.f32.mrb[23].mxu1  ;;  %v985_v63 = vadd.f32 %v984_v51, %v983_v50  ;;  %v1180_v1 = vadd.f32 %v1179_v56, %v1178_v47  ;;  %v1101_v16 = vmul.f32 %v1534_v52, %v1534_v52 }
 0x121   :  { %900 = vst.msk [vmem:[%s2384_s2 + $0x50] sm:$0xf] %vm879_vm0, %v1411_v48  ;;  %v1412_v2 = vpack.c.bf16 %v451_v61, %v451_v61  ;;  %v1181_v4 = vsel %vm944_vm1, %v1098_v57, 0.0  ;;  %v986_v5 = vsel %vm944_vm1, %v451_v61, 0.0  ;;  %v1099_v8 = vmul.f32 %v451_v61, %v451_v61 }
 0x122   :  { %903 = vst.msk [vmem:[%s2384_s2 + $0x5c] sm:$0xf] %vm879_vm0, %v1414_v60  ;;  %v1182_v9 = vadd.f32 %v1181_v4, %v1180_v1  ;;  %v987_v10 = vadd.f32 %v986_v5, %v985_v63  ;;  %v1185_v26 = vsel %vm944_vm1, %v1100_v3, 0.0  ;;  %v990_v27 = vsel %vm944_vm1, %v1534_v52, 0.0 }
 0x123   :  { %901 = vst.msk [vmem:[%s2384_s2 + $0x54] sm:$0xf] %vm879_vm0, %v1412_v2  ;;  %v1183_v17 = vsel %vm944_vm1, %v1099_v8, 0.0  ;;  %v1187_v42 = vsel %vm944_vm1, %v1101_v16, 0.0  ;;  %v1438_v3 = vpack.c.bf16 %v1919_v28, %v1919_v28 }
 0x124   :  { %v989_v19 = vadd.f32 %v988_v14, %v987_v10  ;;  %v1184_v20 = vadd.f32 %v1183_v17, %v1182_v9  ;;  %v1436_v14 = vpack.c.bf16 %v1926_v33, %v1926_v33 }
 0x125   :  { %v1537_v23 = vpop.f32.mrb[24].mxu0  ;;  %v2040_v25 = vpop.f32.mrb[24].mxu1  ;;  %927 = vst.msk [vmem:[%s2384_s2 + $0xbc] sm:$0xf] %vm879_vm0, %v1438_v3 }
 0x126   :  { %v1417_v29 = vpack.c.bf16 %v1537_v23, %v1537_v23  ;;  %v464_v30 = vpop.f32.mrb[25].mxu0  ;;  %v2044_v31 = vpop.f32.mrb[25].mxu1  ;;  %v1186_v32 = vadd.f32 %v1185_v26, %v1184_v20  ;;  %v991_v35 = vadd.f32 %v990_v27, %v989_v19  ;;  %v1104_v57 = vmul.f32 %v1537_v23, %v1537_v23  ;;  %925 = vst.msk [vmem:[%s2384_s2 + $0xb4] sm:$0xf] %vm879_vm0, %v1436_v14 }
 0x127   :  { %v1415_v34 = vpack.c.bf16 %v464_v30, %v464_v30  ;;  %v992_v36 = vsel %vm944_vm1, %v464_v30, 0.0  ;;  %v1538_v38 = vpop.f32.mrb[26].mxu0  ;;  %v2051_v40 = vpop.f32.mrb[26].mxu1  ;;  %v1102_v43 = vmul.f32 %v464_v30, %v464_v30  ;;  %v996_v4 = vsel %vm944_vm1, %v1537_v23, 0.0 }
 0x128   :  { %906 = vst.msk [vmem:[%s2384_s2 + $0x68] sm:$0xf] %vm879_vm0, %v1417_v29  ;;  %v1418_v47 = vpack.c.bf16 %v1538_v38, %v1538_v38  ;;  %v467_v48 = vpop.f32.mrb[27].mxu0  ;;  %v2058_v50 = vpop.f32.mrb[27].mxu1  ;;  %v993_v51 = vadd.f32 %v992_v36, %v991_v35  ;;  %v1188_v52 = vadd.f32 %v1187_v42, %v1186_v32  ;;  %v1105_v5 = vmul.f32 %v1538_v38, %v1538_v38 }
 0x129   :  { %904 = vst.msk [vmem:[%s2384_s2 + $0x60] sm:$0xf] %vm879_vm0, %v1415_v34  ;;  %v1416_v56 = vpack.c.bf16 %v467_v48, %v467_v48  ;;  %v1189_v60 = vsel %vm944_vm1, %v1102_v43, 0.0  ;;  %v994_v61 = vsel %vm944_vm1, %v467_v48, 0.0  ;;  %v1103_v63 = vmul.f32 %v467_v48, %v467_v48 }
 0x12a   :  { %907 = vst.msk [vmem:[%s2384_s2 + $0x6c] sm:$0xf] %vm879_vm0, %v1418_v47  ;;  %v1190_v1 = vadd.f32 %v1189_v60, %v1188_v52  ;;  %v995_v2 = vadd.f32 %v994_v61, %v993_v51  ;;  %v1193_v17 = vsel %vm944_vm1, %v1104_v57, 0.0  ;;  %v998_v19 = vsel %vm944_vm1, %v1538_v38, 0.0 }
 0x12b   :  { %905 = vst.msk [vmem:[%s2384_s2 + $0x64] sm:$0xf] %vm879_vm0, %v1416_v56  ;;  %v1191_v8 = vsel %vm944_vm1, %v1103_v63, 0.0  ;;  %v1195_v35 = vsel %vm944_vm1, %v1105_v5, 0.0  ;;  %v1110_v5 = vmul.f32 %v1775_v45, %v1775_v45 }
 0x12c   :  { %v997_v9 = vadd.f32 %v996_v4, %v995_v2  ;;  %v1192_v10 = vadd.f32 %v1191_v8, %v1190_v1  ;;  %v1441_v1 = vpack.c.bf16 %v1952_v58, %v1952_v58 }
 0x12d   :  { %v1541_v11 = vpop.f32.mrb[28].mxu0  ;;  %v2084_v16 = vpop.f32.mrb[28].mxu1 }
 0x12e   :  { %v1421_v20 = vpack.c.bf16 %v1541_v11, %v1541_v11  ;;  %v480_v23 = vpop.f32.mrb[29].mxu0  ;;  %v2088_v24 = vpop.f32.mrb[29].mxu1  ;;  %v1194_v26 = vadd.f32 %v1193_v17, %v1192_v10  ;;  %v999_v29 = vadd.f32 %v998_v19, %v997_v9  ;;  %v1108_v52 = vmul.f32 %v1541_v11, %v1541_v11  ;;  %930 = vst.msk [vmem:[%s2384_s2 + $0xc8] sm:$0xf] %vm879_vm0, %v1441_v1 }
 0x12f   :  { %v1419_v27 = vpack.c.bf16 %v480_v23, %v480_v23  ;;  %v1000_v30 = vsel %vm944_vm1, %v480_v23, 0.0  ;;  %v1542_v32 = vpop.f32.mrb[30].mxu0  ;;  %v2095_v34 = vpop.f32.mrb[30].mxu1  ;;  %v1106_v36 = vmul.f32 %v480_v23, %v480_v23  ;;  %v1004_v2 = vsel %vm944_vm1, %v1541_v11, 0.0 }
 0x130   :  { %910 = vst.msk [vmem:[%s2384_s2 + $0x78] sm:$0xf] %vm879_vm0, %v1421_v20  ;;  %v1422_v38 = vpack.c.bf16 %v1542_v32, %v1542_v32  ;;  %v483_v42 = vpop.f32.mrb[31].mxu0  ;;  %v2102_v43 = vpop.f32.mrb[31].mxu1  ;;  %v1001_v47 = vadd.f32 %v1000_v30, %v999_v29  ;;  %v1196_v48 = vadd.f32 %v1195_v35, %v1194_v26  ;;  %v1109_v3 = vmul.f32 %v1542_v32, %v1542_v32 }
 0x131   :  { %908 = vst.msk [vmem:[%s2384_s2 + $0x70] sm:$0xf] %vm879_vm0, %v1419_v27  ;;  %v1420_v51 = vpack.c.bf16 %v483_v42, %v483_v42  ;;  %v1197_v56 = vsel %vm944_vm1, %v1106_v36, 0.0  ;;  %v1002_v57 = vsel %vm944_vm1, %v483_v42, 0.0  ;;  %v1107_v60 = vmul.f32 %v483_v42, %v483_v42 }
 0x132   :  { %911 = vst.msk [vmem:[%s2384_s2 + $0x7c] sm:$0xf] %vm879_vm0, %v1422_v38  ;;  %v1198_v61 = vadd.f32 %v1197_v56, %v1196_v48  ;;  %v1003_v63 = vadd.f32 %v1002_v57, %v1001_v47  ;;  %v1439_v10 = vpack.c.bf16 %v1956_v0, %v1956_v0  ;;  %v1201_v14 = vsel %vm944_vm1, %v1108_v52, 0.0 }
 0x133   :  { %909 = vst.msk [vmem:[%s2384_s2 + $0x74] sm:$0xf] %vm879_vm0, %v1420_v51  ;;  %v1199_v4 = vsel %vm944_vm1, %v1107_v60, 0.0  ;;  %v1006_v11 = vsel %vm944_vm1, %v1542_v32, 0.0  ;;  %v1008_v17 = vsel %vm944_vm1, %v1775_v45, 0.0  ;;  %v1442_v19 = vpack.c.bf16 %v1963_v7, %v1963_v7 }
 0x134   :  { %v1005_v8 = vadd.f32 %v1004_v2, %v1003_v63  ;;  %v1200_v9 = vadd.f32 %v1199_v4, %v1198_v61  ;;  %928 = vst.msk [vmem:[%s2384_s2 + $0xc0] sm:$0xf] %vm879_vm0, %v1439_v10  ;;  %v1440_v26 = vpack.c.bf16 %v1970_v13, %v1970_v13  ;;  %v1203_v27 = vsel %vm944_vm1, %v1109_v3, 0.0 }
 0x135   :  { %v1205_v29 = vsel %vm944_vm1, %v1110_v5, 0.0  ;;  %v1111_v45 = vmul.f32 %v1787_v53, %v1787_v53  ;;  %931 = vst.msk [vmem:[%s2384_s2 + $0xcc] sm:$0xf] %vm879_vm0, %v1442_v19  ;;  %v1445_v30 = vpack.c.bf16 %v1996_v37, %v1996_v37  ;;  %v1112_v36 = vmul.f32 %v1771_v41, %v1771_v41 }
 0x136   :  { %v1202_v20 = vadd.f32 %v1201_v14, %v1200_v9  ;;  %v1007_v23 = vadd.f32 %v1006_v11, %v1005_v8  ;;  %929 = vst.msk [vmem:[%s2384_s2 + $0xc4] sm:$0xf] %vm879_vm0, %v1440_v26  ;;  %v1010_v38 = vsel %vm944_vm1, %v1787_v53, 0.0  ;;  %v1443_v42 = vpack.c.bf16 %v2000_v44, %v2000_v44 }
 0x137   :  { %934 = vst.msk [vmem:[%s2384_s2 + $0xd8] sm:$0xf] %vm879_vm0, %v1445_v30  ;;  %v1012_v47 = vsel %vm944_vm1, %v1771_v41, 0.0  ;;  %v1446_v52 = vpack.c.bf16 %v2007_v55, %v2007_v55  ;;  %v1113_v56 = vmul.f32 %v1777_v49, %v1777_v49  ;;  %v1207_v53 = vsel %vm944_vm1, %v1111_v45, 0.0 }
 0x138   :  { %v1009_v32 = vadd.f32 %v1008_v17, %v1007_v23  ;;  %v1204_v35 = vadd.f32 %v1203_v27, %v1202_v20  ;;  %v1114_v57 = vmul.f32 %v1825_v12, %v1825_v12  ;;  %932 = vst.msk [vmem:[%s2384_s2 + $0xd0] sm:$0xf] %vm879_vm0, %v1443_v42  ;;  %v1444_v41 = vpack.c.bf16 %v2014_v62, %v2014_v62 }
 0x139   :  { %935 = vst.msk [vmem:[%s2384_s2 + $0xdc] sm:$0xf] %vm879_vm0, %v1446_v52  ;;  %v1209_v63 = vsel %vm944_vm1, %v1112_v36, 0.0  ;;  %v1014_v1 = vsel %vm944_vm1, %v1777_v49, 0.0  ;;  %v1016_v2 = vsel %vm944_vm1, %v1825_v12, 0.0  ;;  %v1449_v3 = vpack.c.bf16 %v2040_v25, %v2040_v25 }
 0x13a   :  { %v1206_v48 = vadd.f32 %v1205_v29, %v1204_v35  ;;  %v1011_v51 = vadd.f32 %v1010_v38, %v1009_v32  ;;  %933 = vst.msk [vmem:[%s2384_s2 + $0xd4] sm:$0xf] %vm879_vm0, %v1444_v41  ;;  %v1447_v8 = vpack.c.bf16 %v2044_v31, %v2044_v31  ;;  %v1211_v9 = vsel %vm944_vm1, %v1113_v56, 0.0 }
 0x13b   :  { %v1213_v49 = vsel %vm944_vm1, %v1114_v57, 0.0  ;;  %v1115_v12 = vmul.f32 %v1838_v22, %v1838_v22  ;;  %938 = vst.msk [vmem:[%s2384_s2 + $0xe8] sm:$0xf] %vm879_vm0, %v1449_v3  ;;  %v1450_v10 = vpack.c.bf16 %v2051_v40, %v2051_v40  ;;  %v1116_v17 = vmul.f32 %v1821_v6, %v1821_v6 }
 0x13c   :  { %v1013_v60 = vadd.f32 %v1012_v47, %v1011_v51  ;;  %v1208_v61 = vadd.f32 %v1207_v53, %v1206_v48  ;;  %936 = vst.msk [vmem:[%s2384_s2 + $0xe0] sm:$0xf] %vm879_vm0, %v1447_v8  ;;  %v1018_v19 = vsel %vm944_vm1, %v1838_v22, 0.0  ;;  %v1448_v20 = vpack.c.bf16 %v2058_v50, %v2058_v50 }
 0x13d   :  { %939 = vst.msk [vmem:[%s2384_s2 + $0xec] sm:$0xf] %vm879_vm0, %v1450_v10  ;;  %v1020_v23 = vsel %vm944_vm1, %v1821_v6, 0.0  ;;  %v1453_v29 = vpack.c.bf16 %v2084_v16, %v2084_v16  ;;  %v1117_v45 = vmul.f32 %v1832_v18, %v1832_v18  ;;  %v1215_v22 = vsel %vm944_vm1, %v1115_v12, 0.0 }
 0x13e   :  { %v1210_v4 = vadd.f32 %v1209_v63, %v1208_v61  ;;  %v1015_v5 = vadd.f32 %v1014_v1, %v1013_v60  ;;  %v1118_v30 = vmul.f32 %v1872_v46, %v1872_v46  ;;  %937 = vst.msk [vmem:[%s2384_s2 + $0xe4] sm:$0xf] %vm879_vm0, %v1448_v20  ;;  %v1451_v6 = vpack.c.bf16 %v2088_v24, %v2088_v24 }
 0x13f   :  { %942 = vst.msk [vmem:[%s2384_s2 + $0xf8] sm:$0xf] %vm879_vm0, %v1453_v29  ;;  %v1217_v36 = vsel %vm944_vm1, %v1116_v17, 0.0  ;;  %v1022_v38 = vsel %vm944_vm1, %v1832_v18, 0.0  ;;  %v1024_v42 = vsel %vm944_vm1, %v1872_v46, 0.0  ;;  %v1454_v47 = vpack.c.bf16 %v2095_v34, %v2095_v34 }
 0x140   :  { %v1017_v14 = vadd.f32 %v1016_v2, %v1015_v5  ;;  %v1212_v11 = vadd.f32 %v1211_v9, %v1210_v4  ;;  %940 = vst.msk [vmem:[%s2384_s2 + $0xf0] sm:$0xf] %vm879_vm0, %v1451_v6  ;;  %v1452_v52 = vpack.c.bf16 %v2102_v43, %v2102_v43  ;;  %v1219_v56 = vsel %vm944_vm1, %v1117_v45, 0.0 }
 0x141   :  { %v1221_v18 = vsel %vm944_vm1, %v1118_v30, 0.0  ;;  %v1119_v46 = vmul.f32 %v1882_v59, %v1882_v59  ;;  %943 = vst.msk [vmem:[%s2384_s2 + $0xfc] sm:$0xf] %vm879_vm0, %v1454_v47  ;;  %v1120_v41 = vmul.f32 %v1864_v39, %v1864_v39  ;;  %v1026_v60 = vsel %vm944_vm1, %v1882_v59, 0.0 }
 0x142   :  { %v1214_v26 = vadd.f32 %v1213_v49, %v1212_v11  ;;  %v1019_v27 = vadd.f32 %v1018_v19, %v1017_v14  ;;  %941 = vst.msk [vmem:[%s2384_s2 + $0xf4] sm:$0xf] %vm879_vm0, %v1452_v52  ;;  %v1028_v1 = vsel %vm944_vm1, %v1864_v39, 0.0  ;;  %v1121_v2 = vmul.f32 %v1875_v54, %v1875_v54 }
 0x143   :  { %v1223_v3 = vsel %vm944_vm1, %v1119_v46, 0.0  ;;  %v1122_v4 = vmul.f32 %v1912_v21, %v1912_v21  ;;  %v1225_v9 = vsel %vm944_vm1, %v1120_v41, 0.0  ;;  %v1030_v59 = vsel %vm944_vm1, %v1875_v54, 0.0 }
 0x144   :  { %v1021_v32 = vadd.f32 %v1020_v23, %v1019_v27  ;;  %v1216_v35 = vadd.f32 %v1215_v22, %v1214_v26  ;;  %v1032_v49 = vsel %vm944_vm1, %v1912_v21, 0.0  ;;  %v1227_v10 = vsel %vm944_vm1, %v1121_v2, 0.0 }
 0x145   :  { %v1229_v14 = vsel %vm944_vm1, %v1122_v4, 0.0  ;;  %v1123_v11 = vmul.f32 %v1926_v33, %v1926_v33  ;;  %v1124_v20 = vmul.f32 %v1908_v15, %v1908_v15  ;;  %v1034_v54 = vsel %vm944_vm1, %v1926_v33, 0.0 }
 0x146   :  { %v1218_v48 = vadd.f32 %v1217_v36, %v1216_v35  ;;  %v1023_v51 = vadd.f32 %v1022_v38, %v1021_v32  ;;  %v1036_v21 = vsel %vm944_vm1, %v1908_v15, 0.0  ;;  %v1125_v27 = vmul.f32 %v1919_v28, %v1919_v28 }
 0x147   :  { %v1231_v29 = vsel %vm944_vm1, %v1123_v11, 0.0  ;;  %v1126_v45 = vmul.f32 %v1956_v0, %v1956_v0  ;;  %v1233_v6 = vsel %vm944_vm1, %v1124_v20, 0.0  ;;  %v1038_v33 = vsel %vm944_vm1, %v1919_v28, 0.0 }
 0x148   :  { %v1025_v53 = vadd.f32 %v1024_v42, %v1023_v51  ;;  %v1220_v57 = vadd.f32 %v1219_v56, %v1218_v48  ;;  %v1040_v32 = vsel %vm944_vm1, %v1956_v0, 0.0  ;;  %v1235_v36 = vsel %vm944_vm1, %v1125_v27, 0.0 }
 0x149   :  { %v1237_v38 = vsel %vm944_vm1, %v1126_v45, 0.0  ;;  %v1127_v42 = vmul.f32 %v1970_v13, %v1970_v13  ;;  %v1128_v51 = vmul.f32 %v1952_v58, %v1952_v58  ;;  %v1042_v28 = vsel %vm944_vm1, %v1970_v13, 0.0 }
 0x14a   :  { %v1222_v61 = vadd.f32 %v1221_v18, %v1220_v57  ;;  %v1027_v63 = vadd.f32 %v1026_v60, %v1025_v53  ;;  %v1044_v0 = vsel %vm944_vm1, %v1952_v58, 0.0  ;;  %v1129_v18 = vmul.f32 %v1963_v7, %v1963_v7 }
 0x14b   :  { %v1239_v46 = vsel %vm944_vm1, %v1127_v42, 0.0  ;;  %v1130_v53 = vmul.f32 %v2000_v44, %v2000_v44  ;;  %v1241_v60 = vsel %vm944_vm1, %v1128_v51, 0.0  ;;  %v1046_v13 = vsel %vm944_vm1, %v1963_v7, 0.0 }
 0x14c   :  { %v1029_v5 = vadd.f32 %v1028_v1, %v1027_v63  ;;  %v1224_v8 = vadd.f32 %v1223_v3, %v1222_v61  ;;  %v1048_v61 = vsel %vm944_vm1, %v2000_v44, 0.0  ;;  %v1243_v1 = vsel %vm944_vm1, %v1129_v18, 0.0 }
 0x14d   :  { %v1245_v2 = vsel %vm944_vm1, %v1130_v53, 0.0  ;;  %v1131_v3 = vmul.f32 %v2014_v62, %v2014_v62  ;;  %v1050_v7 = vsel %vm944_vm1, %v2014_v62, 0.0  ;;  %v1052_v44 = vsel %vm944_vm1, %v1996_v37, 0.0 }
 0x14e   :  { %v1226_v12 = vadd.f32 %v1225_v9, %v1224_v8  ;;  %v1031_v39 = vadd.f32 %v1030_v59, %v1029_v5  ;;  %v1132_v8 = vmul.f32 %v1996_v37, %v1996_v37  ;;  %v1054_v62 = vsel %vm944_vm1, %v2007_v55, 0.0 }
 0x14f   :  { %v1136_v27 = vmul.f32 %v2040_v25, %v2040_v25 }
 0x150   :  { %v1033_v17 = vadd.f32 %v1032_v49, %v1031_v39  ;;  %v1228_v19 = vadd.f32 %v1227_v10, %v1226_v12  ;;  %v1133_v49 = vmul.f32 %v2007_v55, %v2007_v55  ;;  %v1247_v12 = vsel %vm944_vm1, %v1131_v3, 0.0 }
 0x151   :  { %v1134_v39 = vmul.f32 %v2044_v31, %v2044_v31  ;;  %v1249_v11 = vsel %vm944_vm1, %v1132_v8, 0.0  ;;  %v1058_v55 = vsel %vm944_vm1, %v2058_v50, 0.0 }
 0x152   :  { %v1230_v23 = vadd.f32 %v1229_v14, %v1228_v19  ;;  %v1035_v26 = vadd.f32 %v1034_v54, %v1033_v17  ;;  %v1056_v17 = vsel %vm944_vm1, %v2044_v31, 0.0  ;;  %v1251_v20 = vsel %vm944_vm1, %v1133_v49, 0.0 }
 0x153   :  { %v1253_v54 = vsel %vm944_vm1, %v1134_v39, 0.0  ;;  %v1060_v31 = vsel %vm944_vm1, %v2040_v25, 0.0 }
 0x154   :  { %v1037_v22 = vadd.f32 %v1036_v21, %v1035_v26  ;;  %v1232_v30 = vadd.f32 %v1231_v29, %v1230_v23  ;;  %v1135_v23 = vmul.f32 %v2058_v50, %v2058_v50  ;;  %v1062_v50 = vsel %vm944_vm1, %v2051_v40, 0.0 }
 0x156   :  { %v1234_v35 = vadd.f32 %v1233_v6, %v1232_v30  ;;  %v1039_v15 = vadd.f32 %v1038_v33, %v1037_v22  ;;  %v1137_v22 = vmul.f32 %v2051_v40, %v2051_v40  ;;  %v1255_v30 = vsel %vm944_vm1, %v1135_v23, 0.0 }
 0x157   :  { %v1138_v6 = vmul.f32 %v2088_v24, %v2088_v24  ;;  %v1066_v40 = vsel %vm944_vm1, %v2102_v43, 0.0 }
 0x158   :  { %v1041_v47 = vadd.f32 %v1040_v32, %v1039_v15  ;;  %v1236_v48 = vadd.f32 %v1235_v36, %v1234_v35  ;;  %v1257_v35 = vsel %vm944_vm1, %v1136_v27, 0.0  ;;  %v1064_v15 = vsel %vm944_vm1, %v2088_v24, 0.0 }
 0x159   :  { %v1261_v42 = vsel %vm944_vm1, %v1138_v6, 0.0  ;;  %v1068_v24 = vsel %vm944_vm1, %v2084_v16, 0.0 }
 0x15a   :  { %v1238_v52 = vadd.f32 %v1237_v38, %v1236_v48  ;;  %v1043_v56 = vadd.f32 %v1042_v28, %v1041_v47  ;;  %v1259_v38 = vsel %vm944_vm1, %v1137_v22, 0.0  ;;  %v1139_v47 = vmul.f32 %v2102_v43, %v2102_v43 }
 0x15b   :  { %v1140_v28 = vmul.f32 %v2084_v16, %v2084_v16 }
 0x15c   :  { %v1045_v57 = vadd.f32 %v1044_v0, %v1043_v56  ;;  %v1240_v41 = vadd.f32 %v1239_v46, %v1238_v52  ;;  %v1141_v0 = vmul.f32 %v2095_v34, %v2095_v34  ;;  %v1263_v18 = vsel %vm944_vm1, %v1139_v47, 0.0 }
 0x15e   :  { %v1242_v63 = vadd.f32 %v1241_v60, %v1240_v41  ;;  %v1047_v58 = vadd.f32 %v1046_v13, %v1045_v57  ;;  %v1265_v57 = vsel %vm944_vm1, %v1140_v28, 0.0  ;;  %v1070_v41 = vsel %vm944_vm1, %v2095_v34, 0.0 }
 0x15f   :  { %v1267_v43 = vsel %vm944_vm1, %v1141_v0, 0.0 }
 0x160   :  { %v1049_v4 = vadd.f32 %v1048_v61, %v1047_v58  ;;  %v1244_v5 = vadd.f32 %v1243_v1, %v1242_v63 }
 0x162   :  { %v1246_v9 = vadd.f32 %v1245_v2, %v1244_v5  ;;  %v1051_v59 = vadd.f32 %v1050_v7, %v1049_v4 }
 0x164   :  { %v1053_v10 = vadd.f32 %v1052_v44, %v1051_v59  ;;  %v1248_v14 = vadd.f32 %v1247_v12, %v1246_v9 }
 0x166   :  { %v1250_v19 = vadd.f32 %v1249_v11, %v1248_v14  ;;  %v1055_v37 = vadd.f32 %v1054_v62, %v1053_v10 }
 0x168   :  { %v1057_v26 = vadd.f32 %v1056_v17, %v1055_v37  ;;  %v1252_v21 = vadd.f32 %v1251_v20, %v1250_v19 }
 0x16a   :  { %v1254_v29 = vadd.f32 %v1253_v54, %v1252_v21  ;;  %v1059_v45 = vadd.f32 %v1058_v55, %v1057_v26 }
 0x16c   :  { %v1061_v33 = vadd.f32 %v1060_v31, %v1059_v45  ;;  %v1256_v32 = vadd.f32 %v1255_v30, %v1254_v29 }
 0x16e   :  { %v1258_v36 = vadd.f32 %v1257_v35, %v1256_v32  ;;  %v1063_v25 = vadd.f32 %v1062_v50, %v1061_v33 }
 0x170   :  { %v1065_v48 = vadd.f32 %v1064_v15, %v1063_v25  ;;  %v1260_v51 = vadd.f32 %v1259_v38, %v1258_v36 }
 0x172   :  { %v1262_v52 = vadd.f32 %v1261_v42, %v1260_v51  ;;  %v1067_v56 = vadd.f32 %v1066_v40, %v1065_v48 }
 0x174   :  { %v1069_v46 = vadd.f32 %v1068_v24, %v1067_v56  ;;  %v1264_v53 = vadd.f32 %v1263_v18, %v1262_v52 }
 0x176   :  { %v1071_v60 = vadd.f32 %v1070_v41, %v1069_v46  ;;  %v1266_v13 = vadd.f32 %v1265_v57, %v1264_v53 }
 0x178   :  { %v1072_v61 = vrot.slane %v1071_v60, 4  ;;  %v1268_v63 = vadd.f32 %v1267_v43, %v1266_v13 }
 0x17a   :  { %v1073_v58 = vadd.f32 %v1072_v61, %v1071_v60  ;;  %v1269_v16 = vrot.slane %v1268_v63, 4 }
 0x17c   :  { %v1074_v1 = vrot.slane %v1073_v58, 2  ;;  %v1270_v2 = vadd.f32 %v1269_v16, %v1268_v63 }
 0x17e   :  { %v1075_v3 = vadd.f32 %v1074_v1, %v1073_v58  ;;  %v1271_v4 = vrot.slane %v1270_v2, 2 }
 0x180   :  { %v1076_v5 = vrot.slane %v1075_v3, 1  ;;  %v1272_v8 = vadd.f32 %v1271_v4, %v1270_v2 }
 0x182   :  { %v1273_v7 = vrot.slane %v1272_v8, 1  ;;  %v1077_v9 = vadd.f32 %v1076_v5, %v1075_v3 }
 0x184   :  { %v1274_v59 = vadd.f32 %v1273_v7, %v1272_v8 }
 0x186   :  { %v1276_v34 = vsel %vm1275_vm2, %v1077_v9, %v1274_v59 }
 0x187   :  { %1278 = vst.msk [vmem:[%s2385_s3] sm:$0x3] %vm1277_vm3, %v1276_v34 }

// kernel: stage1_d_sty_v2_forward.7
= control target key start
LH: loop header
LB: loop body
LE: loop exit
PB: predicated region body
PF: predicated region fallthrough
CT: control target
= control target key end

     0   :  { %vm399_vm0 = vcmask 257024   ;;  %vm416_vm1 = vcmask 261120   ;;  %vm507_vm2 = vcmask 1040384   ;;  %vm509_vm3 = vcmask 254976   ;;  %s953_s1 = inlined_call_operand.vmem [shape: bf16[256,32], index: 1, kind: input, shape index: {}]   ;;  %s954_s0 = inlined_call_operand.vmem [shape: bf16[128,256], index: 0, kind: input, shape index: {}]   ;;  %s955_s2 = inlined_call_operand.vmem [shape: bf16[128,32], index: 2, kind: output, shape index: {0}]   ;;  %s956_s3 = inlined_call_operand.vmem [shape: f32[1,2,32], index: 3, kind: output, shape index: {1}]  }
   0x1   :  { %v663_v0 = vld [vmem:[%s953_s1 + $0x40] sm:$0xff]   ;;  %v665_v2 = vld [vmem:[%s953_s1 + $0x48] sm:$0xff]   ;;  %v667_v4 = vld [vmem:[%s953_s1 + $0x50] sm:$0xff]  }
   0x2   :  { %v664_v1 = vld [vmem:[%s953_s1] sm:$0xff]   ;;  %583 = vmatprep.subr.bf16.mxu0 %v663_v0  ;;  %647 = vmatprep.subr.bf16.mxu1 %v663_v0  ;;  %v666_v3 = vld [vmem:[%s953_s1 + $0x8] sm:$0xff]   ;;  %v668_v5 = vld [vmem:[%s953_s1 + $0x10] sm:$0xff]  }
   0x3   :  { %584 = vmatpush3.bf16.msra.mxu0 %v664_v1  ;;  %655 = vmatpush3.bf16.msra.mxu1 %v664_v1  ;;  %v669_v6 = vld [vmem:[%s953_s1 + $0x58] sm:$0xff]   ;;  %v671_v8 = vld [vmem:[%s953_s1 + $0x60] sm:$0xff]   ;;  %v673_v10 = vld [vmem:[%s953_s1 + $0x68] sm:$0xff]  }
   0x4   :  { %585 = vmatprep.subr.bf16.mxu0 %v665_v2  ;;  %648 = vmatprep.subr.bf16.mxu1 %v665_v2  ;;  %v670_v7 = vld [vmem:[%s953_s1 + $0x18] sm:$0xff]   ;;  %v672_v9 = vld [vmem:[%s953_s1 + $0x20] sm:$0xff]   ;;  %v674_v12 = vld [vmem:[%s953_s1 + $0x28] sm:$0xff]  }
   0x5   :  { %v681_v11 = vld [vmem:[%s954_s0 + $0x4] ss:$8 sps:$4 sm:$0xff]   ;;  %v675_v14 = vld [vmem:[%s953_s1 + $0x70] sm:$0xff]   ;;  %v677_v16 = vld [vmem:[%s953_s1 + $0x78] sm:$0xff]  }
   0x6   :  { %v687_v13 = vld [vmem:[%s954_s0 + $0x44] ss:$8 sps:$4 sm:$0xff]   ;;  %270 = vmatprep.mubr.bf16.mxu0 %v681_v11  ;;  %v676_v15 = vld [vmem:[%s953_s1 + $0x30] sm:$0xff]   ;;  %v678_v17 = vld [vmem:[%s953_s1 + $0x38] sm:$0xff]  }
   0x7   :  { %586 = vmatpush3.bf16.msra.mxu0 %v666_v3  ;;  %656 = vmatpush3.bf16.msra.mxu1 %v666_v3  ;;  %v679_v18 = vld [vmem:[%s954_s0] ss:$8 sps:$4 sm:$0xff]   ;;  %v682_v20 = vld [vmem:[%s954_s0 + $0x14] ss:$8 sps:$4 sm:$0xff]   ;;  %v684_v22 = vld [vmem:[%s954_s0 + $0x10] ss:$8 sps:$4 sm:$0xff]  }
   0x8   :  { %587 = vmatprep.subr.bf16.mxu0 %v667_v4  ;;  %649 = vmatprep.subr.bf16.mxu1 %v667_v4  ;;  %v685_v19 = vld [vmem:[%s954_s0 + $0x40] ss:$8 sps:$4 sm:$0xff]   ;;  %v691_v21 = vld [vmem:[%s954_s0 + $0x54] ss:$8 sps:$4 sm:$0xff]   ;;  %v693_v23 = vld [vmem:[%s954_s0 + $0x50] ss:$8 sps:$4 sm:$0xff]  }
   0x9   :  { %302 = vmatprep.mubr.bf16.mxu1 %v687_v13  ;;  %v688_v24 = vld [vmem:[%s954_s0 + $0x24] ss:$8 sps:$4 sm:$0xff]   ;;  %v690_v26 = vld [vmem:[%s954_s0 + $0x20] ss:$8 sps:$4 sm:$0xff]   ;;  %v694_v28 = vld [vmem:[%s954_s0 + $0x34] ss:$8 sps:$4 sm:$0xff]  }
   0xa   :  { %v697_v25 = vld [vmem:[%s954_s0 + $0x64] ss:$8 sps:$4 sm:$0xff]   ;;  %v699_v27 = vld [vmem:[%s954_s0 + $0x60] ss:$8 sps:$4 sm:$0xff]   ;;  %v700_v29 = vld [vmem:[%s954_s0 + $0x74] ss:$8 sps:$4 sm:$0xff]  }
   0xb   :  { %588 = vmatpush3.bf16.msra.mxu0 %v668_v5  ;;  %657 = vmatpush3.bf16.msra.mxu1 %v668_v5  ;;  %v696_v30 = vld [vmem:[%s954_s0 + $0x30] ss:$8 sps:$4 sm:$0xff]  }
   0xc   :  { %589 = vmatprep.subr.bf16.mxu0 %v669_v6  ;;  %650 = vmatprep.subr.bf16.mxu1 %v669_v6  ;;  %v702_v31 = vld [vmem:[%s954_s0 + $0x70] ss:$8 sps:$4 sm:$0xff]  }
   0xf   :  { %590 = vmatpush3.bf16.msra.mxu0 %v670_v7  ;;  %658 = vmatpush3.bf16.msra.mxu1 %v670_v7 }
  0x10   :  { %591 = vmatprep.subr.bf16.mxu0 %v671_v8  ;;  %651 = vmatprep.subr.bf16.mxu1 %v671_v8 }
  0x13   :  { %592 = vmatpush3.bf16.msra.mxu0 %v672_v9  ;;  %659 = vmatpush3.bf16.msra.mxu1 %v672_v9 }
  0x14   :  { %593 = vmatprep.subr.bf16.mxu0 %v673_v10  ;;  %652 = vmatprep.subr.bf16.mxu1 %v673_v10 }
  0x17   :  { %594 = vmatpush3.bf16.msra.mxu0 %v674_v12  ;;  %660 = vmatpush3.bf16.msra.mxu1 %v674_v12 }
  0x18   :  { %595 = vmatprep.subr.bf16.mxu0 %v675_v14  ;;  %653 = vmatprep.subr.bf16.mxu1 %v675_v14 }
  0x1b   :  { %596 = vmatpush3.bf16.msra.mxu0 %v676_v15  ;;  %661 = vmatpush3.bf16.msra.mxu1 %v676_v15 }
  0x1c   :  { %597 = vmatprep.subr.bf16.mxu0 %v677_v16  ;;  %654 = vmatprep.subr.bf16.mxu1 %v677_v16 }
  0x1f   :  { %598 = vmatpush3.bf16.msra.mxu0 %v678_v17  ;;  %662 = vmatpush3.bf16.msra.mxu1 %v678_v17 }
  0x22   :  { %271 = vmatmul.mubr.bf16.vlgmr.msra.gmra.mrb[0].mxu0 %v679_v18  ;;  %303 = vmatmul.mubr.bf16.vlgmr.msra.gmra.mrb[0].mxu1 %v685_v19 }
  0x23   :  { %278 = vmatprep.mubr.bf16.mxu0 %v682_v20  ;;  %310 = vmatprep.mubr.bf16.mxu1 %v691_v21 }
  0x2a   :  { %279 = vmatmul.mubr.bf16.gmra.mrb[4].mxu0 %v684_v22  ;;  %311 = vmatmul.mubr.bf16.gmra.mrb[4].mxu1 %v693_v23 }
  0x2b   :  { %286 = vmatprep.mubr.bf16.mxu0 %v688_v24  ;;  %318 = vmatprep.mubr.bf16.mxu1 %v697_v25 }
  0x32   :  { %287 = vmatmul.mubr.bf16.gmra.mrb[8].mxu0 %v690_v26  ;;  %319 = vmatmul.mubr.bf16.gmra.mrb[8].mxu1 %v699_v27 }
  0x33   :  { %294 = vmatprep.mubr.bf16.mxu0 %v694_v28  ;;  %326 = vmatprep.mubr.bf16.mxu1 %v700_v29 }
  0x3a   :  { %295 = vmatmul.mubr.bf16.gmra.mrb[12].mxu0 %v696_v30  ;;  %327 = vmatmul.mubr.bf16.gmra.mrb[12].mxu1 %v702_v31 }
  0xf5   :  { %v599_v32 = vpop.f32.mrb[0].mxu0  ;;  %v623_v33 = vpop.f32.mrb[0].mxu1 }
  0xf6   :  { %v600_v34 = vpop.f32.mrb[1].mxu0  ;;  %v624_v35 = vpop.f32.mrb[1].mxu1 }
  0xf7   :  { %v601_v36 = vadd.f32 %v600_v34, %v599_v32  ;;  %v602_v37 = vpop.f32.mrb[2].mxu0  ;;  %v819_v38 = vadd.f32 %v624_v35, %v623_v33  ;;  %v626_v39 = vpop.f32.mrb[2].mxu1 }
  0xf8   :  { %v603_v40 = vpop.f32.mrb[3].mxu0  ;;  %v627_v41 = vpop.f32.mrb[3].mxu1 }
  0xf9   :  { %v567_v42 = vpack.c.bf16 %v601_v36, %v601_v36  ;;  %v454_v43 = vmul.f32 %v601_v36, %v601_v36  ;;  %v604_v44 = vadd.f32 %v603_v40, %v602_v37  ;;  %v575_v45 = vpack.c.bf16 %v819_v38, %v819_v38 }
  0xfa   :  { %v823_v46 = vadd.f32 %v627_v41, %v626_v39  ;;  %v417_v47 = vsel %vm416_vm1, %v601_v36, 0.0 }
  0xfb   :  { %400 = vst.msk [vmem:[%s955_s2] sm:$0xf] %vm399_vm0, %v567_v42  ;;  %v568_v48 = vpack.c.bf16 %v604_v44, %v604_v44  ;;  %v418_v49 = vsel %vm416_vm1, %v604_v44, 0.0  ;;  %v455_v50 = vmul.f32 %v604_v44, %v604_v44  ;;  %408 = vst.msk [vmem:[%s955_s2 + $0x20] sm:$0xf] %vm399_vm0, %v575_v45  ;;  %v470_v53 = vsel %vm416_vm1, %v454_v43, 0.0 }
  0xfc   :  { %v419_v51 = vadd.f32 %v418_v49, %v417_v47  ;;  %v576_v52 = vpack.c.bf16 %v823_v46, %v823_v46 }
  0xfd   :  { %401 = vst.msk [vmem:[%s955_s2 + $0x4] sm:$0xf] %vm399_vm0, %v568_v48  ;;  %v471_v54 = vsel %vm416_vm1, %v455_v50, 0.0  ;;  %v605_v55 = vpop.f32.mrb[4].mxu0  ;;  %v629_v56 = vpop.f32.mrb[4].mxu1 }
  0xfe   :  { %v472_v57 = vadd.f32 %v471_v54, %v470_v53  ;;  %v606_v58 = vpop.f32.mrb[5].mxu0  ;;  %409 = vst.msk [vmem:[%s955_s2 + $0x24] sm:$0xf] %vm399_vm0, %v576_v52  ;;  %v630_v59 = vpop.f32.mrb[5].mxu1 }
  0xff   :  { %v607_v60 = vadd.f32 %v606_v58, %v605_v55  ;;  %v608_v61 = vpop.f32.mrb[6].mxu0  ;;  %v847_v62 = vadd.f32 %v630_v59, %v629_v56  ;;  %v632_v63 = vpop.f32.mrb[6].mxu1 }
 0x100   :  { %v609_v0 = vpop.f32.mrb[7].mxu0  ;;  %v633_v1 = vpop.f32.mrb[7].mxu1 }
 0x101   :  { %v569_v2 = vpack.c.bf16 %v607_v60, %v607_v60  ;;  %v420_v3 = vsel %vm416_vm1, %v607_v60, 0.0  ;;  %v456_v4 = vmul.f32 %v607_v60, %v607_v60  ;;  %v610_v5 = vadd.f32 %v609_v0, %v608_v61 }
 0x102   :  { %v421_v6 = vadd.f32 %v420_v3, %v419_v51  ;;  %v577_v7 = vpack.c.bf16 %v847_v62, %v847_v62  ;;  %v862_v14 = vadd.f32 %v633_v1, %v632_v63  ;;  %v462_v60 = vmul.f32 %v819_v38, %v819_v38 }
 0x103   :  { %402 = vst.msk [vmem:[%s955_s2 + $0x8] sm:$0xf] %vm399_vm0, %v569_v2  ;;  %v473_v8 = vsel %vm416_vm1, %v456_v4, 0.0  ;;  %v570_v9 = vpack.c.bf16 %v610_v5, %v610_v5  ;;  %v422_v10 = vsel %vm416_vm1, %v610_v5, 0.0  ;;  %v457_v11 = vmul.f32 %v610_v5, %v610_v5 }
 0x104   :  { %v474_v12 = vadd.f32 %v473_v8, %v472_v57  ;;  %v423_v13 = vadd.f32 %v422_v10, %v421_v6  ;;  %410 = vst.msk [vmem:[%s955_s2 + $0x28] sm:$0xf] %vm399_vm0, %v577_v7  ;;  %v578_v20 = vpack.c.bf16 %v862_v14, %v862_v14  ;;  %v432_v7 = vsel %vm416_vm1, %v819_v38, 0.0 }
 0x105   :  { %403 = vst.msk [vmem:[%s955_s2 + $0xc] sm:$0xf] %vm399_vm0, %v570_v9  ;;  %v475_v15 = vsel %vm416_vm1, %v457_v11, 0.0  ;;  %v611_v16 = vpop.f32.mrb[8].mxu0  ;;  %v635_v17 = vpop.f32.mrb[8].mxu1  ;;  %v463_v8 = vmul.f32 %v823_v46, %v823_v46  ;;  %v464_v38 = vmul.f32 %v847_v62, %v847_v62 }
 0x106   :  { %v476_v18 = vadd.f32 %v475_v15, %v474_v12  ;;  %v612_v19 = vpop.f32.mrb[9].mxu0  ;;  %v636_v21 = vpop.f32.mrb[9].mxu1  ;;  %411 = vst.msk [vmem:[%s955_s2 + $0x2c] sm:$0xf] %vm399_vm0, %v578_v20  ;;  %v434_v15 = vsel %vm416_vm1, %v823_v46, 0.0  ;;  %v465_v20 = vmul.f32 %v862_v14, %v862_v14 }
 0x107   :  { %v613_v22 = vadd.f32 %v612_v19, %v611_v16  ;;  %v614_v23 = vpop.f32.mrb[10].mxu0  ;;  %v871_v24 = vadd.f32 %v636_v21, %v635_v17  ;;  %v638_v25 = vpop.f32.mrb[10].mxu1  ;;  %v436_v19 = vsel %vm416_vm1, %v847_v62, 0.0 }
 0x108   :  { %v615_v26 = vpop.f32.mrb[11].mxu0  ;;  %v639_v27 = vpop.f32.mrb[11].mxu1 }
 0x109   :  { %v571_v28 = vpack.c.bf16 %v613_v22, %v613_v22  ;;  %v424_v29 = vsel %vm416_vm1, %v613_v22, 0.0  ;;  %v458_v30 = vmul.f32 %v613_v22, %v613_v22  ;;  %v616_v31 = vadd.f32 %v615_v26, %v614_v23 }
 0x10a   :  { %v425_v32 = vadd.f32 %v424_v29, %v423_v13  ;;  %v579_v33 = vpack.c.bf16 %v871_v24, %v871_v24  ;;  %v640_v41 = vadd.f32 %v639_v27, %v638_v25  ;;  %v485_v13 = vsel %vm416_vm1, %v462_v60, 0.0 }
 0x10b   :  { %404 = vst.msk [vmem:[%s955_s2 + $0x10] sm:$0xf] %vm399_vm0, %v571_v28  ;;  %v477_v34 = vsel %vm416_vm1, %v458_v30, 0.0  ;;  %v572_v35 = vpack.c.bf16 %v616_v31, %v616_v31  ;;  %v426_v36 = vsel %vm416_vm1, %v616_v31, 0.0  ;;  %v459_v37 = vmul.f32 %v616_v31, %v616_v31 }
 0x10c   :  { %v478_v39 = vadd.f32 %v477_v34, %v476_v18  ;;  %v427_v40 = vadd.f32 %v426_v36, %v425_v32  ;;  %412 = vst.msk [vmem:[%s955_s2 + $0x30] sm:$0xf] %vm399_vm0, %v579_v33  ;;  %v580_v48 = vpack.c.bf16 %v640_v41, %v640_v41  ;;  %v487_v18 = vsel %vm416_vm1, %v463_v8, 0.0 }
 0x10d   :  { %405 = vst.msk [vmem:[%s955_s2 + $0x14] sm:$0xf] %vm399_vm0, %v572_v35  ;;  %v479_v42 = vsel %vm416_vm1, %v459_v37, 0.0  ;;  %v617_v43 = vpop.f32.mrb[12].mxu0  ;;  %v641_v44 = vpop.f32.mrb[12].mxu1  ;;  %v489_v22 = vsel %vm416_vm1, %v464_v38, 0.0  ;;  %v466_v25 = vmul.f32 %v871_v24, %v871_v24  ;;  %v467_v29 = vmul.f32 %v640_v41, %v640_v41 }
 0x10e   :  { %v480_v45 = vadd.f32 %v479_v42, %v478_v39  ;;  %v618_v47 = vpop.f32.mrb[13].mxu0  ;;  %v642_v49 = vpop.f32.mrb[13].mxu1  ;;  %413 = vst.msk [vmem:[%s955_s2 + $0x34] sm:$0xf] %vm399_vm0, %v580_v48  ;;  %v438_v23 = vsel %vm416_vm1, %v862_v14, 0.0  ;;  %v491_v28 = vsel %vm416_vm1, %v465_v20, 0.0 }
 0x10f   :  { %v619_v50 = vadd.f32 %v618_v47, %v617_v43  ;;  %v620_v51 = vpop.f32.mrb[14].mxu0  ;;  %v643_v52 = vadd.f32 %v642_v49, %v641_v44  ;;  %v644_v53 = vpop.f32.mrb[14].mxu1  ;;  %v440_v62 = vsel %vm416_vm1, %v871_v24, 0.0  ;;  %v493_v33 = vsel %vm416_vm1, %v466_v25, 0.0 }
 0x110   :  { %v621_v54 = vpop.f32.mrb[15].mxu0  ;;  %v645_v55 = vpop.f32.mrb[15].mxu1  ;;  %v442_v34 = vsel %vm416_vm1, %v640_v41, 0.0  ;;  %v495_v37 = vsel %vm416_vm1, %v467_v29, 0.0 }
 0x111   :  { %v573_v56 = vpack.c.bf16 %v619_v50, %v619_v50  ;;  %v428_v57 = vsel %vm416_vm1, %v619_v50, 0.0  ;;  %v460_v58 = vmul.f32 %v619_v50, %v619_v50  ;;  %v622_v59 = vadd.f32 %v621_v54, %v620_v51 }
 0x112   :  { %v429_v61 = vadd.f32 %v428_v57, %v427_v40  ;;  %v581_v63 = vpack.c.bf16 %v643_v52, %v643_v52  ;;  %v646_v6 = vadd.f32 %v645_v55, %v644_v53  ;;  %v468_v30 = vmul.f32 %v643_v52, %v643_v52 }
 0x113   :  { %406 = vst.msk [vmem:[%s955_s2 + $0x18] sm:$0xf] %vm399_vm0, %v573_v56  ;;  %v481_v0 = vsel %vm416_vm1, %v460_v58, 0.0  ;;  %v574_v1 = vpack.c.bf16 %v622_v59, %v622_v59  ;;  %v430_v2 = vsel %vm416_vm1, %v622_v59, 0.0  ;;  %v461_v3 = vmul.f32 %v622_v59, %v622_v59 }
 0x114   :  { %v482_v4 = vadd.f32 %v481_v0, %v480_v45  ;;  %v431_v5 = vadd.f32 %v430_v2, %v429_v61  ;;  %414 = vst.msk [vmem:[%s955_s2 + $0x38] sm:$0xf] %vm399_vm0, %v581_v63  ;;  %v582_v12 = vpack.c.bf16 %v646_v6, %v646_v6  ;;  %v444_v14 = vsel %vm416_vm1, %v643_v52, 0.0 }
 0x115   :  { %407 = vst.msk [vmem:[%s955_s2 + $0x1c] sm:$0xf] %vm399_vm0, %v574_v1  ;;  %v483_v9 = vsel %vm416_vm1, %v461_v3, 0.0  ;;  %v497_v39 = vsel %vm416_vm1, %v468_v30, 0.0  ;;  %v469_v40 = vmul.f32 %v646_v6, %v646_v6  ;;  %v446_v24 = vsel %vm416_vm1, %v646_v6, 0.0 }
 0x116   :  { %v433_v10 = vadd.f32 %v432_v7, %v431_v5  ;;  %v484_v11 = vadd.f32 %v483_v9, %v482_v4  ;;  %415 = vst.msk [vmem:[%s955_s2 + $0x3c] sm:$0xf] %vm399_vm0, %v582_v12 }
 0x117   :  { %v499_v47 = vsel %vm416_vm1, %v469_v40, 0.0 }
 0x118   :  { %v435_v16 = vadd.f32 %v434_v15, %v433_v10  ;;  %v486_v17 = vadd.f32 %v485_v13, %v484_v11 }
 0x11a   :  { %v488_v21 = vadd.f32 %v487_v18, %v486_v17  ;;  %v437_v46 = vadd.f32 %v436_v19, %v435_v16 }
 0x11c   :  { %v439_v26 = vadd.f32 %v438_v23, %v437_v46  ;;  %v490_v27 = vadd.f32 %v489_v22, %v488_v21 }
 0x11e   :  { %v441_v31 = vadd.f32 %v440_v62, %v439_v26  ;;  %v492_v32 = vadd.f32 %v491_v28, %v490_v27 }
 0x120   :  { %v494_v35 = vadd.f32 %v493_v33, %v492_v32  ;;  %v443_v36 = vadd.f32 %v442_v34, %v441_v31 }
 0x122   :  { %v496_v42 = vadd.f32 %v495_v37, %v494_v35  ;;  %v445_v43 = vadd.f32 %v444_v14, %v443_v36 }
 0x124   :  { %v498_v44 = vadd.f32 %v497_v39, %v496_v42  ;;  %v447_v45 = vadd.f32 %v446_v24, %v445_v43 }
 0x126   :  { %v448_v48 = vrot.slane %v447_v45, 4  ;;  %v500_v49 = vadd.f32 %v499_v47, %v498_v44 }
 0x128   :  { %v449_v41 = vadd.f32 %v448_v48, %v447_v45  ;;  %v501_v50 = vrot.slane %v500_v49, 4 }
 0x12a   :  { %v450_v51 = vrot.slane %v449_v41, 2  ;;  %v502_v52 = vadd.f32 %v501_v50, %v500_v49 }
 0x12c   :  { %v451_v53 = vadd.f32 %v450_v51, %v449_v41  ;;  %v503_v54 = vrot.slane %v502_v52, 2 }
 0x12e   :  { %v452_v55 = vrot.slane %v451_v53, 1  ;;  %v504_v56 = vadd.f32 %v503_v54, %v502_v52 }
 0x130   :  { %v505_v57 = vrot.slane %v504_v56, 1  ;;  %v453_v58 = vadd.f32 %v452_v55, %v451_v53 }
 0x132   :  { %v506_v59 = vadd.f32 %v505_v57, %v504_v56 }
 0x134   :  { %v508_v60 = vsel %vm507_vm2, %v453_v58, %v506_v59 }
 0x135   :  { %510 = vst.msk [vmem:[%s956_s3] sm:$0x3] %vm509_vm3, %v508_v60 }

// kernel: stage1_d_sty_v2_forward.8
= control target key start
LH: loop header
LB: loop body
LE: loop exit
PB: predicated region body
PF: predicated region fallthrough
CT: control target
= control target key end

     0   :  { %vm432_vm0 = vcmask 519168   ;;  %vm437_vm1 = vcmask 523264   ;;  %vm468_vm2 = vcmask 1040384   ;;  %vm470_vm3 = vcmask 517120   ;;  %s795_s1 = inlined_call_operand.vmem [shape: bf16[512,64], index: 1, kind: input, shape index: {}]   ;;  %s796_s0 = inlined_call_operand.vmem [shape: bf16[32,512], index: 0, kind: input, shape index: {}]   ;;  %s797_s2 = inlined_call_operand.vmem [shape: bf16[32,64], index: 2, kind: output, shape index: {0}]   ;;  %s798_s3 = inlined_call_operand.vmem [shape: f32[1,2,64], index: 3, kind: output, shape index: {1}]  }
   0x1   :  { %v584_v0 = vld [vmem:[%s795_s1 + $0x40] sm:$0xff]   ;;  %v588_v4 = vld [vmem:[%s795_s1 + $0x48] sm:$0xff]   ;;  %v592_v8 = vld [vmem:[%s795_s1 + $0x50] sm:$0xff]  }
   0x2   :  { %v585_v1 = vld [vmem:[%s795_s1 + $0xc0] sm:$0xff]   ;;  %528 = vmatprep.subr.bf16.mxu0 %v584_v0  ;;  %v589_v5 = vld [vmem:[%s795_s1 + $0xc8] sm:$0xff]   ;;  %v593_v9 = vld [vmem:[%s795_s1 + $0xd0] sm:$0xff]  }
   0x3   :  { %v586_v2 = vld [vmem:[%s795_s1] sm:$0xff]   ;;  %556 = vmatprep.subr.bf16.mxu1 %v585_v1  ;;  %v590_v6 = vld [vmem:[%s795_s1 + $0x8] sm:$0xff]   ;;  %v594_v10 = vld [vmem:[%s795_s1 + $0x10] sm:$0xff]  }
   0x4   :  { %v587_v3 = vld [vmem:[%s795_s1 + $0x80] sm:$0xff]   ;;  %529 = vmatpush3.bf16.msra.mxu0 %v586_v2  ;;  %v591_v7 = vld [vmem:[%s795_s1 + $0x88] sm:$0xff]   ;;  %v595_v11 = vld [vmem:[%s795_s1 + $0x90] sm:$0xff]  }
   0x5   :  { %557 = vmatpush3.bf16.msra.mxu1 %v587_v3  ;;  %530 = vmatprep.subr.bf16.mxu0 %v588_v4  ;;  %v596_v12 = vld [vmem:[%s795_s1 + $0x58] sm:$0xff]   ;;  %v600_v16 = vld [vmem:[%s795_s1 + $0x60] sm:$0xff]   ;;  %v604_v20 = vld [vmem:[%s795_s1 + $0x68] sm:$0xff]  }
   0x6   :  { %558 = vmatprep.subr.bf16.mxu1 %v589_v5  ;;  %v597_v13 = vld [vmem:[%s795_s1 + $0xd8] sm:$0xff]   ;;  %v601_v17 = vld [vmem:[%s795_s1 + $0xe0] sm:$0xff]   ;;  %v605_v21 = vld [vmem:[%s795_s1 + $0xe8] sm:$0xff]  }
   0x7   :  { %v598_v14 = vld [vmem:[%s795_s1 + $0x18] sm:$0xff]   ;;  %v602_v18 = vld [vmem:[%s795_s1 + $0x20] sm:$0xff]   ;;  %v606_v22 = vld [vmem:[%s795_s1 + $0x28] sm:$0xff]  }
   0x8   :  { %531 = vmatpush3.bf16.msra.mxu0 %v590_v6  ;;  %v599_v15 = vld [vmem:[%s795_s1 + $0x98] sm:$0xff]   ;;  %v603_v19 = vld [vmem:[%s795_s1 + $0xa0] sm:$0xff]   ;;  %v607_v23 = vld [vmem:[%s795_s1 + $0xa8] sm:$0xff]  }
   0x9   :  { %559 = vmatpush3.bf16.msra.mxu1 %v591_v7  ;;  %532 = vmatprep.subr.bf16.mxu0 %v592_v8  ;;  %v608_v24 = vld [vmem:[%s795_s1 + $0x70] sm:$0xff]   ;;  %v612_v28 = vld [vmem:[%s795_s1 + $0x78] sm:$0xff]  }
   0xa   :  { %560 = vmatprep.subr.bf16.mxu1 %v593_v9  ;;  %v609_v25 = vld [vmem:[%s795_s1 + $0xf0] sm:$0xff]   ;;  %v613_v29 = vld [vmem:[%s795_s1 + $0xf8] sm:$0xff]  }
   0xb   :  { %v610_v26 = vld [vmem:[%s795_s1 + $0x30] sm:$0xff]   ;;  %v614_v30 = vld [vmem:[%s795_s1 + $0x38] sm:$0xff]  }
   0xc   :  { %533 = vmatpush3.bf16.msra.mxu0 %v594_v10  ;;  %v611_v27 = vld [vmem:[%s795_s1 + $0xb0] sm:$0xff]   ;;  %v615_v31 = vld [vmem:[%s795_s1 + $0xb8] sm:$0xff]  }
   0xd   :  { %561 = vmatpush3.bf16.msra.mxu1 %v595_v11  ;;  %534 = vmatprep.subr.bf16.mxu0 %v596_v12  ;;  %v616_v32 = vld [vmem:[%s796_s0] ss:$16 sps:$4 sm:$0xff]   ;;  %v618_v33 = vld [vmem:[%s796_s0 + $0x4] ss:$16 sps:$4 sm:$0xff]   ;;  %v619_v34 = vld [vmem:[%s796_s0 + $0x8] ss:$16 sps:$4 sm:$0xff]  }
   0xe   :  { %562 = vmatprep.subr.bf16.mxu1 %v597_v13  ;;  %v621_v35 = vld [vmem:[%s796_s0 + $0xc] ss:$16 sps:$4 sm:$0xff]   ;;  %350 = vmatprep.mubr.bf16.mxu0 %v618_v33  ;;  %v622_v36 = vld [vmem:[%s796_s0 + $0x24] ss:$16 sps:$4 sm:$0xff]   ;;  %v626_v38 = vld [vmem:[%s796_s0 + $0x20] ss:$16 sps:$4 sm:$0xff]  }
   0xf   :  { %399 = vmatprep.mubr.bf16.mxu1 %v621_v35  ;;  %v624_v37 = vld [vmem:[%s796_s0 + $0x2c] ss:$16 sps:$4 sm:$0xff]   ;;  %v627_v39 = vld [vmem:[%s796_s0 + $0x28] ss:$16 sps:$4 sm:$0xff]  }
  0x10   :  { %535 = vmatpush3.bf16.msra.mxu0 %v598_v14 }
  0x11   :  { %563 = vmatpush3.bf16.msra.mxu1 %v599_v15  ;;  %536 = vmatprep.subr.bf16.mxu0 %v600_v16 }
  0x12   :  { %564 = vmatprep.subr.bf16.mxu1 %v601_v17 }
  0x14   :  { %537 = vmatpush3.bf16.msra.mxu0 %v602_v18 }
  0x15   :  { %565 = vmatpush3.bf16.msra.mxu1 %v603_v19  ;;  %538 = vmatprep.subr.bf16.mxu0 %v604_v20 }
  0x16   :  { %566 = vmatprep.subr.bf16.mxu1 %v605_v21 }
  0x18   :  { %539 = vmatpush3.bf16.msra.mxu0 %v606_v22 }
  0x19   :  { %567 = vmatpush3.bf16.msra.mxu1 %v607_v23  ;;  %540 = vmatprep.subr.bf16.mxu0 %v608_v24 }
  0x1a   :  { %568 = vmatprep.subr.bf16.mxu1 %v609_v25 }
  0x1c   :  { %541 = vmatpush3.bf16.msra.mxu0 %v610_v26 }
  0x1d   :  { %569 = vmatpush3.bf16.msra.mxu1 %v611_v27  ;;  %542 = vmatprep.subr.bf16.mxu0 %v612_v28 }
  0x1e   :  { %570 = vmatprep.subr.bf16.mxu1 %v613_v29 }
  0x20   :  { %543 = vmatpush3.bf16.msra.mxu0 %v614_v30 }
  0x21   :  { %571 = vmatpush3.bf16.msra.mxu1 %v615_v31 }
  0x23   :  { %351 = vmatmul.mubr.bf16.vlgmr.msra.gmra.mrb[0].mxu0 %v616_v32 }
  0x24   :  { %400 = vmatmul.mubr.bf16.vlgmr.msra.gmra.mrb[0].mxu1 %v619_v34  ;;  %358 = vmatprep.mubr.bf16.mxu0 %v622_v36 }
  0x25   :  { %407 = vmatprep.mubr.bf16.mxu1 %v624_v37 }
  0x2b   :  { %359 = vmatmul.mubr.bf16.gmra.mrb[4].mxu0 %v626_v38 }
  0x2c   :  { %408 = vmatmul.mubr.bf16.gmra.mrb[4].mxu1 %v627_v39 }
  0xf6   :  { %v544_v40 = vpop.f32.mrb[0].mxu0 }
  0xf7   :  { %v572_v41 = vpop.f32.mrb[0].mxu1  ;;  %v545_v42 = vpop.f32.mrb[1].mxu0 }
  0xf8   :  { %v546_v43 = vadd.f32 %v545_v42, %v544_v40  ;;  %v573_v44 = vpop.f32.mrb[1].mxu1  ;;  %v547_v45 = vpop.f32.mrb[2].mxu0 }
  0xf9   :  { %v574_v46 = vadd.f32 %v573_v44, %v572_v41  ;;  %v575_v47 = vpop.f32.mrb[2].mxu1  ;;  %v548_v48 = vpop.f32.mrb[3].mxu0 }
  0xfa   :  { %v549_v49 = vadd.f32 %v548_v48, %v547_v45  ;;  %v576_v50 = vpop.f32.mrb[3].mxu1 }
  0xfb   :  { %v402_v51 = vadd.f32 %v574_v46, %v546_v43  ;;  %v577_v52 = vadd.f32 %v576_v50, %v575_v47 }
  0xfd   :  { %v524_v53 = vpack.c.bf16 %v402_v51, %v402_v51  ;;  %v451_v54 = vmul.f32 %v402_v51, %v402_v51  ;;  %v405_v55 = vadd.f32 %v577_v52, %v549_v49  ;;  %v438_v57 = vsel %vm437_vm1, %v402_v51, 0.0 }
  0xfe   :  { %v550_v56 = vpop.f32.mrb[4].mxu0 }
  0xff   :  { %433 = vst.msk [vmem:[%s797_s2] sm:$0xf] %vm432_vm0, %v524_v53  ;;  %v525_v58 = vpack.c.bf16 %v405_v55, %v405_v55  ;;  %v439_v59 = vsel %vm437_vm1, %v405_v55, 0.0  ;;  %v452_v60 = vmul.f32 %v405_v55, %v405_v55  ;;  %v578_v61 = vpop.f32.mrb[4].mxu1  ;;  %v551_v62 = vpop.f32.mrb[5].mxu0  ;;  %v455_v3 = vsel %vm437_vm1, %v451_v54, 0.0 }
 0x100   :  { %v440_v63 = vadd.f32 %v439_v59, %v438_v57  ;;  %v552_v0 = vadd.f32 %v551_v62, %v550_v56  ;;  %v579_v1 = vpop.f32.mrb[5].mxu1  ;;  %v553_v2 = vpop.f32.mrb[6].mxu0 }
 0x101   :  { %434 = vst.msk [vmem:[%s797_s2 + $0x4] sm:$0xf] %vm432_vm0, %v525_v58  ;;  %v456_v4 = vsel %vm437_vm1, %v452_v60, 0.0  ;;  %v580_v5 = vadd.f32 %v579_v1, %v578_v61  ;;  %v581_v6 = vpop.f32.mrb[6].mxu1  ;;  %v554_v7 = vpop.f32.mrb[7].mxu0 }
 0x102   :  { %v457_v8 = vadd.f32 %v456_v4, %v455_v3  ;;  %v555_v9 = vadd.f32 %v554_v7, %v553_v2  ;;  %v582_v10 = vpop.f32.mrb[7].mxu1 }
 0x103   :  { %v410_v11 = vadd.f32 %v580_v5, %v552_v0  ;;  %v583_v12 = vadd.f32 %v582_v10, %v581_v6 }
 0x105   :  { %v526_v13 = vpack.c.bf16 %v410_v11, %v410_v11  ;;  %v441_v14 = vsel %vm437_vm1, %v410_v11, 0.0  ;;  %v453_v15 = vmul.f32 %v410_v11, %v410_v11  ;;  %v413_v16 = vadd.f32 %v583_v12, %v555_v9 }
 0x106   :  { %v442_v17 = vadd.f32 %v441_v14, %v440_v63 }
 0x107   :  { %435 = vst.msk [vmem:[%s797_s2 + $0x8] sm:$0xf] %vm432_vm0, %v526_v13  ;;  %v458_v18 = vsel %vm437_vm1, %v453_v15, 0.0  ;;  %v527_v19 = vpack.c.bf16 %v413_v16, %v413_v16  ;;  %v443_v20 = vsel %vm437_vm1, %v413_v16, 0.0  ;;  %v454_v21 = vmul.f32 %v413_v16, %v413_v16 }
 0x108   :  { %v459_v22 = vadd.f32 %v458_v18, %v457_v8  ;;  %v444_v23 = vadd.f32 %v443_v20, %v442_v17 }
 0x109   :  { %436 = vst.msk [vmem:[%s797_s2 + $0xc] sm:$0xf] %vm432_vm0, %v527_v19  ;;  %v460_v24 = vsel %vm437_vm1, %v454_v21, 0.0 }
 0x10a   :  { %v445_v25 = vrot.slane %v444_v23, 4  ;;  %v461_v26 = vadd.f32 %v460_v24, %v459_v22 }
 0x10c   :  { %v446_v27 = vadd.f32 %v445_v25, %v444_v23  ;;  %v462_v28 = vrot.slane %v461_v26, 4 }
 0x10e   :  { %v447_v29 = vrot.slane %v446_v27, 2  ;;  %v463_v30 = vadd.f32 %v462_v28, %v461_v26 }
 0x110   :  { %v448_v31 = vadd.f32 %v447_v29, %v446_v27  ;;  %v464_v32 = vrot.slane %v463_v30, 2 }
 0x112   :  { %v449_v33 = vrot.slane %v448_v31, 1  ;;  %v465_v34 = vadd.f32 %v464_v32, %v463_v30 }
 0x114   :  { %v466_v35 = vrot.slane %v465_v34, 1  ;;  %v450_v36 = vadd.f32 %v449_v33, %v448_v31 }
 0x116   :  { %v467_v37 = vadd.f32 %v466_v35, %v465_v34 }
 0x118   :  { %v469_v38 = vsel %vm468_vm2, %v450_v36, %v467_v37 }
 0x119   :  { %471 = vst.msk [vmem:[%s798_s3] sm:$0x3] %vm470_vm3, %v469_v38 }

// kernel: stage1_d_sty_v2_forward.9
= control target key start
LH: loop header
LB: loop body
LE: loop exit
PB: predicated region body
PF: predicated region fallthrough
CT: control target
= control target key end

     0   :  { %8 = vsyncpa [#allocation3], 0  ;;  %s547_s0 = inlined_call_operand.vmem [shape: bf16[2,4,4,64], index: 0, kind: input, shape index: {}]   ;;  %s548_s1 = inlined_call_operand.vmem [shape: f32[1,64], index: 1, kind: input, shape index: {}]   ;;  %s549_s2 = inlined_call_operand.vmem [shape: f32[1,64], index: 2, kind: input, shape index: {}]   ;;  %s550_s3 = inlined_call_operand.hbm [shape: f32[2,4,64], index: 3, kind: output, shape index: {}]  }
   0x1   :  { %10 = vsyncpa [#allocation3 + $0x1], 0  ;;  %s432_s12 = smov 0   ;;  %s434_s13 = smov 0  }
   0x2   :  { %s436_s14 = smov 0   ;;  %s438_s15 = smov 0  }
   0x3 LB: > { %s453_s16 = sadd.s32 4294967295, %s409_s15   ;;  %s294_s17 = sadd.s32 4294967294, %s409_s15   ;;  %s409_s15 = sphi %s438_s15, %s556_s15   ;;  %s405_s14 = sphi %s436_s14, %s555_s14   ;;  %s401_s13 = sphi %s434_s13, %s554_s13   ;;  %s397_s12 = sphi %s432_s12, %s553_s12  }
   0x4   : > { %s457_s18 = sadd.s32 1, %s409_s15   ;;  %s91_s19 = sadd.s32 1, %s405_s14 }
   0x5   : > { %s88_s20 = ssub.s32 %s409_s15, %s457_s18  ;;  %p101_p0 = scmp.ne.s32.totalorder %s405_s14, %s401_s13 }
   0x6   : > { %p89_p1 = scmp.eq.s32.totalorder %s88_s20, 0  ;;  %p102_p2 = scmp.eq.s32.totalorder %s453_s16, 1 }
   0x7   : > { %p107_p3 = scmp.ne.s32.totalorder %s401_s13, %s397_s12  ;;  %p108_p4 = scmp.eq.s32.totalorder %s294_s17, 1 }
   0x8   : > { %s468_s21 = scalar_select %p89_p1, %s405_s14, %s91_s19  }
   0x9   : > { %p470_p5 = por %p102_p2, %p101_p0  ;;  %p474_p6 = por %p108_p4, %p107_p3 }
   0xa   : > { %p297_p7 = scmp.ge.s32.totalorder %s409_s15, 1  ;;  %p140_p8 = scmp.lt.s32.totalorder %s409_s15, 3 }
   0xc   : > { %p141_p9 = pnand %p297_p7, %p140_p8 }
   0xd   : > { %p164_p10 = scmp.lt.s32.totalorder (!%p141_p9), %s453_s16, 1  ;;  %v301_v0 = vld [vmem:[%s548_s1] ss:$0 sm:$0xff] (!%p141_p9)  ;;  %s161_s6 = sand.u32 (!%p141_p9), 1, %s401_s13   ;;  %vm211_vm0 = vcmask (!%p141_p9), 519168  }
   0xe   : > { %144 = sbr.rel (%p141_p9) target bundleno = 59 (0x3b), region = 32  ;;  %v302_v9 = vld [vmem:[%s549_s2] ss:$0 sm:$0xff] (!%p141_p9)  ;;  %s298_s7 = sshll.u32 (!%p141_p9), %s161_s6, 2 }
   0xf   : > { %s163_s8 = scalar_lea.vmem (!%p141_p9), [#allocation2], %s298_s7  ;;  %s304_s10 = sshll.u32 (!%p141_p9), %s453_s16, 6 }
  0x10   : > { %s235_s9 = sshll.u32 (!%p141_p9), %s163_s8, 4  ;;  %s504_s19 = scalar_lea.hbm (!%p141_p9), %s550_s3, %s304_s10  ;;  %s499_s9 = int_to_ptr.vmem [resolvable:$true] %s235_s9 }
  0x11   : > { %s222_s20 = scalar_lea.sflag (!%p141_p9), [#allocation3], %s161_s6 }
  0x15   : > { %s165_s24 = scalar_select %p164_p10, %s453_s16, 1 }
  0x16   : > { %s411_s16 = smov [#allocation2]  }
  0x17   : > { %s307_s25 = sshll.u32 %s165_s24, 3  ;;  %s347_s24 = scalar_lea.vmem %s499_s9, 64 }
  0x18   : > { %s168_s28 = scalar_lea.vmem %s547_s0, %s307_s25  ;;  %p348_p11 = scmp.ne.s32.totalorder %s499_s9, %s347_s24 }
  0x19   : > { %v169_v1 = vld [vmem:[%s168_s28] sm:$0x3]  ;;  %v170_v2 = vld [vmem:[%s168_s28 + $0x2] sm:$0x3]  ;;  %v171_v3 = vld [vmem:[%s168_s28 + $0x4] sm:$0x3] }
  0x1a   : > { %v172_v4 = vld [vmem:[%s168_s28 + $0x6] sm:$0x3]  ;;  %v173_v5 = vunpack.c.l.bf16 %v169_v1  ;;  %v174_v6 = vunpack.c.l.bf16 %v170_v2  ;;  %v175_v7 = vunpack.c.l.bf16 %v171_v3  ;;  %p349_p12 = pnand %p348_p11, %p470_p5  ;;  %s351_s25 = sshll.u32 %s411_s16, 4  ;;  %s352_s25 = int_to_ptr.vmem [resolvable:$false] %s351_s25 }
  0x1b   : > { %v176_v8 = vunpack.c.l.bf16 %v172_v4  ;;  %s353_s26 = scalar_lea.vmem %s352_s25, 128  ;;  %p354_p0 = scmp.lt.s32.totalorder %s499_s9, %s352_s25 }
  0x1c   : > { %v184_v10 = vmul.f32 %v301_v0, %v173_v5  ;;  %v185_v11 = vmul.f32 %v301_v0, %v174_v6  ;;  %v186_v12 = vmul.f32 %v301_v0, %v175_v7  ;;  %p350_p13 = pneg %p349_p12  ;;  %p355_p1 = scmp.lt.s32.totalorder %s353_s26, %s347_s24 }
  0x1d   : > { %v187_v13 = vmul.f32 %v301_v0, %v176_v8 }
  0x1e   : > { %v195_v14 = vadd.f32 %v302_v9, %v184_v10  ;;  %v196_v15 = vadd.f32 %v302_v9, %v185_v11  ;;  %v197_v16 = vadd.f32 %v302_v9, %v186_v12  ;;  %p356_p2 = por %p355_p1, %p354_p0 }
  0x1f   : > { %v198_v17 = vadd.f32 %v302_v9, %v187_v13 }
  0x20   : > { %vm199_vm1 = vcmp.gt.f32.partialorder %v195_v14, 0.0  ;;  %vm200_vm2 = vcmp.gt.f32.partialorder %v196_v15, 0.0  ;;  %vm201_vm3 = vcmp.gt.f32.partialorder %v197_v16, 0.0  ;;  %v203_v18 = vmul.f32 0.2, %v195_v14  ;;  %p357_p3 = pnand %p356_p2, %p350_p13 }
  0x21   : > { %vm202_vm4 = vcmp.gt.f32.partialorder %v198_v17, 0.0  ;;  %v204_v19 = vmul.f32 0.2, %v196_v15  ;;  %v205_v20 = vmul.f32 0.2, %v197_v16 }
  0x22   : > { %v206_v21 = vmul.f32 0.2, %v198_v17  ;;  %v207_v22 = vsel %vm199_vm1, %v195_v14, %v203_v18 }
  0x23   : > { %v208_v23 = vsel %vm200_vm2, %v196_v15, %v204_v19  ;;  %v209_v24 = vsel %vm201_vm3, %v197_v16, %v205_v20  ;;  %v212_v25 = vsel %vm211_vm0, %v207_v22, 0.0 }
  0x24   : > { %v210_v26 = vsel %vm202_vm4, %v198_v17, %v206_v21  ;;  %v213_v27 = vsel %vm211_vm0, %v208_v23, 0.0  ;;  %v215_v28 = vsel %vm211_vm0, %v209_v24, 0.0 }
  0x25   : > { %v214_v29 = vadd.f32 %v213_v27, %v212_v25  ;;  %v217_v30 = vsel %vm211_vm0, %v210_v26, 0.0 }
  0x27   : > { %v216_v31 = vadd.f32 %v215_v28, %v214_v29 }
  0x29   : > { %v218_v32 = vadd.f32 %v217_v30, %v216_v31 }
  0x2b   : > { %v219_v33 = vmul.f32 0.25, %v218_v32 }
  0x2d   : > { %220 = vst.msk [vmem:[%s163_s8] sm:$0xf] %vm211_vm0, %v219_v33 }
  0x2e   : > { %360 = shalt.err (!%p357_p3)
}
  0x2f   : > { %s361_s27 = scalar_lea.hbm %s504_s19, 64  ;;  %s365_s30 = scalar_lea.hbm %s550_s3, 128 }
  0x30   : > { %p362_p4 = scmp.ne.s32.totalorder %s504_s19, %s361_s27  ;;  %p366_p9 = scmp.lt.u32.totalorder %s504_s19, %s550_s3 }
  0x31   : > { %p367_p10 = scmp.lt.u32.totalorder %s365_s30, %s361_s27  ;;  %p369_p12 = scmp.lt.u32.totalorder %s361_s27, %s504_s19 }
  0x32   : > { %p363_p7 = pnand %p362_p4, %p470_p5 }
  0x33   : > { %p368_p11 = por %p367_p10, %p366_p9 }
  0x34   : > { %p364_p8 = pneg %p363_p7 }
  0x35   : > { %p370_p13 = por %p369_p12, %p368_p11 }
  0x37   : > { %p371_p0 = pnand %p370_p13, %p364_p8 }
  0x39   : > { %374 = shalt.err (!%p371_p0)
}
  0x3a   : > { %308 = dma.vmem_to_hbm [thread:$0]  (%p470_p5), %s499_s9, 64, %s504_s19, %s222_s20  }
  0x3b PF: > { %p314_p1 = scmp.ge.s32.totalorder %s409_s15, 2  ;;  %s247_s6 = sand.u32 1, %s397_s12  }
  0x3c   : > { %s248_s7 = scalar_lea.sflag [#allocation3], %s247_s6 }
  0x3d   : > { %p311_p2 = pnand %p314_p1, %p474_p6 }
  0x3f   : > { %392 = dma.done.wait (!%p311_p2), %s248_s7, 64  }
  0x40   : > { %394 = vsyncadd (!%p311_p2), %s248_s7, 4294967232  ;;  %p13_p3 = scmp.ge.s32.totalorder %s457_s18, 4   ;;  %s553_s12 = smov %s401_s13 }
  0x41   : > { %s554_s13 = smov %s405_s14  ;;  %s555_s14 = smov %s468_s21 }
  0x42   : > { %s556_s15 = smov %s457_s18  ;;  %15 = sbr.rel (!%p13_p3) target bundleno = 3 (0x3), region = 67 }
  0x49   :  { %253 = vsyncpa [#allocation3], 1 }
  0x4a   :  { %255 = vsyncpa [#allocation3 + $0x1], 1 }

</bundles_post_ra>
